<compile_context>
chip_gen: v7x
topology: tpu7x:2x2x1
jax: 0.10.0
libtpu: 0.0.40
codegen_flags: <defaults>
</compile_context>

<pallas_src>
import functools

import jax
import jax.numpy as jnp
from jax.experimental import pallas as pl
from jax.experimental.pallas import tpu as pltpu


NUM_FEATURES = 256   # PatchSampleF(num_features=256)
L2_EPS = 1e-7        # Normalize: x / (||x||_2 + 1e-7)
MAX_HW_TILE = 2048   # HW tile bound for the gather path (keeps VMEM small)


def _pick_hw_tile(hw, max_tile=MAX_HW_TILE):
    """Largest divisor of hw that is <= max_tile and a multiple of 8 (else hw)."""
    if hw <= max_tile:
        return hw
    for t in range(max_tile, 7, -1):
        if t % 8 == 0 and hw % t == 0:
            return t
    return hw


# ----------------------------------------------------------------------------
# Kernel A (num_patches > 0): MXU one-hot gather over HW tiles + MLP + L2 norm
# ----------------------------------------------------------------------------
def _gather_kernel(*refs, hw_tile, use_mlp):
    if use_mlp:
        pid_ref, feat_ref, w1_ref, b1_ref, w2_ref, b2_ref, o_ref, acc_ref = refs
    else:
        pid_ref, feat_ref, o_ref, acc_ref = refs
        w1_ref = b1_ref = w2_ref = b2_ref = None

    k = pl.program_id(1)

    @pl.when(k == 0)
    def _():
        acc_ref[...] = jnp.zeros_like(acc_ref)

    # Row gather on the MXU: onehot(P, tile) @ feat(tile, C) accumulates the
    # sampled rows; padded / non-matching positions contribute exact zeros.
    pid = pid_ref[...]                                              # (P, 1) int32
    cols = k * hw_tile + jax.lax.broadcasted_iota(
        jnp.int32, (pid.shape[0], hw_tile), 1)
    onehot = (cols == pid).astype(jnp.float32)                      # (P, tile)
    acc_ref[...] += jnp.dot(onehot, feat_ref[0],
                            preferred_element_type=jnp.float32)     # (P, C)

    @pl.when(k == pl.num_programs(1) - 1)
    def _():
        x = acc_ref[...]                                            # (P, C)
        if use_mlp:
            h = jnp.dot(x, w1_ref[...],
                        preferred_element_type=jnp.float32) + b1_ref[...]
            h = jnp.maximum(h, 0.0)
            x = jnp.dot(h, w2_ref[...],
                        preferred_element_type=jnp.float32) + b2_ref[...]
        # Normalize(power=2) over the feature axis: x / (||x||_2 + 1e-7)
        norm = jnp.sqrt(jnp.sum(x * x, axis=-1, keepdims=True))
        o_ref[0] = (x / (norm + L2_EPS)).astype(o_ref.dtype)


def _gather_call(feat_r, patch_id, mlp, use_mlp):
    """feat_r: (B, HW, C) f32, patch_id: (P,) int32 -> (B, P, nout)."""
    B, HW, C = feat_r.shape
    P = patch_id.shape[0]
    nout = mlp[0].shape[1] if use_mlp else C
    hw_tile = _pick_hw_tile(HW)
    K = HW // hw_tile

    inputs = [patch_id.reshape(P, 1).astype(jnp.int32), feat_r]
    in_specs = [
        pl.BlockSpec((P, 1), lambda b, k: (0, 0)),
        pl.BlockSpec((1, hw_tile, C), lambda b, k: (b, k, 0)),
    ]
    if use_mlp:
        w1, b1, w2, b2 = mlp
        inputs += [w1, b1.reshape(1, -1), w2, b2.reshape(1, -1)]
        in_specs += [
            pl.BlockSpec(w1.shape, lambda b, k: (0, 0)),
            pl.BlockSpec((1, nout), lambda b, k: (0, 0)),
            pl.BlockSpec(w2.shape, lambda b, k: (0, 0)),
            pl.BlockSpec((1, nout), lambda b, k: (0, 0)),
        ]

    kernel = functools.partial(_gather_kernel, hw_tile=hw_tile, use_mlp=use_mlp)
    return pl.pallas_call(
        kernel,
        out_shape=jax.ShapeDtypeStruct((B, P, nout), jnp.float32),
        grid=(B, K),
        in_specs=in_specs,
        out_specs=pl.BlockSpec((1, P, nout), lambda b, k: (b, 0, 0)),
        scratch_shapes=[pltpu.VMEM((P, C), jnp.float32)],
        compiler_params=pltpu.CompilerParams(
            dimension_semantics=("parallel", "arbitrary")),
    )(*inputs)


# ----------------------------------------------------------------------------
# Kernel B (num_patches == 0): MLP + L2 normalisation over the HW axis
# ----------------------------------------------------------------------------
def _dense_kernel(*refs, use_mlp):
    if use_mlp:
        feat_ref, w1_ref, b1_ref, w2_ref, b2_ref, o_ref = refs
    else:
        feat_ref, o_ref = refs
        w1_ref = b1_ref = w2_ref = b2_ref = None

    x = feat_ref[0]                                                 # (HW, C)
    if use_mlp:
        h = jnp.dot(x, w1_ref[...],
                    preferred_element_type=jnp.float32) + b1_ref[...]
        h = jnp.maximum(h, 0.0)
        x = jnp.dot(h, w2_ref[...],
                    preferred_element_type=jnp.float32) + b2_ref[...]
    # torch: x.pow(2).sum(1, keepdim=True) on (B, HW, C) -> reduce over HW.
    norm = jnp.sqrt(jnp.sum(x * x, axis=0, keepdims=True))
    o_ref[0] = (x / (norm + L2_EPS)).astype(o_ref.dtype)


def _dense_call(feat_r, mlp, use_mlp):
    B, HW, C = feat_r.shape
    nout = mlp[0].shape[1] if use_mlp else C
    inputs = [feat_r]
    in_specs = [pl.BlockSpec((1, HW, C), lambda b: (b, 0, 0))]
    if use_mlp:
        w1, b1, w2, b2 = mlp
        inputs += [w1, b1.reshape(1, -1), w2, b2.reshape(1, -1)]
        in_specs += [
            pl.BlockSpec(w1.shape, lambda b: (0, 0)),
            pl.BlockSpec((1, nout), lambda b: (0, 0)),
            pl.BlockSpec(w2.shape, lambda b: (0, 0)),
            pl.BlockSpec((1, nout), lambda b: (0, 0)),
        ]
    kernel = functools.partial(_dense_kernel, use_mlp=use_mlp)
    return pl.pallas_call(
        kernel,
        out_shape=jax.ShapeDtypeStruct((B, HW, nout), jnp.float32),
        grid=(B,),
        in_specs=in_specs,
        out_specs=pl.BlockSpec((1, HW, nout), lambda b: (b, 0, 0)),
        compiler_params=pltpu.CompilerParams(dimension_semantics=("parallel",)),
    )(*inputs)


# ----------------------------------------------------------------------------
# PatchSampleF forward (JAX wrapper around the fused kernels)
# ----------------------------------------------------------------------------
def patch_sample_forward(feats, mlp_params, key, num_patches=64, patch_ids=None,
                         use_mlp=True):
    return_feats, return_ids = [], []
    for feat_id, feat in enumerate(feats):
        B, C, H, W = feat.shape
        HW = H * W
        # feat.permute(0, 2, 3, 1).flatten(1, 2) -> (B, H*W, C)
        feat_r = jnp.transpose(feat, (0, 2, 3, 1)).reshape(B, HW, C).astype(jnp.float32)
        mlp = mlp_params[feat_id] if use_mlp else None

        if num_patches > 0:
            if patch_ids is not None:
                patch_id = jnp.asarray(patch_ids[feat_id], dtype=jnp.int32)
            else:
                key, sub = jax.random.split(key)
                patch_id = jax.random.permutation(sub, HW)[: min(num_patches, HW)]
                patch_id = patch_id.astype(jnp.int32)
            out = _gather_call(feat_r, patch_id, mlp, use_mlp)     # (B, P, nout)
            out = out.reshape(B * out.shape[1], out.shape[2])      # flatten(0, 1)
        else:
            patch_id = jnp.zeros((0,), jnp.int32)                  # torch returns []
            out = _dense_call(feat_r, mlp, use_mlp)                # (B, HW, nout)
            nout = out.shape[2]
            # permute(0, 2, 1).reshape(B, nout, H, W)
            out = jnp.transpose(out, (0, 2, 1)).reshape(B, nout, H, W)

        return_ids.append(patch_id)
        return_feats.append(out)
    return return_feats, return_ids


def init_mlp_params(key, in_channels, num_features=NUM_FEATURES, init_gain=0.02):
    # Eager replacement for the lazy create_mlp() + initialize_weights(normal, 0.02).
    params = []
    for c in in_channels:
        key, k1, k2 = jax.random.split(key, 3)
        w1 = init_gain * jax.random.normal(k1, (c, num_features), jnp.float32)
        b1 = jnp.zeros((num_features,), jnp.float32)
        w2 = init_gain * jax.random.normal(k2, (num_features, num_features), jnp.float32)
        b2 = jnp.zeros((num_features,), jnp.float32)
        params.append((w1, b1, w2, b2))
    return params


# ----------------------------------------------------------------------------
# Pure-JAX reference (for correctness checks)
# ----------------------------------------------------------------------------
def _reference_forward(feats, mlp_params, num_patches, patch_ids, use_mlp):
    outs = []
    for i, feat in enumerate(feats):
        B, C, H, W = feat.shape
        fr = jnp.transpose(feat, (0, 2, 3, 1)).reshape(B, H * W, C)
        if num_patches > 0:
            x = fr[:, patch_ids[i], :].reshape(-1, C)
        else:
            x = fr
        if use_mlp:
            w1, b1, w2, b2 = mlp_params[i]
            hp = jax.lax.Precision.HIGHEST
            x = jnp.maximum(jnp.matmul(x, w1, precision=hp) + b1, 0.0)
            x = jnp.matmul(x, w2, precision=hp) + b2
        n = jnp.sqrt(jnp.sum(x * x, axis=1, keepdims=True))
        x = x / (n + L2_EPS)
        if num_patches == 0:
            nout = x.shape[-1]
            x = jnp.transpose(x, (0, 2, 1)).reshape(B, nout, H, W)
        outs.append(x)
    return outs


if __name__ == "__main__":
    key = jax.random.PRNGKey(0)
    kf1, kf2, kf3, kp, ks = jax.random.split(key, 5)

    # PatchSampleF receives a list of encoder feature maps.
    feats = [
        jax.random.normal(kf1, (2, 64, 16, 16), jnp.float32),   # HW = 256
        jax.random.normal(kf2, (2, 256, 8, 8), jnp.float32),    # HW = 64
        jax.random.normal(kf3, (2, 16, 64, 64), jnp.float32),   # HW = 4096 -> 2 HW tiles
    ]
    mlp_params = init_mlp_params(kp, [f.shape[1] for f in feats])

    fwd = jax.jit(patch_sample_forward, static_argnames=("num_patches", "use_mlp"))

    # --- num_patches > 0, use_mlp=True (standard CUT configuration) ---
    feats_out, ids = fwd(feats, mlp_params, ks, num_patches=64, use_mlp=True)
    jax.block_until_ready(feats_out)
    for f, i in zip(feats_out, ids):
        assert f.shape == (2 * 64, NUM_FEATURES), f.shape
        assert i.shape == (64,)
    ref = _reference_forward(feats, mlp_params, 64, ids, use_mlp=True)
    for f, r in zip(feats_out, ref):
        assert bool(jnp.all(jnp.isfinite(f)))
        rn = jnp.linalg.norm(f, axis=-1)
        assert bool(jnp.all(jnp.abs(rn - 1.0) < 1e-2)), "rows not L2-normalised"
        assert bool(jnp.allclose(f, r, atol=5e-3, rtol=5e-3)), "mismatch vs reference"

    # --- num_patches > 0, use_mlp=False (module default), reusing sampled ids ---
    feats_out2, _ = fwd(feats, None, ks, num_patches=64, patch_ids=ids, use_mlp=False)
    jax.block_until_ready(feats_out2)
    assert feats_out2[0].shape == (2 * 64, 64)
    assert feats_out2[1].shape == (2 * 64, 256)
    assert feats_out2[2].shape == (2 * 64, 16)
    ref2 = _reference_forward(feats, None, 64, ids, use_mlp=False)
    for f, r in zip(feats_out2, ref2):
        assert bool(jnp.all(jnp.isfinite(f)))
        assert bool(jnp.allclose(f, r, atol=5e-3, rtol=5e-3)), "mismatch vs reference"

    # --- num_patches == 0 path (dense, output reshaped to (B, nout, H, W)) ---
    feats_out3, ids3 = fwd(feats[:2], mlp_params[:2], ks, num_patches=0, use_mlp=True)
    jax.block_until_ready(feats_out3)
    assert feats_out3[0].shape == (2, NUM_FEATURES, 16, 16)
    assert feats_out3[1].shape == (2, NUM_FEATURES, 8, 8)
    assert ids3[0].shape == (0,) and ids3[1].shape == (0,)
    ref3 = _reference_forward(feats[:2], mlp_params[:2], 0, None, use_mlp=True)
    for f, r in zip(feats_out3, ref3):
        assert bool(jnp.all(jnp.isfinite(f)))
        assert bool(jnp.allclose(f, r, atol=5e-3, rtol=5e-3)), "mismatch vs reference"

    print("KERNEL_OK")
</pallas_src>

<mosaic_0001>
module attributes {stable_mosaic.version = 11 : i64} {
  func.func @_gather_kernel(%arg0: i32, %arg1: i32, %arg2: memref<64x1xi32, #tpu.memory_space<vmem>>, %arg3: memref<1x2048x16xf32, #tpu.memory_space<vmem>>, %arg4: memref<16x256xf32, #tpu.memory_space<vmem>>, %arg5: memref<1x256xf32, #tpu.memory_space<vmem>>, %arg6: memref<256x256xf32, #tpu.memory_space<vmem>>, %arg7: memref<1x256xf32, #tpu.memory_space<vmem>>, %arg8: memref<1x64x256xf32, #tpu.memory_space<vmem>>, %arg9: memref<64x16xf32, #tpu.memory_space<vmem>>) attributes {dimension_semantics = [#tpu.dimension_semantics<parallel>, #tpu.dimension_semantics<arbitrary>], iteration_bounds = array<i64: 2, 2>, scalar_prefetch = 0 : i64, scratch_operands = 1 : i64, tpu.core_type = #tpu.core_type<tc>, window_params = [{pipeline_mode = #tpu.pipeline_mode<synchronous>, transform_indices = @transform_0, window_bounds = array<i64: 64, 1>}, {transform_indices = @transform_1, window_bounds = array<i64: 1, 2048, 16>}, {pipeline_mode = #tpu.pipeline_mode<synchronous>, transform_indices = @transform_2, window_bounds = array<i64: 16, 256>}, {pipeline_mode = #tpu.pipeline_mode<synchronous>, transform_indices = @transform_3, window_bounds = array<i64: 1, 256>}, {pipeline_mode = #tpu.pipeline_mode<synchronous>, transform_indices = @transform_4, window_bounds = array<i64: 256, 256>}, {pipeline_mode = #tpu.pipeline_mode<synchronous>, transform_indices = @transform_5, window_bounds = array<i64: 1, 256>}, {transform_indices = @transform_6, window_bounds = array<i64: 1, 64, 256>}]} {
    %c0_i32 = arith.constant 0 : i32
    %0 = arith.cmpi eq, %arg1, %c0_i32 : i32
    %1 = arith.extui %0 : i1 to i32
    %c0_i32_0 = arith.constant 0 : i32
    %2 = arith.cmpi ne, %1, %c0_i32_0 : i32
    scf.if %2 {
      %cst_10 = arith.constant 0.000000e+00 : f32
      %21 = vector.broadcast %cst_10 : f32 to vector<64x16xf32>
      %c0_11 = arith.constant 0 : index
      %c0_12 = arith.constant 0 : index
      %22 = vector.load %arg9[%c0_11, %c0_12] : memref<64x16xf32, #tpu.memory_space<vmem>>, vector<64x16xf32>
      tpu.vector_store %arg9[%c0_11, %c0_12], %21 {strides = array<i32>} : memref<64x16xf32, #tpu.memory_space<vmem>>, vector<64x16xf32>,
    } else {
    }
    %c0 = arith.constant 0 : index
    %c0_1 = arith.constant 0 : index
    %3 = vector.load %arg2[%c0, %c0_1] : memref<64x1xi32, #tpu.memory_space<vmem>>, vector<64x1xi32>
    %c2048_i32 = arith.constant 2048 : i32
    %4 = arith.muli %arg1, %c2048_i32 : i32
    %5 = tpu.iota {dimensions = array<i32: 1>} : vector<64x2048xi32>
    %6 = vector.broadcast %4 : i32 to vector<64x2048xi32>
    %7 = arith.addi %6, %5 : vector<64x2048xi32>
    %8 = vector.broadcast %3 : vector<64x1xi32> to vector<64x2048xi32>
    %9 = arith.cmpi eq, %7, %8 : vector<64x2048xi32>
    %10 = arith.extui %9 : vector<64x2048xi1> to vector<64x2048xi32>
    %11 = arith.sitofp %10 : vector<64x2048xi32> to vector<64x2048xf32>
    %c0_2 = arith.constant 0 : index
    %c0_3 = arith.constant 0 : index
    %12 = vector.load %arg9[%c0_2, %c0_3] : memref<64x16xf32, #tpu.memory_space<vmem>>, vector<64x16xf32>
    %c0_4 = arith.constant 0 : index
    %c0_5 = arith.constant 0 : index
    %c0_6 = arith.constant 0 : index
    %13 = vector.load %arg3[%c0_4, %c0_5, %c0_6] : memref<1x2048x16xf32, #tpu.memory_space<vmem>>, vector<1x2048x16xf32>
    %14 = vector.shape_cast %13 : vector<1x2048x16xf32> to vector<2048x16xf32>
    %cst = arith.constant dense<0.000000e+00> : vector<64x16xf32>
    %15 = tpu.matmul %11, %14, %cst {dimension_numbers = #tpu.dot_dimension_numbers<[1], [0], [0], [1], [0, 0, 1, 1], [], []>} : vector<64x2048xf32>, vector<2048x16xf32>, vector<64x16xf32> -> vector<64x16xf32>
    %16 = arith.addf %12, %15 : vector<64x16xf32>
    %c0_7 = arith.constant 0 : index
    %c0_8 = arith.constant 0 : index
    %17 = vector.load %arg9[%c0_7, %c0_8] : memref<64x16xf32, #tpu.memory_space<vmem>>, vector<64x16xf32>
    tpu.vector_store %arg9[%c0_7, %c0_8], %16 {strides = array<i32>} : memref<64x16xf32, #tpu.memory_space<vmem>>, vector<64x16xf32>,
    %c1_i32 = arith.constant 1 : i32
    %18 = arith.cmpi eq, %arg1, %c1_i32 : i32
    %19 = arith.extui %18 : i1 to i32
    %c0_i32_9 = arith.constant 0 : i32
    %20 = arith.cmpi ne, %19, %c0_i32_9 : i32
    scf.if %20 {
      %c0_10 = arith.constant 0 : index
      %c0_11 = arith.constant 0 : index
      %21 = vector.load %arg9[%c0_10, %c0_11] : memref<64x16xf32, #tpu.memory_space<vmem>>, vector<64x16xf32>
      %c0_12 = arith.constant 0 : index
      %c0_13 = arith.constant 0 : index
      %22 = vector.load %arg4[%c0_12, %c0_13] : memref<16x256xf32, #tpu.memory_space<vmem>>, vector<16x256xf32>
      %cst_14 = arith.constant dense<0.000000e+00> : vector<64x256xf32>
      %23 = tpu.matmul %21, %22, %cst_14 {dimension_numbers = #tpu.dot_dimension_numbers<[1], [0], [0], [1], [0, 0, 1, 1], [], []>} : vector<64x16xf32>, vector<16x256xf32>, vector<64x256xf32> -> vector<64x256xf32>
      %c0_15 = arith.constant 0 : index
      %c0_16 = arith.constant 0 : index
      %24 = vector.load %arg5[%c0_15, %c0_16] : memref<1x256xf32, #tpu.memory_space<vmem>>, vector<1x256xf32>
      %25 = vector.broadcast %24 : vector<1x256xf32> to vector<64x256xf32>
      %26 = arith.addf %23, %25 : vector<64x256xf32>
      %cst_17 = arith.constant 0.000000e+00 : f32
      %27 = vector.broadcast %cst_17 : f32 to vector<64x256xf32>
      %28 = arith.maximumf %26, %27 : vector<64x256xf32>
      %c0_18 = arith.constant 0 : index
      %c0_19 = arith.constant 0 : index
      %29 = vector.load %arg6[%c0_18, %c0_19] : memref<256x256xf32, #tpu.memory_space<vmem>>, vector<256x256xf32>
      %cst_20 = arith.constant dense<0.000000e+00> : vector<64x256xf32>
      %30 = tpu.matmul %28, %29, %cst_20 {dimension_numbers = #tpu.dot_dimension_numbers<[1], [0], [0], [1], [0, 0, 1, 1], [], []>} : vector<64x256xf32>, vector<256x256xf32>, vector<64x256xf32> -> vector<64x256xf32>
      %c0_21 = arith.constant 0 : index
      %c0_22 = arith.constant 0 : index
      %31 = vector.load %arg7[%c0_21, %c0_22] : memref<1x256xf32, #tpu.memory_space<vmem>>, vector<1x256xf32>
      %32 = vector.broadcast %31 : vector<1x256xf32> to vector<64x256xf32>
      %33 = arith.addf %30, %32 : vector<64x256xf32>
      %34 = arith.mulf %33, %33 : vector<64x256xf32>
      %cst_23 = arith.constant dense<0.000000e+00> : vector<64xf32>
      %35 = vector.multi_reduction <add>, %34, %cst_23 [1] : vector<64x256xf32> to vector<64xf32>
      %36 = vector.shape_cast %35 : vector<64xf32> to vector<64x1xf32>
      %37 = math.sqrt %36 : vector<64x1xf32>
      %cst_24 = arith.constant 1.000000e-07 : f32
      %38 = vector.broadcast %cst_24 : f32 to vector<64x1xf32>
      %39 = arith.addf %37, %38 : vector<64x1xf32>
      %40 = vector.broadcast %39 : vector<64x1xf32> to vector<64x256xf32>
      %41 = arith.divf %33, %40 : vector<64x256xf32>
      %c0_25 = arith.constant 0 : index
      %c0_26 = arith.constant 0 : index
      %c0_27 = arith.constant 0 : index
      %42 = vector.load %arg8[%c0_25, %c0_26, %c0_27] : memref<1x64x256xf32, #tpu.memory_space<vmem>>, vector<1x64x256xf32>
      %43 = vector.shape_cast %42 : vector<1x64x256xf32> to vector<64x256xf32>
      %44 = vector.shape_cast %41 : vector<64x256xf32> to vector<1x64x256xf32>
      tpu.vector_store %arg8[%c0_25, %c0_26, %c0_27], %44 {strides = array<i32>} : memref<1x64x256xf32, #tpu.memory_space<vmem>>, vector<1x64x256xf32>,
    } else {
    }
    return
  }
  func.func @transform_0(%arg0: i32, %arg1: i32) -> (i32, i32) {
    %c0_i32 = arith.constant 0 : i32
    %c0_i32_0 = arith.constant 0 : i32
    %c0_i32_1 = arith.constant 0 : i32
    return %c0_i32, %c0_i32_0 : i32, i32
  }
  func.func @transform_1(%arg0: i32, %arg1: i32) -> (i32, i32, i32) {
    %c0_i32 = arith.constant 0 : i32
    %c0_i32_0 = arith.constant 0 : i32
    return %arg0, %arg1, %c0_i32 : i32, i32, i32
  }
  func.func @transform_2(%arg0: i32, %arg1: i32) -> (i32, i32) {
    %c0_i32 = arith.constant 0 : i32
    %c0_i32_0 = arith.constant 0 : i32
    %c0_i32_1 = arith.constant 0 : i32
    return %c0_i32, %c0_i32_0 : i32, i32
  }
  func.func @transform_3(%arg0: i32, %arg1: i32) -> (i32, i32) {
    %c0_i32 = arith.constant 0 : i32
    %c0_i32_0 = arith.constant 0 : i32
    %c0_i32_1 = arith.constant 0 : i32
    return %c0_i32, %c0_i32_0 : i32, i32
  }
  func.func @transform_4(%arg0: i32, %arg1: i32) -> (i32, i32) {
    %c0_i32 = arith.constant 0 : i32
    %c0_i32_0 = arith.constant 0 : i32
    %c0_i32_1 = arith.constant 0 : i32
    return %c0_i32, %c0_i32_0 : i32, i32
  }
  func.func @transform_5(%arg0: i32, %arg1: i32) -> (i32, i32) {
    %c0_i32 = arith.constant 0 : i32
    %c0_i32_0 = arith.constant 0 : i32
    %c0_i32_1 = arith.constant 0 : i32
    return %c0_i32, %c0_i32_0 : i32, i32
  }
  func.func @transform_6(%arg0: i32, %arg1: i32) -> (i32, i32, i32) {
    %c0_i32 = arith.constant 0 : i32
    %c0_i32_0 = arith.constant 0 : i32
    %c0_i32_1 = arith.constant 0 : i32
    return %arg0, %c0_i32, %c0_i32_0 : i32, i32, i32
  }
}

module attributes {stable_mosaic.version = 11 : i64} {
  func.func @_gather_kernel(%arg0: i32, %arg1: i32, %arg2: memref<64x1xi32, #tpu.memory_space<vmem>>, %arg3: memref<1x64x256xf32, #tpu.memory_space<vmem>>, %arg4: memref<256x256xf32, #tpu.memory_space<vmem>>, %arg5: memref<1x256xf32, #tpu.memory_space<vmem>>, %arg6: memref<256x256xf32, #tpu.memory_space<vmem>>, %arg7: memref<1x256xf32, #tpu.memory_space<vmem>>, %arg8: memref<1x64x256xf32, #tpu.memory_space<vmem>>, %arg9: memref<64x256xf32, #tpu.memory_space<vmem>>) attributes {dimension_semantics = [#tpu.dimension_semantics<parallel>, #tpu.dimension_semantics<arbitrary>], iteration_bounds = array<i64: 2, 1>, scalar_prefetch = 0 : i64, scratch_operands = 1 : i64, tpu.core_type = #tpu.core_type<tc>, window_params = [{pipeline_mode = #tpu.pipeline_mode<synchronous>, transform_indices = @transform_0, window_bounds = array<i64: 64, 1>}, {transform_indices = @transform_1, window_bounds = array<i64: 1, 64, 256>}, {pipeline_mode = #tpu.pipeline_mode<synchronous>, transform_indices = @transform_2, window_bounds = array<i64: 256, 256>}, {pipeline_mode = #tpu.pipeline_mode<synchronous>, transform_indices = @transform_3, window_bounds = array<i64: 1, 256>}, {pipeline_mode = #tpu.pipeline_mode<synchronous>, transform_indices = @transform_4, window_bounds = array<i64: 256, 256>}, {pipeline_mode = #tpu.pipeline_mode<synchronous>, transform_indices = @transform_5, window_bounds = array<i64: 1, 256>}, {transform_indices = @transform_6, window_bounds = array<i64: 1, 64, 256>}]} {
    %c0_i32 = arith.constant 0 : i32
    %0 = arith.cmpi eq, %arg1, %c0_i32 : i32
    %1 = arith.extui %0 : i1 to i32
    %c0_i32_0 = arith.constant 0 : i32
    %2 = arith.cmpi ne, %1, %c0_i32_0 : i32
    scf.if %2 {
      %cst_11 = arith.constant 0.000000e+00 : f32
      %21 = vector.broadcast %cst_11 : f32 to vector<64x256xf32>
      %c0_12 = arith.constant 0 : index
      %c0_13 = arith.constant 0 : index
      %22 = vector.load %arg9[%c0_12, %c0_13] : memref<64x256xf32, #tpu.memory_space<vmem>>, vector<64x256xf32>
      tpu.vector_store %arg9[%c0_12, %c0_13], %21 {strides = array<i32>} : memref<64x256xf32, #tpu.memory_space<vmem>>, vector<64x256xf32>,
    } else {
    }
    %c0 = arith.constant 0 : index
    %c0_1 = arith.constant 0 : index
    %3 = vector.load %arg2[%c0, %c0_1] : memref<64x1xi32, #tpu.memory_space<vmem>>, vector<64x1xi32>
    %c64_i32 = arith.constant 64 : i32
    %4 = arith.muli %arg1, %c64_i32 : i32
    %5 = tpu.iota {dimensions = array<i32: 1>} : vector<64x64xi32>
    %6 = vector.broadcast %4 : i32 to vector<64x64xi32>
    %7 = arith.addi %6, %5 : vector<64x64xi32>
    %8 = vector.broadcast %3 : vector<64x1xi32> to vector<64x64xi32>
    %9 = arith.cmpi eq, %7, %8 : vector<64x64xi32>
    %10 = arith.extui %9 : vector<64x64xi1> to vector<64x64xi32>
    %11 = arith.sitofp %10 : vector<64x64xi32> to vector<64x64xf32>
    %c0_2 = arith.constant 0 : index
    %c0_3 = arith.constant 0 : index
    %12 = vector.load %arg9[%c0_2, %c0_3] : memref<64x256xf32, #tpu.memory_space<vmem>>, vector<64x256xf32>
    %c0_4 = arith.constant 0 : index
    %c0_5 = arith.constant 0 : index
    %c0_6 = arith.constant 0 : index
    %13 = vector.load %arg3[%c0_4, %c0_5, %c0_6] : memref<1x64x256xf32, #tpu.memory_space<vmem>>, vector<1x64x256xf32>
    %14 = vector.shape_cast %13 : vector<1x64x256xf32> to vector<64x256xf32>
    %cst = arith.constant dense<0.000000e+00> : vector<64x256xf32>
    %15 = tpu.matmul %11, %14, %cst {dimension_numbers = #tpu.dot_dimension_numbers<[1], [0], [0], [1], [0, 0, 1, 1], [], []>} : vector<64x64xf32>, vector<64x256xf32>, vector<64x256xf32> -> vector<64x256xf32>
    %16 = arith.addf %12, %15 : vector<64x256xf32>
    %c0_7 = arith.constant 0 : index
    %c0_8 = arith.constant 0 : index
    %17 = vector.load %arg9[%c0_7, %c0_8] : memref<64x256xf32, #tpu.memory_space<vmem>>, vector<64x256xf32>
    tpu.vector_store %arg9[%c0_7, %c0_8], %16 {strides = array<i32>} : memref<64x256xf32, #tpu.memory_space<vmem>>, vector<64x256xf32>,
    %c0_i32_9 = arith.constant 0 : i32
    %18 = arith.cmpi eq, %arg1, %c0_i32_9 : i32
    %19 = arith.extui %18 : i1 to i32
    %c0_i32_10 = arith.constant 0 : i32
    %20 = arith.cmpi ne, %19, %c0_i32_10 : i32
    scf.if %20 {
      %c0_11 = arith.constant 0 : index
      %c0_12 = arith.constant 0 : index
      %21 = vector.load %arg9[%c0_11, %c0_12] : memref<64x256xf32, #tpu.memory_space<vmem>>, vector<64x256xf32>
      %c0_13 = arith.constant 0 : index
      %c0_14 = arith.constant 0 : index
      %22 = vector.load %arg4[%c0_13, %c0_14] : memref<256x256xf32, #tpu.memory_space<vmem>>, vector<256x256xf32>
      %cst_15 = arith.constant dense<0.000000e+00> : vector<64x256xf32>
      %23 = tpu.matmul %21, %22, %cst_15 {dimension_numbers = #tpu.dot_dimension_numbers<[1], [0], [0], [1], [0, 0, 1, 1], [], []>} : vector<64x256xf32>, vector<256x256xf32>, vector<64x256xf32> -> vector<64x256xf32>
      %c0_16 = arith.constant 0 : index
      %c0_17 = arith.constant 0 : index
      %24 = vector.load %arg5[%c0_16, %c0_17] : memref<1x256xf32, #tpu.memory_space<vmem>>, vector<1x256xf32>
      %25 = vector.broadcast %24 : vector<1x256xf32> to vector<64x256xf32>
      %26 = arith.addf %23, %25 : vector<64x256xf32>
      %cst_18 = arith.constant 0.000000e+00 : f32
      %27 = vector.broadcast %cst_18 : f32 to vector<64x256xf32>
      %28 = arith.maximumf %26, %27 : vector<64x256xf32>
      %c0_19 = arith.constant 0 : index
      %c0_20 = arith.constant 0 : index
      %29 = vector.load %arg6[%c0_19, %c0_20] : memref<256x256xf32, #tpu.memory_space<vmem>>, vector<256x256xf32>
      %cst_21 = arith.constant dense<0.000000e+00> : vector<64x256xf32>
      %30 = tpu.matmul %28, %29, %cst_21 {dimension_numbers = #tpu.dot_dimension_numbers<[1], [0], [0], [1], [0, 0, 1, 1], [], []>} : vector<64x256xf32>, vector<256x256xf32>, vector<64x256xf32> -> vector<64x256xf32>
      %c0_22 = arith.constant 0 : index
      %c0_23 = arith.constant 0 : index
      %31 = vector.load %arg7[%c0_22, %c0_23] : memref<1x256xf32, #tpu.memory_space<vmem>>, vector<1x256xf32>
      %32 = vector.broadcast %31 : vector<1x256xf32> to vector<64x256xf32>
      %33 = arith.addf %30, %32 : vector<64x256xf32>
      %34 = arith.mulf %33, %33 : vector<64x256xf32>
      %cst_24 = arith.constant dense<0.000000e+00> : vector<64xf32>
      %35 = vector.multi_reduction <add>, %34, %cst_24 [1] : vector<64x256xf32> to vector<64xf32>
      %36 = vector.shape_cast %35 : vector<64xf32> to vector<64x1xf32>
      %37 = math.sqrt %36 : vector<64x1xf32>
      %cst_25 = arith.constant 1.000000e-07 : f32
      %38 = vector.broadcast %cst_25 : f32 to vector<64x1xf32>
      %39 = arith.addf %37, %38 : vector<64x1xf32>
      %40 = vector.broadcast %39 : vector<64x1xf32> to vector<64x256xf32>
      %41 = arith.divf %33, %40 : vector<64x256xf32>
      %c0_26 = arith.constant 0 : index
      %c0_27 = arith.constant 0 : index
      %c0_28 = arith.constant 0 : index
      %42 = vector.load %arg8[%c0_26, %c0_27, %c0_28] : memref<1x64x256xf32, #tpu.memory_space<vmem>>, vector<1x64x256xf32>
      %43 = vector.shape_cast %42 : vector<1x64x256xf32> to vector<64x256xf32>
      %44 = vector.shape_cast %41 : vector<64x256xf32> to vector<1x64x256xf32>
      tpu.vector_store %arg8[%c0_26, %c0_27, %c0_28], %44 {strides = array<i32>} : memref<1x64x256xf32, #tpu.memory_space<vmem>>, vector<1x64x256xf32>,
    } else {
    }
    return
  }
  func.func @transform_0(%arg0: i32, %arg1: i32) -> (i32, i32) {
    %c0_i32 = arith.constant 0 : i32
    %c0_i32_0 = arith.constant 0 : i32
    %c0_i32_1 = arith.constant 0 : i32
    return %c0_i32, %c0_i32_0 : i32, i32
  }
  func.func @transform_1(%arg0: i32, %arg1: i32) -> (i32, i32, i32) {
    %c0_i32 = arith.constant 0 : i32
    %c0_i32_0 = arith.constant 0 : i32
    return %arg0, %arg1, %c0_i32 : i32, i32, i32
  }
  func.func @transform_2(%arg0: i32, %arg1: i32) -> (i32, i32) {
    %c0_i32 = arith.constant 0 : i32
    %c0_i32_0 = arith.constant 0 : i32
    %c0_i32_1 = arith.constant 0 : i32
    return %c0_i32, %c0_i32_0 : i32, i32
  }
  func.func @transform_3(%arg0: i32, %arg1: i32) -> (i32, i32) {
    %c0_i32 = arith.constant 0 : i32
    %c0_i32_0 = arith.constant 0 : i32
    %c0_i32_1 = arith.constant 0 : i32
    return %c0_i32, %c0_i32_0 : i32, i32
  }
  func.func @transform_4(%arg0: i32, %arg1: i32) -> (i32, i32) {
    %c0_i32 = arith.constant 0 : i32
    %c0_i32_0 = arith.constant 0 : i32
    %c0_i32_1 = arith.constant 0 : i32
    return %c0_i32, %c0_i32_0 : i32, i32
  }
  func.func @transform_5(%arg0: i32, %arg1: i32) -> (i32, i32) {
    %c0_i32 = arith.constant 0 : i32
    %c0_i32_0 = arith.constant 0 : i32
    %c0_i32_1 = arith.constant 0 : i32
    return %c0_i32, %c0_i32_0 : i32, i32
  }
  func.func @transform_6(%arg0: i32, %arg1: i32) -> (i32, i32, i32) {
    %c0_i32 = arith.constant 0 : i32
    %c0_i32_0 = arith.constant 0 : i32
    %c0_i32_1 = arith.constant 0 : i32
    return %arg0, %c0_i32, %c0_i32_0 : i32, i32, i32
  }
}

module attributes {stable_mosaic.version = 11 : i64} {
  func.func @_gather_kernel(%arg0: i32, %arg1: i32, %arg2: memref<64x1xi32, #tpu.memory_space<vmem>>, %arg3: memref<1x256x64xf32, #tpu.memory_space<vmem>>, %arg4: memref<64x256xf32, #tpu.memory_space<vmem>>, %arg5: memref<1x256xf32, #tpu.memory_space<vmem>>, %arg6: memref<256x256xf32, #tpu.memory_space<vmem>>, %arg7: memref<1x256xf32, #tpu.memory_space<vmem>>, %arg8: memref<1x64x256xf32, #tpu.memory_space<vmem>>, %arg9: memref<64x64xf32, #tpu.memory_space<vmem>>) attributes {dimension_semantics = [#tpu.dimension_semantics<parallel>, #tpu.dimension_semantics<arbitrary>], iteration_bounds = array<i64: 2, 1>, scalar_prefetch = 0 : i64, scratch_operands = 1 : i64, tpu.core_type = #tpu.core_type<tc>, window_params = [{pipeline_mode = #tpu.pipeline_mode<synchronous>, transform_indices = @transform_0, window_bounds = array<i64: 64, 1>}, {transform_indices = @transform_1, window_bounds = array<i64: 1, 256, 64>}, {pipeline_mode = #tpu.pipeline_mode<synchronous>, transform_indices = @transform_2, window_bounds = array<i64: 64, 256>}, {pipeline_mode = #tpu.pipeline_mode<synchronous>, transform_indices = @transform_3, window_bounds = array<i64: 1, 256>}, {pipeline_mode = #tpu.pipeline_mode<synchronous>, transform_indices = @transform_4, window_bounds = array<i64: 256, 256>}, {pipeline_mode = #tpu.pipeline_mode<synchronous>, transform_indices = @transform_5, window_bounds = array<i64: 1, 256>}, {transform_indices = @transform_6, window_bounds = array<i64: 1, 64, 256>}]} {
    %c0_i32 = arith.constant 0 : i32
    %0 = arith.cmpi eq, %arg1, %c0_i32 : i32
    %1 = arith.extui %0 : i1 to i32
    %c0_i32_0 = arith.constant 0 : i32
    %2 = arith.cmpi ne, %1, %c0_i32_0 : i32
    scf.if %2 {
      %cst_11 = arith.constant 0.000000e+00 : f32
      %21 = vector.broadcast %cst_11 : f32 to vector<64x64xf32>
      %c0_12 = arith.constant 0 : index
      %c0_13 = arith.constant 0 : index
      %22 = vector.load %arg9[%c0_12, %c0_13] : memref<64x64xf32, #tpu.memory_space<vmem>>, vector<64x64xf32>
      tpu.vector_store %arg9[%c0_12, %c0_13], %21 {strides = array<i32>} : memref<64x64xf32, #tpu.memory_space<vmem>>, vector<64x64xf32>,
    } else {
    }
    %c0 = arith.constant 0 : index
    %c0_1 = arith.constant 0 : index
    %3 = vector.load %arg2[%c0, %c0_1] : memref<64x1xi32, #tpu.memory_space<vmem>>, vector<64x1xi32>
    %c256_i32 = arith.constant 256 : i32
    %4 = arith.muli %arg1, %c256_i32 : i32
    %5 = tpu.iota {dimensions = array<i32: 1>} : vector<64x256xi32>
    %6 = vector.broadcast %4 : i32 to vector<64x256xi32>
    %7 = arith.addi %6, %5 : vector<64x256xi32>
    %8 = vector.broadcast %3 : vector<64x1xi32> to vector<64x256xi32>
    %9 = arith.cmpi eq, %7, %8 : vector<64x256xi32>
    %10 = arith.extui %9 : vector<64x256xi1> to vector<64x256xi32>
    %11 = arith.sitofp %10 : vector<64x256xi32> to vector<64x256xf32>
    %c0_2 = arith.constant 0 : index
    %c0_3 = arith.constant 0 : index
    %12 = vector.load %arg9[%c0_2, %c0_3] : memref<64x64xf32, #tpu.memory_space<vmem>>, vector<64x64xf32>
    %c0_4 = arith.constant 0 : index
    %c0_5 = arith.constant 0 : index
    %c0_6 = arith.constant 0 : index
    %13 = vector.load %arg3[%c0_4, %c0_5, %c0_6] : memref<1x256x64xf32, #tpu.memory_space<vmem>>, vector<1x256x64xf32>
    %14 = vector.shape_cast %13 : vector<1x256x64xf32> to vector<256x64xf32>
    %cst = arith.constant dense<0.000000e+00> : vector<64x64xf32>
    %15 = tpu.matmul %11, %14, %cst {dimension_numbers = #tpu.dot_dimension_numbers<[1], [0], [0], [1], [0, 0, 1, 1], [], []>} : vector<64x256xf32>, vector<256x64xf32>, vector<64x64xf32> -> vector<64x64xf32>
    %16 = arith.addf %12, %15 : vector<64x64xf32>
    %c0_7 = arith.constant 0 : index
    %c0_8 = arith.constant 0 : index
    %17 = vector.load %arg9[%c0_7, %c0_8] : memref<64x64xf32, #tpu.memory_space<vmem>>, vector<64x64xf32>
    tpu.vector_store %arg9[%c0_7, %c0_8], %16 {strides = array<i32>} : memref<64x64xf32, #tpu.memory_space<vmem>>, vector<64x64xf32>,
    %c0_i32_9 = arith.constant 0 : i32
    %18 = arith.cmpi eq, %arg1, %c0_i32_9 : i32
    %19 = arith.extui %18 : i1 to i32
    %c0_i32_10 = arith.constant 0 : i32
    %20 = arith.cmpi ne, %19, %c0_i32_10 : i32
    scf.if %20 {
      %c0_11 = arith.constant 0 : index
      %c0_12 = arith.constant 0 : index
      %21 = vector.load %arg9[%c0_11, %c0_12] : memref<64x64xf32, #tpu.memory_space<vmem>>, vector<64x64xf32>
      %c0_13 = arith.constant 0 : index
      %c0_14 = arith.constant 0 : index
      %22 = vector.load %arg4[%c0_13, %c0_14] : memref<64x256xf32, #tpu.memory_space<vmem>>, vector<64x256xf32>
      %cst_15 = arith.constant dense<0.000000e+00> : vector<64x256xf32>
      %23 = tpu.matmul %21, %22, %cst_15 {dimension_numbers = #tpu.dot_dimension_numbers<[1], [0], [0], [1], [0, 0, 1, 1], [], []>} : vector<64x64xf32>, vector<64x256xf32>, vector<64x256xf32> -> vector<64x256xf32>
      %c0_16 = arith.constant 0 : index
      %c0_17 = arith.constant 0 : index
      %24 = vector.load %arg5[%c0_16, %c0_17] : memref<1x256xf32, #tpu.memory_space<vmem>>, vector<1x256xf32>
      %25 = vector.broadcast %24 : vector<1x256xf32> to vector<64x256xf32>
      %26 = arith.addf %23, %25 : vector<64x256xf32>
      %cst_18 = arith.constant 0.000000e+00 : f32
      %27 = vector.broadcast %cst_18 : f32 to vector<64x256xf32>
      %28 = arith.maximumf %26, %27 : vector<64x256xf32>
      %c0_19 = arith.constant 0 : index
      %c0_20 = arith.constant 0 : index
      %29 = vector.load %arg6[%c0_19, %c0_20] : memref<256x256xf32, #tpu.memory_space<vmem>>, vector<256x256xf32>
      %cst_21 = arith.constant dense<0.000000e+00> : vector<64x256xf32>
      %30 = tpu.matmul %28, %29, %cst_21 {dimension_numbers = #tpu.dot_dimension_numbers<[1], [0], [0], [1], [0, 0, 1, 1], [], []>} : vector<64x256xf32>, vector<256x256xf32>, vector<64x256xf32> -> vector<64x256xf32>
      %c0_22 = arith.constant 0 : index
      %c0_23 = arith.constant 0 : index
      %31 = vector.load %arg7[%c0_22, %c0_23] : memref<1x256xf32, #tpu.memory_space<vmem>>, vector<1x256xf32>
      %32 = vector.broadcast %31 : vector<1x256xf32> to vector<64x256xf32>
      %33 = arith.addf %30, %32 : vector<64x256xf32>
      %34 = arith.mulf %33, %33 : vector<64x256xf32>
      %cst_24 = arith.constant dense<0.000000e+00> : vector<64xf32>
      %35 = vector.multi_reduction <add>, %34, %cst_24 [1] : vector<64x256xf32> to vector<64xf32>
      %36 = vector.shape_cast %35 : vector<64xf32> to vector<64x1xf32>
      %37 = math.sqrt %36 : vector<64x1xf32>
      %cst_25 = arith.constant 1.000000e-07 : f32
      %38 = vector.broadcast %cst_25 : f32 to vector<64x1xf32>
      %39 = arith.addf %37, %38 : vector<64x1xf32>
      %40 = vector.broadcast %39 : vector<64x1xf32> to vector<64x256xf32>
      %41 = arith.divf %33, %40 : vector<64x256xf32>
      %c0_26 = arith.constant 0 : index
      %c0_27 = arith.constant 0 : index
      %c0_28 = arith.constant 0 : index
      %42 = vector.load %arg8[%c0_26, %c0_27, %c0_28] : memref<1x64x256xf32, #tpu.memory_space<vmem>>, vector<1x64x256xf32>
      %43 = vector.shape_cast %42 : vector<1x64x256xf32> to vector<64x256xf32>
      %44 = vector.shape_cast %41 : vector<64x256xf32> to vector<1x64x256xf32>
      tpu.vector_store %arg8[%c0_26, %c0_27, %c0_28], %44 {strides = array<i32>} : memref<1x64x256xf32, #tpu.memory_space<vmem>>, vector<1x64x256xf32>,
    } else {
    }
    return
  }
  func.func @transform_0(%arg0: i32, %arg1: i32) -> (i32, i32) {
    %c0_i32 = arith.constant 0 : i32
    %c0_i32_0 = arith.constant 0 : i32
    %c0_i32_1 = arith.constant 0 : i32
    return %c0_i32, %c0_i32_0 : i32, i32
  }
  func.func @transform_1(%arg0: i32, %arg1: i32) -> (i32, i32, i32) {
    %c0_i32 = arith.constant 0 : i32
    %c0_i32_0 = arith.constant 0 : i32
    return %arg0, %arg1, %c0_i32 : i32, i32, i32
  }
  func.func @transform_2(%arg0: i32, %arg1: i32) -> (i32, i32) {
    %c0_i32 = arith.constant 0 : i32
    %c0_i32_0 = arith.constant 0 : i32
    %c0_i32_1 = arith.constant 0 : i32
    return %c0_i32, %c0_i32_0 : i32, i32
  }
  func.func @transform_3(%arg0: i32, %arg1: i32) -> (i32, i32) {
    %c0_i32 = arith.constant 0 : i32
    %c0_i32_0 = arith.constant 0 : i32
    %c0_i32_1 = arith.constant 0 : i32
    return %c0_i32, %c0_i32_0 : i32, i32
  }
  func.func @transform_4(%arg0: i32, %arg1: i32) -> (i32, i32) {
    %c0_i32 = arith.constant 0 : i32
    %c0_i32_0 = arith.constant 0 : i32
    %c0_i32_1 = arith.constant 0 : i32
    return %c0_i32, %c0_i32_0 : i32, i32
  }
  func.func @transform_5(%arg0: i32, %arg1: i32) -> (i32, i32) {
    %c0_i32 = arith.constant 0 : i32
    %c0_i32_0 = arith.constant 0 : i32
    %c0_i32_1 = arith.constant 0 : i32
    return %c0_i32, %c0_i32_0 : i32, i32
  }
  func.func @transform_6(%arg0: i32, %arg1: i32) -> (i32, i32, i32) {
    %c0_i32 = arith.constant 0 : i32
    %c0_i32_0 = arith.constant 0 : i32
    %c0_i32_1 = arith.constant 0 : i32
    return %arg0, %c0_i32, %c0_i32_0 : i32, i32, i32
  }
}

</mosaic_0001>

<bundles_post_ra>
// kernel: patch_sample_forward.5
= control target key start
LH: loop header
LB: loop body
LE: loop exit
PB: predicated region body
PF: predicated region fallthrough
CT: control target
= control target key end

     0   :  { %11 = vsyncpa [#allocation4], 0  ;;  %s5675_s0 = inlined_call_operand.vmem [shape: s32[64,1], index: 0, kind: input, shape index: {}]   ;;  %s5676_s1 = inlined_call_operand.vmem [shape: f32[2,4096,16], index: 1, kind: input, shape index: {}]   ;;  %s5677_s2 = inlined_call_operand.vmem [shape: f32[16,256], index: 2, kind: input, shape index: {}]   ;;  %s5678_s3 = inlined_call_operand.vmem [shape: f32[1,256], index: 3, kind: input, shape index: {}]   ;;  %s5679_s4 = inlined_call_operand.vmem [shape: f32[256,256], index: 4, kind: input, shape index: {}]   ;;  %s5680_s5 = inlined_call_operand.vmem [shape: f32[1,256], index: 5, kind: input, shape index: {}]   ;;  %s5681_s6 = inlined_call_operand.hbm [shape: f32[2,64,256], index: 6, kind: output, shape index: {}]  }
   0x1   :  { %13 = vsyncpa [#allocation4 + $0x1], 0  ;;  %s3805_s21 = smov 0   ;;  %s3807_s22 = smov 0  }
   0x2   :  { %s3809_s23 = smov 0   ;;  %s3811_s24 = smov 0  }
   0x3   :  { %s3813_s25 = smov 0   ;;  %s3815_s26 = smov 0  }
   0x4   :  { %s3817_s27 = smov 0   ;;  %s3819_s28 = smov 0  }
   0x5 LB: > { %s2470_s29 = sadd.s32 4294967295, %s3761_s28   ;;  %s2471_s30 = sadd.s32 4294967294, %s3761_s28   ;;  %s3761_s28 = sphi %s3819_s28, %s19_s28   ;;  %s3757_s27 = sphi %s3817_s27, %s5856_s27   ;;  %s3753_s26 = sphi %s3815_s26, %s5855_s26   ;;  %s3749_s25 = sphi %s3813_s25, %s5854_s25   ;;  %s3745_s24 = sphi %s3811_s24, %s5853_s24   ;;  %s3741_s23 = sphi %s3809_s23, %s5852_s23   ;;  %s3737_s22 = sphi %s3807_s22, %s5851_s22   ;;  %s3733_s21 = sphi %s3805_s21, %s5850_s21  }
   0x6   : > { %s28_s7 = sadd.s32 1, %s3753_s26  ;;  %s31_s8 = sadd.s32 1, %s3757_s27 }
   0x7   : > { %p29_p0 = scmp.ge.s32.totalorder %s28_s7, 2  ;;  %p181_p1 = scmp.ne.s32.totalorder %s3741_s23, %s3737_s22 }
   0x8   : > { %p182_p2 = scmp.eq.s32.totalorder %s2470_s29, 3  ;;  %p187_p4 = scmp.ne.s32.totalorder %s3737_s22, %s3733_s21 }
   0x9   : > { %s5858_s7 = smov (%p29_p0, %s28_s7), 0  ;;  %s5860_s8 = smov (!%p29_p0, %s31_s8), %s3757_s27 }
   0xa   : > { %p3854_p3 = por %p182_p2, %p181_p1  ;;  %p33_p5 = scmp.ge.s32.totalorder %s5860_s8, 2 }
   0xb   : > { %p188_p6 = scmp.eq.s32.totalorder %s2471_s30, 3  ;;  %p2474_p7 = scmp.ge.s32.totalorder %s3761_s28, 1 }
   0xc   : > { %p234_p8 = scmp.lt.s32.totalorder %s3761_s28, 5  ;;  %s5862_s8 = smov (%p33_p5, %s5860_s8), 0 }
   0xd   : > { %p3864_p9 = por %p188_p6, %p187_p4  ;;  %s168_s11 = ssub.s32 %s3757_s27, %s5862_s8 }
   0xe   : > { %p235_p10 = pnand %p2474_p7, %p234_p8  ;;  %s171_s12 = sadd.s32 1, %s3741_s23 }
   0xf   : > { %p169_p11 = scmp.eq.s32.totalorder %s168_s11, 0 }
  0x10   : > { %238 = sbr.rel (%p235_p10) target bundleno = 1177 (0x499), region = 44 }
  0x11   : > { %s3872_s13 = scalar_select %p169_p11, %s3741_s23, %s171_s12  }
  0x17   : > { %s5713_s14 = sand.u32 1, %s3737_s22   ;;  %s2476_s15 = sshll.u32 %s3745_s24, 8 }
  0x18   : > { %s2475_s16 = sshll.u32 %s5713_s14, 7  ;;  %p269_p12 = scmp.lt.s32.totalorder %s3749_s25, 1 }
  0x19   : > { %p271_p13 = scmp.lt.s32.totalorder %s2476_s15, 511  ;;  %s3885_s12 = scalar_lea.vmem [#allocation3], %s2475_s16 }
  0x1a   : > { %s270_s17 = scalar_select %p269_p12, %s3749_s25, 1 }
  0x1b   : > { %s5864_s15 = smov (!%p271_p13, %s2476_s15), 511  ;;  %p2479_p0 = scmp.ne.s32.totalorder %s3745_s24, 0 }
  0x1c   : > { %s2477_s18 = sshll.u32 %s270_s17, 9  ;;  %vm282_vm0 = vcmask (!%p2479_p0), 130048   ;;  %v3763_v0 = vmov (!%p2479_p0), 0.0  }
  0x1d   : > { %s274_s19 = sadd.s32 %s2477_s18, %s5864_s15  ;;  %281 = sbr.rel (%p2479_p0) target bundleno = 36 (0x24), region = 48  ;;  %283 = vst.msk [vmem:[#allocation2] sm:$0xff] (!%p2479_p0), %vm282_vm0, %v3763_v0  ;;  %284 = vst.msk [vmem:[#allocation2 + $0x8] sm:$0xff] (!%p2479_p0), %vm282_vm0, %v3763_v0 }
  0x1e   : > { %s2478_s20 = sshll.u32 %s274_s19, 3  ;;  %285 = vst.msk [vmem:[#allocation2 + $0x10] sm:$0xff] (!%p2479_p0), %vm282_vm0, %v3763_v0  ;;  %286 = vst.msk [vmem:[#allocation2 + $0x18] sm:$0xff] (!%p2479_p0), %vm282_vm0, %v3763_v0 }
  0x1f   : > { %s3883_s11 = scalar_lea.vmem %s5676_s1, %s2478_s20  ;;  %287 = vst.msk [vmem:[#allocation2 + $0x20] sm:$0xff] (!%p2479_p0), %vm282_vm0, %v3763_v0  ;;  %288 = vst.msk [vmem:[#allocation2 + $0x28] sm:$0xff] (!%p2479_p0), %vm282_vm0, %v3763_v0 }
  0x20   : > { %289 = vst.msk [vmem:[#allocation2 + $0x30] sm:$0xff] (!%p2479_p0), %vm282_vm0, %v3763_v0  ;;  %290 = vst.msk [vmem:[#allocation2 + $0x38] sm:$0xff] (!%p2479_p0), %vm282_vm0, %v3763_v0 }
  0x24 PF: > { %v293_v1 = vld [vmem:[%s5675_s0 + $0x10] sm:$0xff]  ;;  %v291_v2 = vld [vmem:[%s5675_s0] sm:$0xff]  ;;  %v3764_v3 = vmov 0   ;;  %v294_v4 = vld [vmem:[%s5675_s0 + $0x18] sm:$0xff]  ;;  %v5682_v43 = vlaneseq  ;;  %s2480_s15 = sshll.u32 %s3745_s24, 11  ;;  %p2737_p1 = scmp.ne.s32.totalorder %s3745_s24, 1 }
  0x25   : > { %3634 = vset.pattern.permute.xlu1 %v3764_v3  ;;  %3633 = vset.pattern.permute.xlu0 %v3764_v3  ;;  %v292_v5 = vld [vmem:[%s5675_s0 + $0x8] sm:$0xff]  ;;  %v766_v6 = vld [vmem:[%s3883_s11 + $0x80] sm:$0xff]  ;;  %v768_v19 = vld [vmem:[%s3883_s11 + $0x90] sm:$0xff] }
  0x26   : > { %341 = vperm.xlu1 %3634, %v293_v1   ;;  %335 = vperm.xlu0 %3633, %v291_v2   ;;  %v767_v7 = vld [vmem:[%s3883_s11 + $0x88] sm:$0xff]  ;;  %v750_v8 = vld [vmem:[%s3883_s11] sm:$0xff]  ;;  %v769_v20 = vld [vmem:[%s3883_s11 + $0x98] sm:$0xff]  ;;  %v3949_v60 = vand.u32 127, %v5682_v43 }
  0x27   : > { %v751_v9 = vld [vmem:[%s3883_s11 + $0x8] sm:$0xff]  ;;  %v3200_v10 = vpack.c.bf16 %v767_v7, %v766_v6  ;;  %v798_v12 = vld [vmem:[%s3883_s11 + $0x180] sm:$0xff]  ;;  %v3204_v22 = vpack.c.bf16 %v769_v20, %v768_v19  ;;  %v752_v23 = vld [vmem:[%s3883_s11 + $0x10] sm:$0xff] }
  0x28   : > { %v3202_v11 = vpack.c.bf16 %v751_v9, %v750_v8  ;;  %v799_v13 = vld [vmem:[%s3883_s11 + $0x188] sm:$0xff]  ;;  %v782_v14 = vld [vmem:[%s3883_s11 + $0x100] sm:$0xff]  ;;  %v753_v24 = vld [vmem:[%s3883_s11 + $0x18] sm:$0xff]  ;;  %5716 = vst [vmem:[#allocation6_spill] sm:$0xff] %v3949_v60  ;;  %v3958_v8 = vstv %s2480_s15 }
  0x29   : > { %v296_v15 = vld [vmem:[%s5675_s0 + $0x28] sm:$0xff]  ;;  %v295_v16 = vld [vmem:[%s5675_s0 + $0x20] sm:$0xff]  ;;  %v3232_v17 = vpack.c.bf16 %v799_v13, %v798_v12  ;;  %v800_v25 = vld [vmem:[%s3883_s11 + $0x190] sm:$0xff]  ;;  %3201 = vmatprep.subr.bf16.mxu0 %v3200_v10  ;;  %v3206_v29 = vpack.c.bf16 %v753_v24, %v752_v23  ;;  %5717 = vst [vmem:[#allocation7_spill] sm:$0xff] %v3958_v8  ;;  %v309_v13 = vadd.s32 1024, %v3949_v60 }
  0x2a   : > { %v783_v18 = vld [vmem:[%s3883_s11 + $0x108] sm:$0xff]  ;;  %344 = vperm.xlu1 %3634, %v294_v4   ;;  %338 = vperm.xlu0 %3633, %v292_v5   ;;  %v801_v26 = vld [vmem:[%s3883_s11 + $0x198] sm:$0xff]  ;;  %v784_v27 = vld [vmem:[%s3883_s11 + $0x110] sm:$0xff] }
  0x2b   : > { %v3234_v21 = vpack.c.bf16 %v783_v18, %v782_v14  ;;  %3233 = vmatprep.subr.bf16.mxu1 %v3232_v17  ;;  %v785_v28 = vld [vmem:[%s3883_s11 + $0x118] sm:$0xff]  ;;  %3203 = vmatpush3.bf16.msra.mxu0 %v3202_v11  ;;  %v3236_v30 = vpack.c.bf16 %v801_v26, %v800_v25  ;;  %v770_v32 = vld [vmem:[%s3883_s11 + $0xa0] sm:$0xff]  ;;  %v771_v33 = vld [vmem:[%s3883_s11 + $0xa8] sm:$0xff]  ;;  %v312_v11 = vadd.s32 1408, %v3949_v60  ;;  %v311_v14 = vadd.s32 1280, %v3949_v60 }
  0x2c   : > { %v3238_v31 = vpack.c.bf16 %v785_v28, %v784_v27  ;;  %v754_v34 = vld [vmem:[%s3883_s11 + $0x20] sm:$0xff]  ;;  %3205 = vmatprep.subr.bf16.mxu0 %v3204_v22  ;;  %v3208_v35 = vpack.c.bf16 %v771_v33, %v770_v32  ;;  %v755_v36 = vld [vmem:[%s3883_s11 + $0x28] sm:$0xff]  ;;  %v772_v42 = vld [vmem:[%s3883_s11 + $0xb0] sm:$0xff]  ;;  %v3975_v25 = vadd.s32 %v3958_v8, %v309_v13  ;;  %v308_v13 = vadd.s32 896, %v3949_v60 }
  0x2d   : > { %3235 = vmatpush3.bf16.msra.mxu1 %v3234_v21  ;;  %v802_v37 = vld [vmem:[%s3883_s11 + $0x1a0] sm:$0xff]  ;;  %v803_v38 = vld [vmem:[%s3883_s11 + $0x1a8] sm:$0xff]  ;;  %v298_v44 = vld [vmem:[%s5675_s0 + $0x38] sm:$0xff]  ;;  %v3210_v47 = vpack.c.bf16 %v755_v36, %v754_v34  ;;  %v3969_v20 = vadd.s32 %v3958_v8, %v312_v11  ;;  %v3978_v26 = vadd.s32 %v3958_v8, %v311_v14  ;;  %v305_v14 = vadd.s32 512, %v3949_v60 }
  0x2e   : > { %350 = vperm.xlu1 %3634, %v296_v15   ;;  %347 = vperm.xlu0 %3633, %v295_v16   ;;  %v3240_v39 = vpack.c.bf16 %v803_v38, %v802_v37  ;;  %v786_v40 = vld [vmem:[%s3883_s11 + $0x120] sm:$0xff]  ;;  %v787_v41 = vld [vmem:[%s3883_s11 + $0x128] sm:$0xff]  ;;  %v297_v45 = vld [vmem:[%s5675_s0 + $0x30] sm:$0xff]  ;;  %v314_v15 = vadd.s32 1664, %v3949_v60  ;;  %5719 = vst [vmem:[#allocation9_spill] sm:$0xff] %v3975_v25 }
  0x2f   : > { %3237 = vmatprep.subr.bf16.mxu1 %v3236_v30  ;;  %v773_v46 = vld [vmem:[%s3883_s11 + $0xb8] sm:$0xff]  ;;  %3207 = vmatpush3.bf16.msra.mxu0 %v3206_v29  ;;  %v3242_v48 = vpack.c.bf16 %v787_v41, %v786_v40  ;;  %v756_v49 = vld [vmem:[%s3883_s11 + $0x30] sm:$0xff]  ;;  %v774_v57 = vld [vmem:[%s3883_s11 + $0xc0] sm:$0xff]  ;;  %5718 = vst [vmem:[#allocation8_spill] sm:$0xff] %v3969_v20 }
  0x30   : > { %v804_v50 = vld [vmem:[%s3883_s11 + $0x1b0] sm:$0xff]  ;;  %v805_v51 = vld [vmem:[%s3883_s11 + $0x1b8] sm:$0xff]  ;;  %3209 = vmatprep.subr.bf16.mxu0 %v3208_v35  ;;  %v3212_v52 = vpack.c.bf16 %v773_v46, %v772_v42  ;;  %v775_v58 = vld [vmem:[%s3883_s11 + $0xc8] sm:$0xff]  ;;  %5720 = vst [vmem:[#allocation10_spill] sm:$0xff] %v3978_v26  ;;  %v3984_v30 = vadd.s32 %v3958_v8, %v314_v15  ;;  %v307_v15 = vadd.s32 768, %v3949_v60 }
  0x31   : > { %3239 = vmatpush3.bf16.msra.mxu1 %v3238_v31  ;;  %v757_v53 = vld [vmem:[%s3883_s11 + $0x38] sm:$0xff]  ;;  %v3244_v54 = vpack.c.bf16 %v805_v51, %v804_v50  ;;  %v788_v55 = vld [vmem:[%s3883_s11 + $0x130] sm:$0xff]  ;;  %v806_v59 = vld [vmem:[%s3883_s11 + $0x1c0] sm:$0xff]  ;;  %v3216_v3 = vpack.c.bf16 %v775_v58, %v774_v57  ;;  %v315_v58 = vadd.s32 1792, %v3949_v60 }
  0x32   : > { %3241 = vmatprep.subr.bf16.mxu1 %v3240_v39  ;;  %v789_v56 = vld [vmem:[%s3883_s11 + $0x138] sm:$0xff]  ;;  %356 = vperm.xlu1 %3634, %v298_v44   ;;  %v807_v61 = vld [vmem:[%s3883_s11 + $0x1c8] sm:$0xff]  ;;  %v3214_v62 = vpack.c.bf16 %v757_v53, %v756_v49  ;;  %v758_v0 = vld [vmem:[%s3883_s11 + $0x40] sm:$0xff]  ;;  %5721 = vst [vmem:[#allocation11_spill] sm:$0xff] %v3984_v30  ;;  %v316_v53 = vadd.s32 1920, %v3949_v60 }
  0x33   : > { %353 = vperm.xlu0 %3633, %v297_v45   ;;  %3211 = vmatpush3.bf16.msra.mxu0 %v3210_v47  ;;  %v3246_v63 = vpack.c.bf16 %v789_v56, %v788_v55  ;;  %v759_v1 = vld [vmem:[%s3883_s11 + $0x48] sm:$0xff]  ;;  %v790_v2 = vld [vmem:[%s3883_s11 + $0x140] sm:$0xff]  ;;  %v3248_v4 = vpack.c.bf16 %v807_v61, %v806_v59  ;;  %v776_v6 = vld [vmem:[%s3883_s11 + $0xd0] sm:$0xff] }
  0x34   : > { %3213 = vmatprep.subr.bf16.mxu0 %v3212_v52  ;;  %v791_v5 = vld [vmem:[%s3883_s11 + $0x148] sm:$0xff]  ;;  %v777_v7 = vld [vmem:[%s3883_s11 + $0xd8] sm:$0xff]  ;;  %v808_v9 = vld [vmem:[%s3883_s11 + $0x1d0] sm:$0xff]  ;;  %v3218_v12 = vpack.c.bf16 %v759_v1, %v758_v0  ;;  %v4006_v59 = vadd.s32 %v3958_v8, %v316_v53  ;;  %v4012_v0 = vadd.s32 %v3958_v8, %v315_v58 }
  0x35   : > { %3243 = vmatpush3.bf16.msra.mxu1 %v3242_v48  ;;  %v809_v10 = vld [vmem:[%s3883_s11 + $0x1d8] sm:$0xff]  ;;  %v3250_v16 = vpack.c.bf16 %v791_v5, %v790_v2  ;;  %v3220_v17 = vpack.c.bf16 %v777_v7, %v776_v6  ;;  %v760_v18 = vld [vmem:[%s3883_s11 + $0x50] sm:$0xff]  ;;  %v778_v24 = vld [vmem:[%s3883_s11 + $0xe0] sm:$0xff]  ;;  %v303_v5 = vadd.s32 256, %v3949_v60  ;;  %v306_v6 = vadd.s32 640, %v3949_v60 }
  0x36   : > { %3245 = vmatprep.subr.bf16.mxu1 %v3244_v54  ;;  %v761_v19 = vld [vmem:[%s3883_s11 + $0x58] sm:$0xff]  ;;  %v3252_v21 = vpack.c.bf16 %v809_v10, %v808_v9  ;;  %v792_v22 = vld [vmem:[%s3883_s11 + $0x150] sm:$0xff]  ;;  %v779_v27 = vld [vmem:[%s3883_s11 + $0xe8] sm:$0xff]  ;;  %v313_v54 = vadd.s32 1536, %v3949_v60  ;;  %5722 = vst [vmem:[#allocation12_spill] sm:$0xff] %v4006_v59  ;;  %v5737_v59 = vmov 1.0  }
  0x37   : > { %3215 = vmatpush3.bf16.msra.mxu0 %v3214_v62  ;;  %v793_v23 = vld [vmem:[%s3883_s11 + $0x158] sm:$0xff]  ;;  %v810_v28 = vld [vmem:[%s3883_s11 + $0x1e0] sm:$0xff]  ;;  %v811_v29 = vld [vmem:[%s3883_s11 + $0x1e8] sm:$0xff]  ;;  %v3222_v31 = vpack.c.bf16 %v761_v19, %v760_v18  ;;  %v3224_v35 = vpack.c.bf16 %v779_v27, %v778_v24  ;;  %5724 = vst [vmem:[#allocation14_spill] sm:$0xff] %v4012_v0 }
  0x38   : > { %3217 = vmatprep.subr.bf16.mxu0 %v3216_v3  ;;  %v3254_v32 = vpack.c.bf16 %v793_v23, %v792_v22  ;;  %v762_v33 = vld [vmem:[%s3883_s11 + $0x60] sm:$0xff]  ;;  %v763_v34 = vld [vmem:[%s3883_s11 + $0x68] sm:$0xff]  ;;  %v3256_v36 = vpack.c.bf16 %v811_v29, %v810_v28  ;;  %v780_v39 = vld [vmem:[%s3883_s11 + $0xf0] sm:$0xff]  ;;  %v4009_v61 = vadd.s32 %v3958_v8, %v313_v54  ;;  %v302_v3 = vadd.s32 128, %v3949_v60 }
  0x39   : > { %3247 = vmatpush3.bf16.msra.mxu1 %v3246_v63  ;;  %v794_v37 = vld [vmem:[%s3883_s11 + $0x160] sm:$0xff]  ;;  %v795_v38 = vld [vmem:[%s3883_s11 + $0x168] sm:$0xff]  ;;  %v781_v40 = vld [vmem:[%s3883_s11 + $0xf8] sm:$0xff]  ;;  %v3226_v44 = vpack.c.bf16 %v763_v34, %v762_v33  ;;  %v4053_v22 = vadd.s32 %v3958_v8, %v3949_v60  ;;  %v4056_v23 = vadd.s32 %v3958_v8, %v303_v5 }
  0x3a   : > { %3249 = vmatprep.subr.bf16.mxu1 %v3248_v4  ;;  %v812_v41 = vld [vmem:[%s3883_s11 + $0x1f0] sm:$0xff]  ;;  %v813_v42 = vld [vmem:[%s3883_s11 + $0x1f8] sm:$0xff]  ;;  %v3258_v45 = vpack.c.bf16 %v795_v38, %v794_v37  ;;  %v3228_v48 = vpack.c.bf16 %v781_v40, %v780_v39  ;;  %v830_v52 = vld [vmem:[%s3883_s11 + $0x280] sm:$0xff]  ;;  %5723 = vst [vmem:[#allocation13_spill] sm:$0xff] %v4009_v61  ;;  %v304_v4 = vadd.s32 384, %v3949_v60  ;;  %v4046_v19 = vadd.s32 %v3958_v8, %v302_v3 }
  0x3b   : > { %3219 = vmatpush3.bf16.msra.mxu0 %v3218_v12  ;;  %v764_v46 = vld [vmem:[%s3883_s11 + $0x70] sm:$0xff]  ;;  %v765_v47 = vld [vmem:[%s3883_s11 + $0x78] sm:$0xff]  ;;  %v3260_v49 = vpack.c.bf16 %v813_v42, %v812_v41  ;;  %v831_v55 = vld [vmem:[%s3883_s11 + $0x288] sm:$0xff]  ;;  %v4104_v42 = vadd.s32 %v3958_v8, %v306_v6 }
  0x3c   : > { %3221 = vmatprep.subr.bf16.mxu0 %v3220_v17  ;;  %v796_v50 = vld [vmem:[%s3883_s11 + $0x170] sm:$0xff]  ;;  %v797_v51 = vld [vmem:[%s3883_s11 + $0x178] sm:$0xff]  ;;  %v862_v56 = vld [vmem:[%s3883_s11 + $0x380] sm:$0xff]  ;;  %v3230_v62 = vpack.c.bf16 %v765_v47, %v764_v46  ;;  %v3264_v1 = vpack.c.bf16 %v831_v55, %v830_v52  ;;  %v4113_v46 = vadd.s32 %v3958_v8, %v307_v15 }
  0x3d   : > { %3251 = vmatpush3.bf16.msra.mxu1 %v3250_v16  ;;  %v863_v57 = vld [vmem:[%s3883_s11 + $0x388] sm:$0xff]  ;;  %v3262_v63 = vpack.c.bf16 %v797_v51, %v796_v50  ;;  %v4019_v7 = vld [vmem:[%s3883_s11 + $0x200] sm:$0xff]  ;;  %v4031_v12 = vld [vmem:[%s3883_s11 + $0x290] sm:$0xff]  ;;  %5725 = vst [vmem:[#allocation15_spill] sm:$0xff] %v4104_v42 }
  0x3e   : > { %3253 = vmatprep.subr.bf16.mxu1 %v3252_v21  ;;  %v3296_v2 = vpack.c.bf16 %v863_v57, %v862_v56  ;;  %v4022_v9 = vld [vmem:[%s3883_s11 + $0x208] sm:$0xff]  ;;  %v4025_v10 = vld [vmem:[%s3883_s11 + $0x300] sm:$0xff]  ;;  %v4037_v16 = vld [vmem:[%s3883_s11 + $0x298] sm:$0xff]  ;;  %v4049_v21 = vadd.s32 %v3958_v8, %v304_v4  ;;  %5728 = vst [vmem:[#allocation18_spill] sm:$0xff] %v4113_v46 }
  0x3f   : > { %3223 = vmatpush3.bf16.msra.mxu0 %v3222_v31  ;;  %v4028_v11 = vld [vmem:[%s3883_s11 + $0x308] sm:$0xff]  ;;  %v4040_v17 = vld [vmem:[%s3883_s11 + $0x210] sm:$0xff]  ;;  %v4043_v18 = vld [vmem:[%s3883_s11 + $0x218] sm:$0xff]  ;;  %v3268_v50 = vpack.c.bf16 %v4037_v16, %v4031_v12 }
  0x40   : > { %3225 = vmatprep.subr.bf16.mxu0 %v3224_v35  ;;  %v4059_v24 = vld [vmem:[%s3883_s11 + $0x390] sm:$0xff]  ;;  %v4062_v27 = vld [vmem:[%s3883_s11 + $0x398] sm:$0xff]  ;;  %v4071_v31 = vld [vmem:[%s3883_s11 + $0x2a0] sm:$0xff] }
  0x41   : > { %3255 = vmatpush3.bf16.msra.mxu1 %v3254_v32  ;;  %v4065_v28 = vld [vmem:[%s3883_s11 + $0x310] sm:$0xff]  ;;  %v4068_v29 = vld [vmem:[%s3883_s11 + $0x318] sm:$0xff]  ;;  %v4074_v32 = vld [vmem:[%s3883_s11 + $0x2a8] sm:$0xff] }
  0x42   : > { %3257 = vmatprep.subr.bf16.mxu1 %v3256_v36  ;;  %v4077_v33 = vld [vmem:[%s3883_s11 + $0x220] sm:$0xff]  ;;  %v4080_v34 = vld [vmem:[%s3883_s11 + $0x228] sm:$0xff]  ;;  %v4095_v39 = vld [vmem:[%s3883_s11 + $0x2b0] sm:$0xff] }
  0x43   : > { %3227 = vmatpush3.bf16.msra.mxu0 %v3226_v44  ;;  %v4083_v35 = vld [vmem:[%s3883_s11 + $0x3a0] sm:$0xff]  ;;  %v4086_v36 = vld [vmem:[%s3883_s11 + $0x3a8] sm:$0xff]  ;;  %v4098_v40 = vld [vmem:[%s3883_s11 + $0x2b8] sm:$0xff]  ;;  %v4107_v44 = vadd.s32 %v3958_v8, %v308_v13 }
  0x44   : > { %3229 = vmatprep.subr.bf16.mxu0 %v3228_v48  ;;  %v4089_v37 = vld [vmem:[%s3883_s11 + $0x320] sm:$0xff]  ;;  %v4092_v38 = vld [vmem:[%s3883_s11 + $0x328] sm:$0xff]  ;;  %v4101_v41 = vld [vmem:[%s3883_s11 + $0x230] sm:$0xff]  ;;  %v3266_v48 = vpack.c.bf16 %v4022_v9, %v4019_v7 }
  0x45   : > { %3259 = vmatpush3.bf16.msra.mxu1 %v3258_v45  ;;  %5726 = vst [vmem:[#allocation16_spill] sm:$0xff] %v4107_v44  ;;  %v4110_v45 = vadd.s32 %v3958_v8, %v305_v14  ;;  %v4126_v52 = vld [vmem:[%s3883_s11 + $0x238] sm:$0xff]  ;;  %v4129_v53 = vld [vmem:[%s3883_s11 + $0x3b0] sm:$0xff]  ;;  %v4149_v57 = vld [vmem:[%s3883_s11 + $0x2c0] sm:$0xff]  ;;  %v5739_v44 = vpack.c.bf16 %v4043_v18, %v4040_v17 }
  0x46   : > { %3261 = vmatprep.subr.bf16.mxu1 %v3260_v49  ;;  %v3298_v49 = vpack.c.bf16 %v4028_v11, %v4025_v10  ;;  %v4132_v54 = vld [vmem:[%s3883_s11 + $0x3b8] sm:$0xff]  ;;  %v4143_v55 = vld [vmem:[%s3883_s11 + $0x330] sm:$0xff]  ;;  %v4152_v58 = vld [vmem:[%s3883_s11 + $0x2c8] sm:$0xff] }
  0x47   : > { %3231 = vmatpush3.bf16.msra.mxu0 %v3230_v62  ;;  %5727 = vst [vmem:[#allocation17_spill] sm:$0xff] %v4110_v45  ;;  %v4146_v56 = vld [vmem:[%s3883_s11 + $0x338] sm:$0xff]  ;;  %v5687_v62 = vmov 1.0   ;;  %v4163_v3 = vld [vmem:[%s3883_s11 + $0x240] sm:$0xff]  ;;  %v4166_v4 = vld [vmem:[%s3883_s11 + $0x248] sm:$0xff] }
  0x48   : > { %3265 = vmatprep.subr.bf16.mxu0 %v3264_v1  ;;  %v4169_v5 = vld [vmem:[%s3883_s11 + $0x3c0] sm:$0xff]  ;;  %v4180_v10 = vld [vmem:[%s3883_s11 + $0x3c8] sm:$0xff]  ;;  %v4208_v43 = vld [vmem:[%s3883_s11 + $0x258] sm:$0xff]  ;;  %v5744_v1 = vpack.c.bf16 %v4074_v32, %v4071_v31  ;;  %v5748_v32 = vpack.c.bf16 %v4086_v36, %v4083_v35 }
  0x49   : > { %3263 = vmatpush3.bf16.msra.mxu1 %v3262_v63  ;;  %v3300_v63 = vpack.c.bf16 %v4062_v27, %v4059_v24  ;;  %v4183_v11 = vld [vmem:[%s3883_s11 + $0x340] sm:$0xff]  ;;  %v4186_v12 = vld [vmem:[%s3883_s11 + $0x348] sm:$0xff]  ;;  %v4199_v27 = vld [vmem:[%s3883_s11 + $0x2d0] sm:$0xff]  ;;  %5731 = vst [vmem:[#allocation21_spill] sm:$0xff] %v4208_v43 }
  0x4a   : > { %3297 = vmatprep.subr.bf16.mxu1 %v3296_v2  ;;  %v4211_v9 = vld [vmem:[%s3883_s11 + $0x3d0] sm:$0xff]  ;;  %v4214_v15 = vld [vmem:[%s3883_s11 + $0x3d8] sm:$0xff]  ;;  %v4231_v7 = vld [vmem:[%s3883_s11 + $0x2e0] sm:$0xff] }
  0x4b   : > { %5732 = vst [vmem:[#allocation22_spill] sm:$0xff] %v4211_v9  ;;  %5733 = vst [vmem:[#allocation23_spill] sm:$0xff] %v4214_v15  ;;  %v4225_v24 = vld [vmem:[%s3883_s11 + $0x350] sm:$0xff]  ;;  %v4228_v16 = vld [vmem:[%s3883_s11 + $0x358] sm:$0xff] }
  0x4c   : > { %v4234_v6 = vld [vmem:[%s3883_s11 + $0x2e8] sm:$0xff]  ;;  %v4237_v2 = vld [vmem:[%s3883_s11 + $0x260] sm:$0xff]  ;;  %v4280_v30 = vld [vmem:[%s3883_s11 + $0x2f8] sm:$0xff] }
  0x4d   : > { %5734 = vst [vmem:[#allocation24_spill] sm:$0xff] %v4237_v2  ;;  %v4251_v8 = vld [vmem:[%s3883_s11 + $0x3e0] sm:$0xff]  ;;  %v4254_v60 = vld [vmem:[%s3883_s11 + $0x3e8] sm:$0xff]  ;;  %v4283_v46 = vld [vmem:[%s3883_s11 + $0x270] sm:$0xff] }
  0x4e   : > { %v4257_v0 = vld [vmem:[%s3883_s11 + $0x360] sm:$0xff]  ;;  %v4260_v61 = vld [vmem:[%s3883_s11 + $0x368] sm:$0xff]  ;;  %5738 = vst [vmem:[#allocation27_spill] sm:$0xff] %v4283_v46  ;;  %v4286_v45 = vld [vmem:[%s3883_s11 + $0x278] sm:$0xff]  ;;  %v5749_v46 = vpack.c.bf16 %v4092_v38, %v4089_v37  ;;  %v5752_v38 = vpack.c.bf16 %v4132_v54, %v4129_v53 }
  0x4f   : > { %v4298_v51 = vld [vmem:[%s3883_s11 + $0x3f0] sm:$0xff]  ;;  %v4301_v42 = vld [vmem:[%s3883_s11 + $0x3f8] sm:$0xff]  ;;  %v4310_v18 = vld [vmem:[%s3883_s11 + $0x480] sm:$0xff] }
  0x50   : > { %v4307_v17 = vld [vmem:[%s3883_s11 + $0x378] sm:$0xff]  ;;  %5740 = vst [vmem:[#allocation28_spill] sm:$0xff] %v4310_v18  ;;  %v4326_v25 = vld [vmem:[%s3883_s11 + $0x488] sm:$0xff]  ;;  %v4350_v15 = vld [vmem:[%s3883_s11 + $0x580] sm:$0xff] }
  0x51   : > { %v4356_v43 = vld [vmem:[%s3883_s11 + $0x500] sm:$0xff]  ;;  %v4359_v20 = vld [vmem:[%s3883_s11 + $0x508] sm:$0xff]  ;;  %v4376_v9 = vld [vmem:[%s3883_s11 + $0x490] sm:$0xff] }
  0x52   : > { %5745 = vst [vmem:[#allocation31_spill] sm:$0xff] %v4356_v43  ;;  %5746 = vst [vmem:[#allocation32_spill] sm:$0xff] %v4359_v20  ;;  %v4382_v26 = vld [vmem:[%s3883_s11 + $0x410] sm:$0xff]  ;;  %v4399_v31 = vld [vmem:[%s3883_s11 + $0x418] sm:$0xff] }
  0x53   : > { %v4437_v35 = vld [vmem:[%s3883_s11 + $0x4a8] sm:$0xff]  ;;  %v4440_v18 = vld [vmem:[%s3883_s11 + $0x420] sm:$0xff]  ;;  %v4480_v43 = vld [vmem:[%s3883_s11 + $0x4b0] sm:$0xff] }
  0x54   : > { %v4443_v37 = vld [vmem:[%s3883_s11 + $0x428] sm:$0xff]  ;;  %v4460_v36 = vld [vmem:[%s3883_s11 + $0x520] sm:$0xff]  ;;  %v4483_v20 = vld [vmem:[%s3883_s11 + $0x4b8] sm:$0xff] }
  0xa5   : > { %v4115_v47 = vpop.permute.xlu0 %335  ;;  %v4188_v13 = vpop.permute.xlu1 %341 }
  0xa6   : > { %vm359_vm1 = vcmp.eq.s32.totalorder %v4046_v19, %v4115_v47  ;;  %vm361_vm2 = vcmp.eq.s32.totalorder %v4049_v21, %v4115_v47  ;;  %vm358_vm3 = vcmp.eq.s32.totalorder %v4053_v22, %v4115_v47  ;;  %vm360_vm4 = vcmp.eq.s32.totalorder %v4056_v23, %v4115_v47 }
  0xa7   : > { %2609 = vmatprep.mubr.msk.f32.mxu0 %vm359_vm1, %v5687_v62  ;;  %2625 = vmatprep.mubr.msk.f32.mxu1 %vm361_vm2, %v5687_v62  ;;  %vm391_vm9 = vcmp.eq.s32.totalorder %v4046_v19, %v4188_v13  ;;  %vm393_vm10 = vcmp.eq.s32.totalorder %v4049_v21, %v4188_v13  ;;  %vm390_vm11 = vcmp.eq.s32.totalorder %v4053_v22, %v4188_v13 }
  0xa8   : > { %2610 = vmatmul.mubr.msk.f32.vlgmr.msra.gmra.mrb[0].mxu0 %vm358_vm3, %v5687_v62  ;;  %2626 = vmatmul.mubr.msk.f32.vlgmr.msra.gmra.mrb[0].mxu1 %vm360_vm4, %v5687_v62  ;;  %vm392_vm12 = vcmp.eq.s32.totalorder %v4056_v23, %v4188_v13 }
  0xa9   : > { %3267 = vmatpush3.bf16.msra.mxu0 %v3266_v48  ;;  %3299 = vmatpush3.bf16.msra.mxu1 %v3298_v49  ;;  %v4190_v14 = vpop.permute.xlu0 %338  ;;  %v4202_v48 = vld [vmem:[%s3883_s11 + $0x2d8] sm:$0xff]  ;;  %v4205_v49 = vld [vmem:[%s3883_s11 + $0x250] sm:$0xff] }
  0xaa   : > { %5729 = vst [vmem:[#allocation19_spill] sm:$0xff] %v4190_v14  ;;  %5730 = vst [vmem:[#allocation20_spill] sm:$0xff] %v4205_v49  ;;  %vm375_vm5 = vcmp.eq.s32.totalorder %v4046_v19, %v4190_v14  ;;  %vm377_vm6 = vcmp.eq.s32.totalorder %v4049_v21, %v4190_v14  ;;  %3269 = vmatprep.subr.bf16.mxu0 %v3268_v50  ;;  %vm374_vm7 = vcmp.eq.s32.totalorder %v4053_v22, %v4190_v14  ;;  %v4240_v50 = vld [vmem:[%s3883_s11 + $0x268] sm:$0xff] }
  0xab   : > { %vm376_vm8 = vcmp.eq.s32.totalorder %v4056_v23, %v4190_v14  ;;  %5735 = vst [vmem:[#allocation25_spill] sm:$0xff] %v4240_v50  ;;  %2611 = vmatprep.mubr.msk.f32.mxu0 %vm375_vm5, %v5687_v62  ;;  %2627 = vmatprep.mubr.msk.f32.mxu1 %vm377_vm6, %v5687_v62  ;;  %v4263_v62 = vld [vmem:[%s3883_s11 + $0x2f0] sm:$0xff]  ;;  %v4353_v49 = vld [vmem:[%s3883_s11 + $0x588] sm:$0xff]  ;;  %v5747_v50 = vpack.c.bf16 %v4080_v34, %v4077_v33  ;;  %v4405_v33 = vld [vmem:[%s3883_s11 + $0x598] sm:$0xff] }
  0xac   : > { %5736 = vst [vmem:[#allocation26_spill] sm:$0xff] %v4263_v62  ;;  %2612 = vmatmul.mubr.msk.f32.gmra.mrb[2].mxu0 %vm374_vm7, %v5737_v59  ;;  %2628 = vmatmul.mubr.msk.f32.gmra.mrb[2].mxu1 %vm376_vm8, %v5737_v59  ;;  %v4304_v14 = vld [vmem:[%s3883_s11 + $0x370] sm:$0xff]  ;;  %v5750_v34 = vpack.c.bf16 %v4098_v40, %v4095_v39  ;;  %v3334_v39 = vpack.c.bf16 %v4399_v31, %v4382_v26  ;;  %v4477_v40 = vld [vmem:[%s3883_s11 + $0x528] sm:$0xff]  ;;  %v885_v31 = vld [vmem:[%s3883_s11 + $0x438] sm:$0xff] }
  0xad   : > { %3271 = vmatpush3.bf16.msra.mxu0 %v5739_v44  ;;  %3301 = vmatprep.subr.bf16.mxu1 %v3300_v63  ;;  %v5741_v44 = vpack.c.bf16 %v4068_v29, %v4065_v28  ;;  %v4329_v28 = vld [vmem:[%s3883_s11 + $0x400] sm:$0xff]  ;;  %v4332_v29 = vld [vmem:[%s3883_s11 + $0x408] sm:$0xff]  ;;  %v4379_v63 = vld [vmem:[%s3883_s11 + $0x498] sm:$0xff]  ;;  %v4384_v2 = vpop.permute.xlu0 %347 }
  0xae   : > { %2613 = vmatprep.mubr.msk.f32.mxu0 %vm391_vm9, %v5737_v59  ;;  %5742 = vst [vmem:[#allocation29_spill] sm:$0xff] %v4329_v28  ;;  %5743 = vst [vmem:[#allocation30_spill] sm:$0xff] %v4332_v29  ;;  %2629 = vmatprep.mubr.msk.f32.mxu1 %vm393_vm10, %v5737_v59  ;;  %v4402_v62 = vld [vmem:[%s3883_s11 + $0x590] sm:$0xff]  ;;  %v5751_v29 = vpack.c.bf16 %v4126_v52, %v4101_v41  ;;  %vm423_vm1 = vcmp.eq.s32.totalorder %v4046_v19, %v4384_v2 }
  0xaf   : > { %3303 = vmatpush3.bf16.msra.mxu1 %v5741_v44  ;;  %v4334_v44 = vpop.permute.xlu1 %344  ;;  %3273 = vmatprep.subr.bf16.mxu0 %v5744_v1  ;;  %v4422_v1 = vld [vmem:[%s3883_s11 + $0x4a0] sm:$0xff]  ;;  %vm425_vm2 = vcmp.eq.s32.totalorder %v4049_v21, %v4384_v2  ;;  %v3364_v41 = vpack.c.bf16 %v4405_v33, %v4402_v62  ;;  %vm422_vm3 = vcmp.eq.s32.totalorder %v4053_v22, %v4384_v2  ;;  %v932_v62 = vld [vmem:[%s3883_s11 + $0x5b0] sm:$0xff] }
  0xb0   : > { %2614 = vmatmul.mubr.msk.f32.gmra.mrb[4].mxu0 %vm390_vm11, %v5737_v59  ;;  %2630 = vmatmul.mubr.msk.f32.gmra.mrb[4].mxu1 %vm392_vm12, %v5737_v59  ;;  %vm407_vm13 = vcmp.eq.s32.totalorder %v4046_v19, %v4334_v44  ;;  %vm409_vm14 = vcmp.eq.s32.totalorder %v4049_v21, %v4334_v44  ;;  %vm406_vm15 = vcmp.eq.s32.totalorder %v4053_v22, %v4334_v44  ;;  %v884_v26 = vld [vmem:[%s3883_s11 + $0x430] sm:$0xff]  ;;  %v902_v33 = vld [vmem:[%s3883_s11 + $0x4c0] sm:$0xff] }
  0xb1   : > { %3275 = vmatpush3.bf16.msra.mxu0 %v5747_v50  ;;  %3305 = vmatprep.subr.bf16.mxu1 %v5748_v32  ;;  %v4416_v50 = vld [vmem:[%s3883_s11 + $0x510] sm:$0xff]  ;;  %v4419_v32 = vld [vmem:[%s3883_s11 + $0x518] sm:$0xff]  ;;  %vm408_vm0 = vcmp.eq.s32.totalorder %v4056_v23, %v4334_v44  ;;  %v3336_v53 = vpack.c.bf16 %v4437_v35, %v4422_v1  ;;  %vm424_vm4 = vcmp.eq.s32.totalorder %v4056_v23, %v4384_v2  ;;  %v903_v35 = vld [vmem:[%s3883_s11 + $0x4c8] sm:$0xff] }
  0xb2   : > { %2615 = vmatprep.mubr.msk.f32.mxu0 %vm407_vm13, %v5737_v59  ;;  %2631 = vmatprep.mubr.msk.f32.mxu1 %vm409_vm14, %v5737_v59  ;;  %v4493_v54 = vpop.permute.xlu0 %353  ;;  %v3338_v52 = vpack.c.bf16 %v4443_v37, %v4440_v18  ;;  %v5800_v1 = vpack.c.bf16 %v4419_v32, %v4416_v50  ;;  %v916_v32 = vld [vmem:[%s3883_s11 + $0x530] sm:$0xff]  ;;  %v3344_v18 = vpack.c.bf16 %v903_v35, %v902_v33  ;;  %v886_v37 = vld [vmem:[%s3883_s11 + $0x440] sm:$0xff] }
  0xb3   : > { %3307 = vmatpush3.bf16.msra.mxu1 %v5749_v46  ;;  %3277 = vmatprep.subr.bf16.mxu0 %v5750_v34  ;;  %v4454_v46 = vld [vmem:[%s3883_s11 + $0x5a0] sm:$0xff]  ;;  %v4457_v34 = vld [vmem:[%s3883_s11 + $0x5a8] sm:$0xff]  ;;  %v4462_v28 = vpop.permute.xlu1 %350  ;;  %vm455_vm9 = vcmp.eq.s32.totalorder %v4046_v19, %v4493_v54  ;;  %vm457_vm10 = vcmp.eq.s32.totalorder %v4049_v21, %v4493_v54  ;;  %vm454_vm14 = vcmp.eq.s32.totalorder %v4053_v22, %v4493_v54 }
  0xb4   : > { %2616 = vmatmul.mubr.msk.f32.gmra.mrb[6].mxu0 %vm406_vm15, %v5737_v59  ;;  %2632 = vmatmul.mubr.msk.f32.gmra.mrb[6].mxu1 %vm408_vm0, %v5737_v59  ;;  %vm439_vm5 = vcmp.eq.s32.totalorder %v4046_v19, %v4462_v28  ;;  %vm441_vm6 = vcmp.eq.s32.totalorder %v4049_v21, %v4462_v28  ;;  %vm438_vm7 = vcmp.eq.s32.totalorder %v4053_v22, %v4462_v28 }
  0xb5   : > { %3279 = vmatpush3.bf16.msra.mxu0 %v5751_v29  ;;  %3309 = vmatprep.subr.bf16.mxu1 %v5752_v38  ;;  %v5753_v29 = vpack.c.bf16 %v4146_v56, %v4143_v55  ;;  %v5754_v38 = vpack.c.bf16 %v4152_v58, %v4149_v57  ;;  %v3368_v55 = vpack.c.bf16 %v4457_v34, %v4454_v46  ;;  %v5769_v56 = vld [vmem:[#allocation15_spill] sm:$0xff]  ;;  %v5770_v57 = vld [vmem:[#allocation16_spill] sm:$0xff]  ;;  %v934_v34 = vld [vmem:[%s3883_s11 + $0x5c0] sm:$0xff] }
  0xb6   : > { %2617 = vmatprep.mubr.msk.f32.mxu0 %vm423_vm1, %v5737_v59  ;;  %2633 = vmatprep.mubr.msk.f32.mxu1 %vm425_vm2, %v5737_v59  ;;  %v5755_v58 = vpack.c.bf16 %v4166_v4, %v4163_v3  ;;  %vm440_vm8 = vcmp.eq.s32.totalorder %v4056_v23, %v4462_v28  ;;  %v5757_v4 = vpack.c.bf16 %v4186_v12, %v4183_v11  ;;  %v5762_v11 = vld [vmem:[#allocation19_spill] sm:$0xff]  ;;  %v5763_v12 = vld [vmem:[#allocation21_spill] sm:$0xff] }
  0xb7   : > { %3311 = vmatpush3.bf16.msra.mxu1 %v5753_v29  ;;  %3281 = vmatprep.subr.bf16.mxu0 %v5754_v38  ;;  %v5756_v29 = vpack.c.bf16 %v4180_v10, %v4169_v5  ;;  %v4535_v3 = vpop.permute.xlu1 %356  ;;  %v5758_v5 = vpack.c.bf16 %v4202_v48, %v4199_v27  ;;  %v5759_v10 = vld [vmem:[#allocation8_spill] sm:$0xff]  ;;  %v5760_v38 = vld [vmem:[#allocation9_spill] sm:$0xff]  ;;  %vm456_vm1 = vcmp.eq.s32.totalorder %v4056_v23, %v4493_v54 }
  0xb8   : > { %2618 = vmatmul.mubr.msk.f32.gmra.mrb[8].mxu0 %vm422_vm3, %v5737_v59  ;;  %2634 = vmatmul.mubr.msk.f32.gmra.mrb[8].mxu1 %vm424_vm4, %v5737_v59  ;;  %vm369_vm11 = vcmp.eq.s32.totalorder %v5759_v10, %v4115_v47  ;;  %vm366_vm12 = vcmp.eq.s32.totalorder %v5760_v38, %v4115_v47  ;;  %v5764_v27 = vld [vmem:[#allocation20_spill] sm:$0xff]  ;;  %vm363_vm2 = vcmp.eq.s32.totalorder %v5769_v56, %v4115_v47 }
  0xb9   : > { %3283 = vmatpush3.bf16.msra.mxu0 %v5755_v58  ;;  %3313 = vmatprep.subr.bf16.mxu1 %v5756_v29  ;;  %v5761_v58 = vld [vmem:[#allocation10_spill] sm:$0xff]  ;;  %v5765_v48 = vpack.c.bf16 %v5763_v12, %v5764_v27  ;;  %v5766_v29 = vld [vmem:[#allocation23_spill] sm:$0xff]  ;;  %vm365_vm3 = vcmp.eq.s32.totalorder %v5770_v57, %v4115_v47  ;;  %v5771_v12 = vpack.c.bf16 %v4228_v16, %v4225_v24 }
  0xba   : > { %2619 = vmatprep.mubr.msk.f32.mxu0 %vm439_vm5, %v5737_v59  ;;  %2635 = vmatprep.mubr.msk.f32.mxu1 %vm441_vm6, %v5737_v59  ;;  %vm471_vm6 = vcmp.eq.s32.totalorder %v4046_v19, %v4535_v3  ;;  %v5772_v27 = vpack.c.bf16 %v4234_v6, %v4231_v7  ;;  %vm473_vm5 = vcmp.eq.s32.totalorder %v4049_v21, %v4535_v3  ;;  %v5774_v6 = vld [vmem:[#allocation25_spill] sm:$0xff]  ;;  %v5775_v7 = vld [vmem:[#allocation24_spill] sm:$0xff]  ;;  %v5778_v21 = vld [vmem:[#allocation18_spill] sm:$0xff] }
  0xbb   : > { %3315 = vmatpush3.bf16.msra.mxu1 %v5757_v4  ;;  %3285 = vmatprep.subr.bf16.mxu0 %v5758_v5  ;;  %v5767_v4 = vld [vmem:[#allocation22_spill] sm:$0xff]  ;;  %v5776_v16 = vpack.c.bf16 %v5774_v6, %v5775_v7  ;;  %v5777_v24 = vpack.c.bf16 %v4254_v60, %v4251_v8  ;;  %vm472_vm4 = vcmp.eq.s32.totalorder %v4056_v23, %v4535_v3  ;;  %v5786_v23 = vld [vmem:[#allocation12_spill] sm:$0xff]  ;;  %v905_v7 = vld [vmem:[%s3883_s11 + $0x4d8] sm:$0xff] }
  0xbc   : > { %2620 = vmatmul.mubr.msk.f32.gmra.mrb[10].mxu0 %vm438_vm7, %v5737_v59  ;;  %2636 = vmatmul.mubr.msk.f32.gmra.mrb[10].mxu1 %vm440_vm8, %v5737_v59  ;;  %v5768_v5 = vpack.c.bf16 %v5766_v29, %v5767_v4  ;;  %vm381_vm0 = vcmp.eq.s32.totalorder %v5770_v57, %v5762_v11  ;;  %v5779_v60 = vpack.c.bf16 %v4260_v61, %v4257_v0  ;;  %v5780_v8 = vld [vmem:[#allocation26_spill] sm:$0xff]  ;;  %v5790_v29 = vld [vmem:[#allocation28_spill] sm:$0xff] }
  0xbd   : > { %3287 = vmatpush3.bf16.msra.mxu0 %v5765_v48  ;;  %2621 = vmatprep.mubr.msk.f32.mxu0 %vm455_vm9, %v5737_v59  ;;  %v5773_v48 = vld [vmem:[#allocation17_spill] sm:$0xff]  ;;  %v5781_v19 = vpack.c.bf16 %v4280_v30, %v5780_v8  ;;  %vm395_vm8 = vcmp.eq.s32.totalorder %v5769_v56, %v4188_v13  ;;  %v5782_v30 = vld [vmem:[#allocation27_spill] sm:$0xff]  ;;  %v5784_v0 = vpack.c.bf16 %v4301_v42, %v4298_v51  ;;  %v904_v6 = vld [vmem:[%s3883_s11 + $0x4d0] sm:$0xff] }
  0xbe   : > { %3317 = vmatprep.subr.bf16.mxu1 %v5768_v5  ;;  %2637 = vmatprep.mubr.msk.f32.mxu1 %vm457_vm10, %v5737_v59  ;;  %vm362_vm9 = vcmp.eq.s32.totalorder %v5773_v48, %v4115_v47  ;;  %vm379_vm10 = vcmp.eq.s32.totalorder %v5769_v56, %v5762_v11  ;;  %vm378_vm7 = vcmp.eq.s32.totalorder %v5773_v48, %v5762_v11  ;;  %v5787_v42 = vld [vmem:[#allocation13_spill] sm:$0xff]  ;;  %v888_v8 = vld [vmem:[%s3883_s11 + $0x450] sm:$0xff] }
  0xbf   : > { %3319 = vmatpush3.bf16.msra.mxu1 %v5771_v12  ;;  %3289 = vmatprep.subr.bf16.mxu0 %v5772_v27  ;;  %v5783_v61 = vpack.c.bf16 %v4286_v45, %v5782_v30  ;;  %vm397_vm15 = vcmp.eq.s32.totalorder %v5770_v57, %v4188_v13  ;;  %v5788_v45 = vld [vmem:[#allocation14_spill] sm:$0xff]  ;;  %v5789_v51 = vpack.c.bf16 %v4307_v17, %v4304_v14  ;;  %v5794_v17 = vld [vmem:[#allocation29_spill] sm:$0xff]  ;;  %v5798_v12 = vld [vmem:[#allocation31_spill] sm:$0xff] }
  0xc0   : > { %2622 = vmatmul.mubr.msk.f32.gmra.mrb[12].mxu0 %vm454_vm14, %v5737_v59  ;;  %2638 = vmatmul.mubr.msk.f32.gmra.mrb[12].mxu1 %vm456_vm1, %v5737_v59  ;;  %vm470_vm14 = vcmp.eq.s32.totalorder %v4053_v22, %v4535_v3  ;;  %vm364_vm1 = vcmp.eq.s32.totalorder %v5778_v21, %v4115_v47  ;;  %v5785_v22 = vld [vmem:[#allocation11_spill] sm:$0xff]  ;;  %v5791_v4 = vpack.c.bf16 %v4326_v25, %v5790_v29  ;;  %v5793_v14 = vld [vmem:[#allocation30_spill] sm:$0xff]  ;;  %v920_v29 = vld [vmem:[%s3883_s11 + $0x550] sm:$0xff] }
  0xc1   : > { %3291 = vmatpush3.bf16.msra.mxu0 %v5776_v16  ;;  %3321 = vmatprep.subr.bf16.mxu1 %v5777_v24  ;;  %v5792_v25 = vpack.c.bf16 %v4353_v49, %v4350_v15  ;;  %vm402_vm13 = vcmp.eq.s32.totalorder %v5787_v42, %v4188_v13  ;;  %v5795_v5 = vpack.c.bf16 %v5793_v14, %v5794_v17  ;;  %v5797_v49 = vld [vmem:[#allocation32_spill] sm:$0xff]  ;;  %v937_v24 = vld [vmem:[%s3883_s11 + $0x5d8] sm:$0xff]  ;;  %v938_v14 = vld [vmem:[%s3883_s11 + $0x5e0] sm:$0xff] }
  0xc2   : > { %2623 = vmatprep.mubr.msk.f32.mxu0 %vm471_vm6, %v5737_v59  ;;  %2639 = vmatprep.mubr.msk.f32.mxu1 %vm473_vm5, %v5737_v59  ;;  %vm462_vm6 = vcmp.eq.s32.totalorder %v5760_v38, %v4493_v54  ;;  %vm419_vm5 = vcmp.eq.s32.totalorder %v5785_v22, %v4334_v44  ;;  %v5796_v15 = vpack.c.bf16 %v4379_v63, %v4376_v9  ;;  %v933_v63 = vld [vmem:[%s3883_s11 + $0x5b8] sm:$0xff]  ;;  %v936_v16 = vld [vmem:[%s3883_s11 + $0x5d0] sm:$0xff]  ;;  %v939_v17 = vld [vmem:[%s3883_s11 + $0x5e8] sm:$0xff] }
  0xc3   : > { %3323 = vmatpush3.bf16.msra.mxu1 %v5779_v60  ;;  %3293 = vmatprep.subr.bf16.mxu0 %v5781_v19  ;;  %v5799_v9 = vpack.c.bf16 %v5797_v49, %v5798_v12  ;;  %v3372_v50 = vpack.c.bf16 %v933_v63, %v932_v62  ;;  %v3342_v46 = vpack.c.bf16 %v885_v31, %v884_v26  ;;  %v889_v19 = vld [vmem:[%s3883_s11 + $0x458] sm:$0xff]  ;;  %v891_v49 = vld [vmem:[%s3883_s11 + $0x468] sm:$0xff]  ;;  %v922_v26 = vld [vmem:[%s3883_s11 + $0x560] sm:$0xff] }
  0xc4   : > { %2624 = vmatmul.mubr.msk.f32.gmra.mrb[14].mxu0 %vm470_vm14, %v5737_v59  ;;  %2640 = vmatmul.mubr.msk.f32.gmra.mrb[14].mxu1 %vm472_vm4, %v5737_v59  ;;  %vm380_vm4 = vcmp.eq.s32.totalorder %v5778_v21, %v5762_v11  ;;  %vm403_vm14 = vcmp.eq.s32.totalorder %v5785_v22, %v4188_v13  ;;  %v3348_v60 = vpack.c.bf16 %v905_v7, %v904_v6  ;;  %v909_v62 = vld [vmem:[%s3883_s11 + $0x4f8] sm:$0xff]  ;;  %v923_v31 = vld [vmem:[%s3883_s11 + $0x568] sm:$0xff] }
  0xc5   : > { %3295 = vmatpush3.bf16.msra.mxu0 %v5783_v61  ;;  %3325 = vmatprep.subr.bf16.mxu1 %v5784_v0  ;;  %v906_v61 = vld [vmem:[%s3883_s11 + $0x4e0] sm:$0xff]  ;;  %v907_v0 = vld [vmem:[%s3883_s11 + $0x4e8] sm:$0xff]  ;;  %v3384_v63 = vpack.c.bf16 %v939_v17, %v938_v14  ;;  %v925_v6 = vld [vmem:[%s3883_s11 + $0x578] sm:$0xff] }
  0xc6   : > { %2641 = vmatprep.mubr.msk.f32.mxu0 %vm363_vm2, %v5737_v59  ;;  %2657 = vmatprep.mubr.msk.f32.mxu1 %vm365_vm3, %v5737_v59  ;;  %vm394_vm2 = vcmp.eq.s32.totalorder %v5773_v48, %v4188_v13  ;;  %vm435_vm3 = vcmp.eq.s32.totalorder %v5785_v22, %v4384_v2  ;;  %v976_v17 = vld [vmem:[%s3883_s11 + $0x710] sm:$0xff] }
  0xc7   : > { %3327 = vmatpush3.bf16.msra.mxu1 %v5789_v51  ;;  %3329 = vmatprep.subr.bf16.mxu0 %v5791_v4  ;;  %v3380_v51 = vpack.c.bf16 %v937_v24, %v936_v16  ;;  %v921_v4 = vld [vmem:[%s3883_s11 + $0x558] sm:$0xff]  ;;  %v960_v24 = vld [vmem:[%s3883_s11 + $0x690] sm:$0xff] }
  0xc8   : > { %2642 = vmatmul.mubr.msk.f32.vlgmr.msra.gmra.mrb[16].mxu0 %vm362_vm9, %v5737_v59  ;;  %3361 = vmatprep.subr.bf16.mxu1 %v5792_v25  ;;  %vm436_vm9 = vcmp.eq.s32.totalorder %v5788_v45, %v4384_v2  ;;  %v3350_v25 = vpack.c.bf16 %v889_v19, %v888_v8  ;;  %v3382_v12 = vpack.c.bf16 %v921_v4, %v920_v29  ;;  %v974_v8 = vld [vmem:[%s3883_s11 + $0x700] sm:$0xff]  ;;  %v975_v19 = vld [vmem:[%s3883_s11 + $0x708] sm:$0xff]  ;;  %v945_v29 = vld [vmem:[%s3883_s11 + $0x618] sm:$0xff] }
  0xc9   : > { %3331 = vmatpush3.bf16.msra.mxu0 %v5795_v5  ;;  %2643 = vmatprep.mubr.msk.f32.mxu0 %vm379_vm10, %v5737_v59  ;;  %vm467_vm10 = vcmp.eq.s32.totalorder %v5785_v22, %v4493_v54  ;;  %v3352_v5 = vpack.c.bf16 %v907_v0, %v906_v61  ;;  %v993_v61 = vld [vmem:[%s3883_s11 + $0x798] sm:$0xff]  ;;  %v962_v4 = vld [vmem:[%s3883_s11 + $0x6a0] sm:$0xff] }
  0xca   : > { %2658 = vmatmul.mubr.msk.f32.vlgmr.msra.gmra.mrb[16].mxu1 %vm364_vm1, %v5737_v59  ;;  %3333 = vmatprep.subr.bf16.mxu0 %v5796_v15  ;;  %vm396_vm1 = vcmp.eq.s32.totalorder %v5778_v21, %v4188_v13  ;;  %v890_v15 = vld [vmem:[%s3883_s11 + $0x460] sm:$0xff] }
  0xcb   : > { %2659 = vmatprep.mubr.msk.f32.mxu1 %vm381_vm0, %v5737_v59  ;;  %3363 = vmatpush3.bf16.msra.mxu1 %v5799_v9  ;;  %vm451_vm0 = vcmp.eq.s32.totalorder %v5785_v22, %v4462_v28  ;;  %v908_v9 = vld [vmem:[%s3883_s11 + $0x4f0] sm:$0xff]  ;;  %v3354_v35 = vpack.c.bf16 %v891_v49, %v890_v15  ;;  %v994_v49 = vld [vmem:[%s3883_s11 + $0x7a0] sm:$0xff] }
  0xcc   : > { %2644 = vmatmul.mubr.msk.f32.gmra.mrb[18].mxu0 %vm378_vm7, %v5737_v59  ;;  %3365 = vmatprep.subr.bf16.mxu1 %v3364_v41  ;;  %vm482_vm7 = vcmp.eq.s32.totalorder %v5787_v42, %v4535_v3  ;;  %v935_v41 = vld [vmem:[%s3883_s11 + $0x5c8] sm:$0xff] }
  0xcd   : > { %3335 = vmatpush3.bf16.msra.mxu0 %v3334_v39  ;;  %2645 = vmatprep.mubr.msk.f32.mxu0 %vm395_vm8, %v5737_v59  ;;  %vm466_vm8 = vcmp.eq.s32.totalorder %v5787_v42, %v4493_v54  ;;  %v917_v39 = vld [vmem:[%s3883_s11 + $0x538] sm:$0xff] }
  0xce   : > { %2660 = vmatmul.mubr.msk.f32.gmra.mrb[18].mxu1 %vm380_vm4, %v5737_v59  ;;  %3337 = vmatprep.subr.bf16.mxu0 %v3336_v53  ;;  %vm485_vm4 = vcmp.eq.s32.totalorder %v5786_v23, %v4535_v3  ;;  %v5801_v53 = vpack.c.bf16 %v4483_v20, %v4480_v43  ;;  %v3374_v27 = vpack.c.bf16 %v917_v39, %v916_v32  ;;  %v918_v20 = vld [vmem:[%s3883_s11 + $0x540] sm:$0xff]  ;;  %v941_v32 = vld [vmem:[%s3883_s11 + $0x5f8] sm:$0xff] }
  0xcf   : > { %2661 = vmatprep.mubr.msk.f32.mxu1 %vm397_vm15, %v5737_v59  ;;  %3367 = vmatpush3.bf16.msra.mxu1 %v5800_v1  ;;  %vm411_vm15 = vcmp.eq.s32.totalorder %v5769_v56, %v4334_v44  ;;  %v3376_v43 = vpack.c.bf16 %v935_v41, %v934_v34  ;;  %v5803_v1 = vld [vmem:[#allocation6_spill] sm:$0xff]  ;;  %v3356_v39 = vpack.c.bf16 %v909_v62, %v908_v9  ;;  %v893_v34 = vld [vmem:[%s3883_s11 + $0x478] sm:$0xff] }
  0xd0   : > { %2646 = vmatmul.mubr.msk.f32.gmra.mrb[20].mxu0 %vm394_vm2, %v5737_v59  ;;  %3369 = vmatprep.subr.bf16.mxu1 %v3368_v55  ;;  %vm413_vm2 = vcmp.eq.s32.totalorder %v5770_v57, %v4334_v44  ;;  %v5802_v55 = vpack.c.bf16 %v4477_v40, %v4460_v36  ;;  %v919_v36 = vld [vmem:[%s3883_s11 + $0x548] sm:$0xff]  ;;  %v310_v33 = vadd.s32 1152, %v5803_v1  ;;  %v3386_v41 = vpack.c.bf16 %v923_v31, %v922_v26  ;;  %v946_v62 = vld [vmem:[%s3883_s11 + $0x620] sm:$0xff]  ;;  %v964_v31 = vld [vmem:[%s3883_s11 + $0x6b0] sm:$0xff] }
  0xd1   : > { %3339 = vmatpush3.bf16.msra.mxu0 %v3338_v52  ;;  %2647 = vmatprep.mubr.msk.f32.mxu0 %vm411_vm15, %v5737_v59  ;;  %v887_v52 = vld [vmem:[%s3883_s11 + $0x448] sm:$0xff]  ;;  %vm427_vm15 = vcmp.eq.s32.totalorder %v5769_v56, %v4384_v2  ;;  %v3378_v30 = vpack.c.bf16 %v919_v36, %v918_v20  ;;  %v942_v36 = vld [vmem:[%s3883_s11 + $0x600] sm:$0xff]  ;;  %v965_v1 = vld [vmem:[%s3883_s11 + $0x6b8] sm:$0xff] }
  0xd2   : > { %2662 = vmatmul.mubr.msk.f32.gmra.mrb[20].mxu1 %vm396_vm1, %v5737_v59  ;;  %3341 = vmatprep.subr.bf16.mxu0 %v5801_v53  ;;  %vm410_vm1 = vcmp.eq.s32.totalorder %v5773_v48, %v4334_v44  ;;  %v3346_v40 = vpack.c.bf16 %v887_v52, %v886_v37  ;;  %v958_v53 = vld [vmem:[%s3883_s11 + $0x680] sm:$0xff]  ;;  %v5804_v52 = vld [vmem:[#allocation7_spill] sm:$0xff] }
  0xd3   : > { %2663 = vmatprep.mubr.msk.f32.mxu1 %vm413_vm2, %v5737_v59  ;;  %3371 = vmatpush3.bf16.msra.mxu1 %v5802_v55  ;;  %vm412_vm2 = vcmp.eq.s32.totalorder %v5778_v21, %v4334_v44  ;;  %v4920_v55 = vadd.s32 %v5804_v52, %v310_v33  ;;  %v991_v20 = vld [vmem:[%s3883_s11 + $0x788] sm:$0xff] }
  0xd4   : > { %2648 = vmatmul.mubr.msk.f32.gmra.mrb[22].mxu0 %vm410_vm1, %v5737_v59  ;;  %3373 = vmatprep.subr.bf16.mxu1 %v3372_v50  ;;  %vm429_vm1 = vcmp.eq.s32.totalorder %v5770_v57, %v4384_v2  ;;  %v940_v50 = vld [vmem:[%s3883_s11 + $0x5f0] sm:$0xff]  ;;  %v967_v52 = vld [vmem:[%s3883_s11 + $0x6c8] sm:$0xff] }
  0xd5   : > { %3343 = vmatpush3.bf16.msra.mxu0 %v3342_v46  ;;  %2649 = vmatprep.mubr.msk.f32.mxu0 %vm427_vm15, %v5737_v59  ;;  %vm426_vm15 = vcmp.eq.s32.totalorder %v5773_v48, %v4384_v2  ;;  %v892_v46 = vld [vmem:[%s3883_s11 + $0x470] sm:$0xff]  ;;  %v3388_v37 = vpack.c.bf16 %v941_v32, %v940_v50  ;;  %v979_v50 = vld [vmem:[%s3883_s11 + $0x728] sm:$0xff] }
  0xd6   : > { %2664 = vmatmul.mubr.msk.f32.gmra.mrb[22].mxu1 %vm412_vm2, %v5737_v59  ;;  %3345 = vmatprep.subr.bf16.mxu0 %v3344_v18  ;;  %vm443_vm2 = vcmp.eq.s32.totalorder %v5769_v56, %v4462_v28  ;;  %v959_v18 = vld [vmem:[%s3883_s11 + $0x688] sm:$0xff]  ;;  %v3358_v7 = vpack.c.bf16 %v893_v34, %v892_v46  ;;  %v997_v46 = vld [vmem:[%s3883_s11 + $0x7b8] sm:$0xff]  ;;  %v3404_v34 = vpack.c.bf16 %v965_v1, %v964_v31  ;;  %v972_v1 = vld [vmem:[%s3883_s11 + $0x6f0] sm:$0xff] }
  0xd7   : > { %2665 = vmatprep.mubr.msk.f32.mxu1 %vm429_vm1, %v5737_v59  ;;  %3375 = vmatpush3.bf16.msra.mxu1 %v3374_v27  ;;  %vm428_vm1 = vcmp.eq.s32.totalorder %v5778_v21, %v4384_v2  ;;  %v924_v27 = vld [vmem:[%s3883_s11 + $0x570] sm:$0xff] }
  0xd8   : > { %2650 = vmatmul.mubr.msk.f32.gmra.mrb[24].mxu0 %vm426_vm15, %v5737_v59  ;;  %3377 = vmatprep.subr.bf16.mxu1 %v3376_v43  ;;  %vm445_vm15 = vcmp.eq.s32.totalorder %v5770_v57, %v4462_v28  ;;  %v990_v43 = vld [vmem:[%s3883_s11 + $0x780] sm:$0xff]  ;;  %v3390_v16 = vpack.c.bf16 %v925_v6, %v924_v27  ;;  %v980_v6 = vld [vmem:[%s3883_s11 + $0x730] sm:$0xff] }
  0xd9   : > { %3347 = vmatpush3.bf16.msra.mxu0 %v3346_v40  ;;  %2651 = vmatprep.mubr.msk.f32.mxu0 %vm443_vm2, %v5737_v59  ;;  %vm442_vm2 = vcmp.eq.s32.totalorder %v5773_v48, %v4462_v28  ;;  %v943_v40 = vld [vmem:[%s3883_s11 + $0x608] sm:$0xff] }
  0xda   : > { %2666 = vmatmul.mubr.msk.f32.gmra.mrb[24].mxu1 %vm428_vm1, %v5737_v59  ;;  %3349 = vmatprep.subr.bf16.mxu0 %v3348_v60  ;;  %vm459_vm1 = vcmp.eq.s32.totalorder %v5769_v56, %v4493_v54  ;;  %v961_v60 = vld [vmem:[%s3883_s11 + $0x698] sm:$0xff] }
  0xdb   : > { %2667 = vmatprep.mubr.msk.f32.mxu1 %vm445_vm15, %v5737_v59  ;;  %3379 = vmatpush3.bf16.msra.mxu1 %v3378_v30  ;;  %vm444_vm15 = vcmp.eq.s32.totalorder %v5778_v21, %v4462_v28  ;;  %v992_v30 = vld [vmem:[%s3883_s11 + $0x790] sm:$0xff]  ;;  %v3396_v0 = vpack.c.bf16 %v961_v60, %v960_v24 }
  0xdc   : > { %2652 = vmatmul.mubr.msk.f32.gmra.mrb[26].mxu0 %vm442_vm2, %v5737_v59  ;;  %3381 = vmatprep.subr.bf16.mxu1 %v3380_v51  ;;  %vm461_vm2 = vcmp.eq.s32.totalorder %v5770_v57, %v4493_v54  ;;  %v944_v51 = vld [vmem:[%s3883_s11 + $0x610] sm:$0xff]  ;;  %v3428_v14 = vpack.c.bf16 %v993_v61, %v992_v30 }
  0xdd   : > { %3351 = vmatpush3.bf16.msra.mxu0 %v3350_v25  ;;  %2653 = vmatprep.mubr.msk.f32.mxu0 %vm459_vm1, %v5737_v59  ;;  %vm458_vm1 = vcmp.eq.s32.totalorder %v5773_v48, %v4493_v54  ;;  %v963_v25 = vld [vmem:[%s3883_s11 + $0x6a8] sm:$0xff]  ;;  %v3398_v15 = vpack.c.bf16 %v945_v29, %v944_v51  ;;  %v968_v60 = vld [vmem:[%s3883_s11 + $0x6d0] sm:$0xff] }
  0xde   : > { %2668 = vmatmul.mubr.msk.f32.gmra.mrb[26].mxu1 %vm444_vm15, %v5737_v59  ;;  %3353 = vmatprep.subr.bf16.mxu0 %v3352_v5  ;;  %vm475_vm15 = vcmp.eq.s32.totalorder %v5769_v56, %v4535_v3  ;;  %v3392_v56 = vpack.c.bf16 %v959_v18, %v958_v53  ;;  %v977_v5 = vld [vmem:[%s3883_s11 + $0x718] sm:$0xff]  ;;  %v3400_v9 = vpack.c.bf16 %v963_v25, %v962_v4  ;;  %v1000_v61 = vld [vmem:[%s3883_s11 + $0x7d0] sm:$0xff]  ;;  %v970_v25 = vld [vmem:[%s3883_s11 + $0x6e0] sm:$0xff] }
  0xdf   : > { %2669 = vmatprep.mubr.msk.f32.mxu1 %vm461_vm2, %v5737_v59  ;;  %3383 = vmatpush3.bf16.msra.mxu1 %v3382_v12  ;;  %vm460_vm2 = vcmp.eq.s32.totalorder %v5778_v21, %v4493_v54  ;;  %v995_v12 = vld [vmem:[%s3883_s11 + $0x7a8] sm:$0xff]  ;;  %v3430_v26 = vpack.c.bf16 %v977_v5, %v976_v17  ;;  %v949_v53 = vld [vmem:[%s3883_s11 + $0x638] sm:$0xff]  ;;  %v952_v29 = vld [vmem:[%s3883_s11 + $0x650] sm:$0xff] }
  0xe0   : > { %2654 = vmatmul.mubr.msk.f32.gmra.mrb[28].mxu0 %vm458_vm1, %v5737_v59  ;;  %3385 = vmatprep.subr.bf16.mxu1 %v3384_v63  ;;  %vm477_vm1 = vcmp.eq.s32.totalorder %v5770_v57, %v4535_v3  ;;  %v3424_v57 = vpack.c.bf16 %v991_v20, %v990_v43  ;;  %v947_v63 = vld [vmem:[%s3883_s11 + $0x628] sm:$0xff]  ;;  %v3432_v33 = vpack.c.bf16 %v995_v12, %v994_v49  ;;  %v998_v20 = vld [vmem:[%s3883_s11 + $0x7c0] sm:$0xff]  ;;  %v984_v5 = vld [vmem:[%s3883_s11 + $0x750] sm:$0xff] }
  0xe1   : > { %3355 = vmatpush3.bf16.msra.mxu0 %v3354_v35  ;;  %2655 = vmatprep.mubr.msk.f32.mxu0 %vm475_vm15, %v5737_v59  ;;  %vm474_vm15 = vcmp.eq.s32.totalorder %v5773_v48, %v4535_v3  ;;  %v3394_v48 = vpack.c.bf16 %v943_v40, %v942_v36  ;;  %v978_v35 = vld [vmem:[%s3883_s11 + $0x720] sm:$0xff]  ;;  %v3402_v32 = vpack.c.bf16 %v947_v63, %v946_v62 }
  0xe2   : > { %2670 = vmatmul.mubr.msk.f32.gmra.mrb[28].mxu1 %vm460_vm2, %v5737_v59  ;;  %3357 = vmatprep.subr.bf16.mxu0 %v3356_v39  ;;  %vm367_vm2 = vcmp.eq.s32.totalorder %v4920_v55, %v4115_v47  ;;  %v996_v39 = vld [vmem:[%s3883_s11 + $0x7b0] sm:$0xff]  ;;  %v3434_v18 = vpack.c.bf16 %v979_v50, %v978_v35  ;;  %v950_v40 = vld [vmem:[%s3883_s11 + $0x640] sm:$0xff] }
  0xe3   : > { %2671 = vmatprep.mubr.msk.f32.mxu1 %vm477_vm1, %v5737_v59  ;;  %3387 = vmatpush3.bf16.msra.mxu1 %v3386_v41  ;;  %vm476_vm1 = vcmp.eq.s32.totalorder %v5778_v21, %v4535_v3  ;;  %v3426_v21 = vpack.c.bf16 %v975_v19, %v974_v8  ;;  %v948_v41 = vld [vmem:[%s3883_s11 + $0x630] sm:$0xff]  ;;  %v3436_v27 = vpack.c.bf16 %v997_v46, %v996_v39  ;;  %v982_v19 = vld [vmem:[%s3883_s11 + $0x740] sm:$0xff] }
  0xe4   : > { %2656 = vmatmul.mubr.msk.f32.gmra.mrb[30].mxu0 %vm474_vm15, %v5737_v59  ;;  %3389 = vmatprep.subr.bf16.mxu1 %v3388_v37  ;;  %vm383_vm15 = vcmp.eq.s32.totalorder %v4920_v55, %v5762_v11  ;;  %v966_v37 = vld [vmem:[%s3883_s11 + $0x6c0] sm:$0xff]  ;;  %v3406_v43 = vpack.c.bf16 %v949_v53, %v948_v41  ;;  %v1004_v46 = vld [vmem:[%s3883_s11 + $0x7f0] sm:$0xff] }
  0xe5   : > { %3359 = vmatpush3.bf16.msra.mxu0 %v3358_v7  ;;  %2673 = vmatprep.mubr.msk.f32.mxu0 %vm367_vm2, %v5737_v59  ;;  %vm5807_vm2 = vcmp.eq.s32.totalorder %v5760_v38, %v5762_v11  ;;  %v981_v7 = vld [vmem:[%s3883_s11 + $0x738] sm:$0xff]  ;;  %v3408_v36 = vpack.c.bf16 %v967_v52, %v966_v37  ;;  %v1002_v12 = vld [vmem:[%s3883_s11 + $0x7e0] sm:$0xff]  ;;  %v956_v53 = vld [vmem:[%s3883_s11 + $0x670] sm:$0xff] }
  0xe6   : > { %2672 = vmatmul.mubr.msk.f32.gmra.mrb[30].mxu1 %vm476_vm1, %v5737_v59  ;;  %3393 = vmatprep.subr.bf16.mxu0 %v3392_v56  ;;  %vm399_vm1 = vcmp.eq.s32.totalorder %v4920_v55, %v4188_v13  ;;  %v999_v56 = vld [vmem:[%s3883_s11 + $0x7c8] sm:$0xff]  ;;  %v3438_v24 = vpack.c.bf16 %v981_v7, %v980_v6  ;;  %v954_v63 = vld [vmem:[%s3883_s11 + $0x660] sm:$0xff]  ;;  %v989_v6 = vld [vmem:[%s3883_s11 + $0x778] sm:$0xff] }
  0xe7   : > { %3391 = vmatpush3.bf16.msra.mxu1 %v3390_v16  ;;  %2689 = vmatprep.mubr.msk.f32.mxu1 %vm369_vm11, %v5737_v59  ;;  %vm5805_vm11 = vcmp.eq.s32.totalorder %v5761_v58, %v4115_v47  ;;  %v951_v16 = vld [vmem:[%s3883_s11 + $0x648] sm:$0xff]  ;;  %v3440_v8 = vpack.c.bf16 %v999_v56, %v998_v20  ;;  %v986_v50 = vld [vmem:[%s3883_s11 + $0x760] sm:$0xff] }
  0xe8   : > { %2674 = vmatmul.mubr.msk.f32.vlgmr.msra.gmra.mrb[32].mxu0 %vm366_vm12, %v5737_v59  ;;  %3425 = vmatprep.subr.bf16.mxu1 %v3424_v57  ;;  %vm5806_vm12 = vcmp.eq.s32.totalorder %v5759_v10, %v5762_v11  ;;  %v969_v57 = vld [vmem:[%s3883_s11 + $0x6d8] sm:$0xff]  ;;  %v3410_v30 = vpack.c.bf16 %v951_v16, %v950_v40 }
  0xe9   : > { %3395 = vmatpush3.bf16.msra.mxu0 %v3394_v48  ;;  %2675 = vmatprep.mubr.msk.f32.mxu0 %vm383_vm15, %v5737_v59  ;;  %vm5808_vm15 = vcmp.eq.s32.totalorder %v5761_v58, %v5762_v11  ;;  %v983_v48 = vld [vmem:[%s3883_s11 + $0x748] sm:$0xff]  ;;  %v3412_v51 = vpack.c.bf16 %v969_v57, %v968_v60 }
  0xea   : > { %2690 = vmatmul.mubr.msk.f32.vlgmr.msra.gmra.mrb[32].mxu1 %vm5805_vm11, %v5737_v59  ;;  %3397 = vmatprep.subr.bf16.mxu0 %v3396_v0  ;;  %vm5809_vm11 = vcmp.eq.s32.totalorder %v5759_v10, %v4188_v13  ;;  %v1001_v0 = vld [vmem:[%s3883_s11 + $0x7d8] sm:$0xff]  ;;  %v3442_v4 = vpack.c.bf16 %v983_v48, %v982_v19 }
  0xeb   : > { %2691 = vmatprep.mubr.msk.f32.mxu1 %vm5806_vm12, %v5737_v59  ;;  %3427 = vmatpush3.bf16.msra.mxu1 %v3426_v21  ;;  %vm5810_vm12 = vcmp.eq.s32.totalorder %v5760_v38, %v4188_v13  ;;  %v953_v21 = vld [vmem:[%s3883_s11 + $0x658] sm:$0xff]  ;;  %v3444_v17 = vpack.c.bf16 %v1001_v0, %v1000_v61 }
  0xec   : > { %2676 = vmatmul.mubr.msk.f32.gmra.mrb[34].mxu0 %vm5807_vm2, %v5737_v59  ;;  %3429 = vmatprep.subr.bf16.mxu1 %v3428_v14  ;;  %vm415_vm2 = vcmp.eq.s32.totalorder %v4920_v55, %v4334_v44  ;;  %v971_v14 = vld [vmem:[%s3883_s11 + $0x6e8] sm:$0xff]  ;;  %v3414_v49 = vpack.c.bf16 %v953_v21, %v952_v29 }
  0xed   : > { %3399 = vmatpush3.bf16.msra.mxu0 %v3398_v15  ;;  %2677 = vmatprep.mubr.msk.f32.mxu0 %vm399_vm1, %v5737_v59  ;;  %vm5811_vm1 = vcmp.eq.s32.totalorder %v5761_v58, %v4188_v13  ;;  %v985_v15 = vld [vmem:[%s3883_s11 + $0x758] sm:$0xff]  ;;  %v3416_v62 = vpack.c.bf16 %v971_v14, %v970_v25 }
  0xee   : > { %2692 = vmatmul.mubr.msk.f32.gmra.mrb[34].mxu1 %vm5808_vm15, %v5737_v59  ;;  %3401 = vmatprep.subr.bf16.mxu0 %v3400_v9  ;;  %vm5812_vm15 = vcmp.eq.s32.totalorder %v5759_v10, %v4334_v44  ;;  %v1003_v9 = vld [vmem:[%s3883_s11 + $0x7e8] sm:$0xff]  ;;  %v3446_v31 = vpack.c.bf16 %v985_v15, %v984_v5 }
  0xef   : > { %2693 = vmatprep.mubr.msk.f32.mxu1 %vm5809_vm11, %v5737_v59  ;;  %3431 = vmatpush3.bf16.msra.mxu1 %v3430_v26  ;;  %vm5813_vm11 = vcmp.eq.s32.totalorder %v5760_v38, %v4334_v44  ;;  %v955_v26 = vld [vmem:[%s3883_s11 + $0x668] sm:$0xff]  ;;  %v3448_v35 = vpack.c.bf16 %v1003_v9, %v1002_v12 }
  0xf0   : > { %2678 = vmatmul.mubr.msk.f32.gmra.mrb[36].mxu0 %vm5810_vm12, %v5737_v59  ;;  %3433 = vmatprep.subr.bf16.mxu1 %v3432_v33  ;;  %vm431_vm12 = vcmp.eq.s32.totalorder %v4920_v55, %v4384_v2  ;;  %v973_v33 = vld [vmem:[%s3883_s11 + $0x6f8] sm:$0xff]  ;;  %v3418_v39 = vpack.c.bf16 %v955_v26, %v954_v63 }
  0xf1   : > { %3403 = vmatpush3.bf16.msra.mxu0 %v3402_v32  ;;  %2679 = vmatprep.mubr.msk.f32.mxu0 %vm415_vm2, %v5737_v59  ;;  %vm5814_vm2 = vcmp.eq.s32.totalorder %v5761_v58, %v4334_v44  ;;  %v987_v32 = vld [vmem:[%s3883_s11 + $0x768] sm:$0xff]  ;;  %v3420_v41 = vpack.c.bf16 %v973_v33, %v972_v1 }
  0xf2   : > { %2694 = vmatmul.mubr.msk.f32.gmra.mrb[36].mxu1 %vm5811_vm1, %v5737_v59  ;;  %3405 = vmatprep.subr.bf16.mxu0 %v3404_v34  ;;  %vm5815_vm1 = vcmp.eq.s32.totalorder %v5759_v10, %v4384_v2  ;;  %v1005_v34 = vld [vmem:[%s3883_s11 + $0x7f8] sm:$0xff]  ;;  %v3450_v37 = vpack.c.bf16 %v987_v32, %v986_v50 }
  0xf3   : > { %2695 = vmatprep.mubr.msk.f32.mxu1 %vm5812_vm15, %v5737_v59  ;;  %3435 = vmatpush3.bf16.msra.mxu1 %v3434_v18  ;;  %vm5816_vm15 = vcmp.eq.s32.totalorder %v5760_v38, %v4384_v2  ;;  %v957_v18 = vld [vmem:[%s3883_s11 + $0x678] sm:$0xff]  ;;  %v3452_v52 = vpack.c.bf16 %v1005_v34, %v1004_v46 }
  0xf4   : > { %2680 = vmatmul.mubr.msk.f32.gmra.mrb[38].mxu0 %vm5813_vm11, %v5737_v59  ;;  %3437 = vmatprep.subr.bf16.mxu1 %v3436_v27  ;;  %vm447_vm11 = vcmp.eq.s32.totalorder %v4920_v55, %v4462_v28  ;;  %v988_v27 = vld [vmem:[%s3883_s11 + $0x770] sm:$0xff]  ;;  %v3422_v7 = vpack.c.bf16 %v957_v18, %v956_v53 }
  0xf5   : > { %3407 = vmatpush3.bf16.msra.mxu0 %v3406_v43  ;;  %2681 = vmatprep.mubr.msk.f32.mxu0 %vm431_vm12, %v5737_v59  ;;  %vm5817_vm12 = vcmp.eq.s32.totalorder %v5761_v58, %v4384_v2 }
  0xf6   : > { %2696 = vmatmul.mubr.msk.f32.gmra.mrb[38].mxu1 %vm5814_vm2, %v5737_v59  ;;  %3409 = vmatprep.subr.bf16.mxu0 %v3408_v36  ;;  %vm5818_vm2 = vcmp.eq.s32.totalorder %v5759_v10, %v4462_v28 }
  0xf7   : > { %2697 = vmatprep.mubr.msk.f32.mxu1 %vm5815_vm1, %v5737_v59  ;;  %3439 = vmatpush3.bf16.msra.mxu1 %v3438_v24  ;;  %vm5819_vm1 = vcmp.eq.s32.totalorder %v5760_v38, %v4462_v28 }
  0xf8   : > { %2682 = vmatmul.mubr.msk.f32.gmra.mrb[40].mxu0 %vm5816_vm15, %v5737_v59  ;;  %3441 = vmatprep.subr.bf16.mxu1 %v3440_v8  ;;  %vm463_vm15 = vcmp.eq.s32.totalorder %v4920_v55, %v4493_v54 }
  0xf9   : > { %3411 = vmatpush3.bf16.msra.mxu0 %v3410_v30  ;;  %2683 = vmatprep.mubr.msk.f32.mxu0 %vm447_vm11, %v5737_v59  ;;  %vm5820_vm11 = vcmp.eq.s32.totalorder %v5761_v58, %v4462_v28 }
  0xfa   : > { %2698 = vmatmul.mubr.msk.f32.gmra.mrb[40].mxu1 %vm5817_vm12, %v5737_v59  ;;  %3413 = vmatprep.subr.bf16.mxu0 %v3412_v51  ;;  %vm5821_vm12 = vcmp.eq.s32.totalorder %v5759_v10, %v4493_v54 }
  0xfb   : > { %2699 = vmatprep.mubr.msk.f32.mxu1 %vm5818_vm2, %v5737_v59  ;;  %3443 = vmatpush3.bf16.msra.mxu1 %v3442_v4  ;;  %vm479_vm2 = vcmp.eq.s32.totalorder %v4920_v55, %v4535_v3  ;;  %v3454_v55 = vpack.c.bf16 %v989_v6, %v988_v27 }
  0xfc   : > { %2684 = vmatmul.mubr.msk.f32.gmra.mrb[42].mxu0 %vm5819_vm1, %v5737_v59  ;;  %3445 = vmatprep.subr.bf16.mxu1 %v3444_v17  ;;  %vm5822_vm1 = vcmp.eq.s32.totalorder %v5761_v58, %v4493_v54 }
  0xfd   : > { %3415 = vmatpush3.bf16.msra.mxu0 %v3414_v49  ;;  %2685 = vmatprep.mubr.msk.f32.mxu0 %vm463_vm15, %v5737_v59  ;;  %vm5824_vm15 = vcmp.eq.s32.totalorder %v5760_v38, %v4535_v3 }
  0xfe   : > { %2700 = vmatmul.mubr.msk.f32.gmra.mrb[42].mxu1 %vm5820_vm11, %v5737_v59  ;;  %3417 = vmatprep.subr.bf16.mxu0 %v3416_v62  ;;  %vm5825_vm11 = vcmp.eq.s32.totalorder %v5785_v22, %v4115_v47 }
  0xff   : > { %2701 = vmatprep.mubr.msk.f32.mxu1 %vm5821_vm12, %v5737_v59  ;;  %3447 = vmatpush3.bf16.msra.mxu1 %v3446_v31  ;;  %vm5826_vm12 = vcmp.eq.s32.totalorder %v5761_v58, %v4535_v3 }
 0x100   : > { %2686 = vmatmul.mubr.msk.f32.gmra.mrb[44].mxu0 %vm462_vm6, %v5737_v59  ;;  %3449 = vmatprep.subr.bf16.mxu1 %v3448_v35  ;;  %vm5823_vm6 = vcmp.eq.s32.totalorder %v5759_v10, %v4535_v3 }
 0x101   : > { %3419 = vmatpush3.bf16.msra.mxu0 %v3418_v39  ;;  %2687 = vmatprep.mubr.msk.f32.mxu0 %vm479_vm2, %v5737_v59  ;;  %vm5827_vm2 = vcmp.eq.s32.totalorder %v5786_v23, %v4115_v47 }
 0x102   : > { %2702 = vmatmul.mubr.msk.f32.gmra.mrb[44].mxu1 %vm5822_vm1, %v5737_v59  ;;  %3421 = vmatprep.subr.bf16.mxu0 %v3420_v41  ;;  %vm5828_vm1 = vcmp.eq.s32.totalorder %v5787_v42, %v4115_v47 }
 0x103   : > { %2703 = vmatprep.mubr.msk.f32.mxu1 %vm5823_vm6, %v5737_v59  ;;  %3451 = vmatpush3.bf16.msra.mxu1 %v3450_v37  ;;  %vm5829_vm6 = vcmp.eq.s32.totalorder %v5785_v22, %v5762_v11 }
 0x104   : > { %2688 = vmatmul.mubr.msk.f32.gmra.mrb[46].mxu0 %vm5824_vm15, %v5737_v59  ;;  %3453 = vmatprep.subr.bf16.mxu1 %v3452_v52  ;;  %vm5830_vm15 = vcmp.eq.s32.totalorder %v5788_v45, %v4115_v47 }
 0x105   : > { %3423 = vmatpush3.bf16.msra.mxu0 %v3422_v7  ;;  %2705 = vmatprep.mubr.msk.f32.mxu0 %vm5825_vm11, %v5737_v59  ;;  %vm5831_vm11 = vcmp.eq.s32.totalorder %v5786_v23, %v5762_v11 }
 0x106   : > { %2704 = vmatmul.mubr.msk.f32.gmra.mrb[46].mxu1 %vm5826_vm12, %v5737_v59  ;;  %vm5832_vm12 = vcmp.eq.s32.totalorder %v5787_v42, %v5762_v11 }
 0x107   : > { %3455 = vmatpush3.bf16.msra.mxu1 %v3454_v55  ;;  %2721 = vmatprep.mubr.msk.f32.mxu1 %vm5827_vm2, %v5737_v59  ;;  %vm5833_vm2 = vcmp.eq.s32.totalorder %v5788_v45, %v5762_v11 }
 0x108   : > { %2706 = vmatmul.mubr.msk.f32.vlgmr.msra.gmra.mrb[48].mxu0 %vm5828_vm1, %v5737_v59  ;;  %vm5834_vm1 = vcmp.eq.s32.totalorder %v5786_v23, %v4188_v13 }
 0x109   : > { %2707 = vmatprep.mubr.msk.f32.mxu0 %vm5829_vm6, %v5737_v59  ;;  %vm5836_vm6 = vcmp.eq.s32.totalorder %v5786_v23, %v4334_v44 }
 0x10a   : > { %2722 = vmatmul.mubr.msk.f32.vlgmr.msra.gmra.mrb[48].mxu1 %vm5830_vm15, %v5737_v59  ;;  %vm5837_vm15 = vcmp.eq.s32.totalorder %v5787_v42, %v4334_v44 }
 0x10b   : > { %2723 = vmatprep.mubr.msk.f32.mxu1 %vm5831_vm11, %v5737_v59  ;;  %vm5840_vm11 = vcmp.eq.s32.totalorder %v5787_v42, %v4384_v2 }
 0x10c   : > { %2708 = vmatmul.mubr.msk.f32.gmra.mrb[50].mxu0 %vm5832_vm12, %v5737_v59  ;;  %vm5842_vm12 = vcmp.eq.s32.totalorder %v5787_v42, %v4462_v28 }
 0x10d   : > { %2709 = vmatprep.mubr.msk.f32.mxu0 %vm403_vm14, %v5737_v59  ;;  %vm5835_vm14 = vcmp.eq.s32.totalorder %v5788_v45, %v4188_v13 }
 0x10e   : > { %2724 = vmatmul.mubr.msk.f32.gmra.mrb[50].mxu1 %vm5833_vm2, %v5737_v59  ;;  %vm5845_vm2 = vcmp.eq.s32.totalorder %v5785_v22, %v4535_v3 }
 0x10f   : > { %2725 = vmatprep.mubr.msk.f32.mxu1 %vm5834_vm1, %v5737_v59 }
 0x110   : > { %2710 = vmatmul.mubr.msk.f32.gmra.mrb[52].mxu0 %vm402_vm13, %v5737_v59  ;;  %vm5838_vm13 = vcmp.eq.s32.totalorder %v5788_v45, %v4334_v44 }
 0x111   : > { %2711 = vmatprep.mubr.msk.f32.mxu0 %vm419_vm5, %v5737_v59  ;;  %vm5839_vm5 = vcmp.eq.s32.totalorder %v5786_v23, %v4384_v2 }
 0x112   : > { %2726 = vmatmul.mubr.msk.f32.gmra.mrb[52].mxu1 %vm5835_vm14, %v5737_v59 }
 0x113   : > { %2727 = vmatprep.mubr.msk.f32.mxu1 %vm5836_vm6, %v5737_v59 }
 0x114   : > { %2712 = vmatmul.mubr.msk.f32.gmra.mrb[54].mxu0 %vm5837_vm15, %v5737_v59 }
 0x115   : > { %2713 = vmatprep.mubr.msk.f32.mxu0 %vm435_vm3, %v5737_v59  ;;  %vm5841_vm3 = vcmp.eq.s32.totalorder %v5786_v23, %v4462_v28 }
 0x116   : > { %2728 = vmatmul.mubr.msk.f32.gmra.mrb[54].mxu1 %vm5838_vm13, %v5737_v59 }
 0x117   : > { %2729 = vmatprep.mubr.msk.f32.mxu1 %vm5839_vm5, %v5737_v59 }
 0x118   : > { %2714 = vmatmul.mubr.msk.f32.gmra.mrb[56].mxu0 %vm5840_vm11, %v5737_v59 }
 0x119   : > { %2715 = vmatprep.mubr.msk.f32.mxu0 %vm451_vm0, %v5737_v59  ;;  %vm5843_vm0 = vcmp.eq.s32.totalorder %v5788_v45, %v4462_v28 }
 0x11a   : > { %2730 = vmatmul.mubr.msk.f32.gmra.mrb[56].mxu1 %vm436_vm9, %v5737_v59  ;;  %vm5844_vm9 = vcmp.eq.s32.totalorder %v5786_v23, %v4493_v54 }
 0x11b   : > { %2731 = vmatprep.mubr.msk.f32.mxu1 %vm5841_vm3, %v5737_v59 }
 0x11c   : > { %2716 = vmatmul.mubr.msk.f32.gmra.mrb[58].mxu0 %vm5842_vm12, %v5737_v59 }
 0x11d   : > { %2717 = vmatprep.mubr.msk.f32.mxu0 %vm467_vm10, %v5737_v59  ;;  %vm5846_vm10 = vcmp.eq.s32.totalorder %v5788_v45, %v4493_v54 }
 0x11e   : > { %2732 = vmatmul.mubr.msk.f32.gmra.mrb[58].mxu1 %vm5843_vm0, %v5737_v59 }
 0x11f   : > { %2733 = vmatprep.mubr.msk.f32.mxu1 %vm5844_vm9, %v5737_v59 }
 0x120   : > { %2718 = vmatmul.mubr.msk.f32.gmra.mrb[60].mxu0 %vm466_vm8, %v5737_v59  ;;  %vm5847_vm8 = vcmp.eq.s32.totalorder %v5788_v45, %v4535_v3 }
 0x121   : > { %2719 = vmatprep.mubr.msk.f32.mxu0 %vm5845_vm2, %v5737_v59 }
 0x122   : > { %2734 = vmatmul.mubr.msk.f32.gmra.mrb[60].mxu1 %vm5846_vm10, %v5737_v59 }
 0x123   : > { %2735 = vmatprep.mubr.msk.f32.mxu1 %vm485_vm4, %v5737_v59 }
 0x124   : > { %2720 = vmatmul.mubr.msk.f32.gmra.mrb[62].mxu0 %vm482_vm7, %v5737_v59  ;;  %vm1854_vm7 = vcmask 130048  }
 0x126   : > { %2736 = vmatmul.mubr.msk.f32.gmra.mrb[62].mxu1 %vm5847_vm8, %v5737_v59 }
 0x17b   : > { %v2784_v47 = vpop.f32.mrb[0].mxu0  ;;  %v2840_v2 = vpop.f32.mrb[0].mxu1 }
 0x17c   : > { %v2785_v13 = vpop.f32.mrb[1].mxu0  ;;  %v2841_v28 = vpop.f32.mrb[1].mxu1 }
 0x17d   : > { %v2786_v44 = vadd.f32 %v2785_v13, %v2784_v47  ;;  %v2842_v54 = vadd.f32 %v2841_v28, %v2840_v2 }
 0x17f   : > { %v1178_v10 = vadd.f32 %v2842_v54, %v2786_v44  ;;  %v2787_v38 = vpop.f32.mrb[2].mxu0  ;;  %v2843_v58 = vpop.f32.mrb[2].mxu1 }
 0x180   : > { %v2788_v11 = vpop.f32.mrb[3].mxu0  ;;  %v2844_v22 = vpop.f32.mrb[3].mxu1 }
 0x181   : > { %v2789_v23 = vadd.f32 %v2788_v11, %v2787_v38  ;;  %v2845_v43 = vadd.f32 %v2844_v22, %v2843_v58 }
 0x183   : > { %v1183_v42 = vadd.f32 %v2845_v43, %v2789_v23  ;;  %v2790_v20 = vpop.f32.mrb[4].mxu0  ;;  %v2846_v56 = vpop.f32.mrb[4].mxu1 }
 0x184   : > { %v2791_v36 = vpop.f32.mrb[5].mxu0  ;;  %v2847_v40 = vpop.f32.mrb[5].mxu1 }
 0x185   : > { %v2792_v3 = vadd.f32 %v2791_v36, %v2790_v20  ;;  %v2848_v59 = vadd.f32 %v2847_v40, %v2846_v56 }
 0x187   : > { %v1188_v45 = vadd.f32 %v2848_v59, %v2792_v3  ;;  %v2793_v16 = vpop.f32.mrb[6].mxu0  ;;  %v2849_v24 = vpop.f32.mrb[6].mxu1 }
 0x188   : > { %v2794_v60 = vpop.f32.mrb[7].mxu0  ;;  %v2850_v57 = vpop.f32.mrb[7].mxu1 }
 0x189   : > { %v2795_v8 = vadd.f32 %v2794_v60, %v2793_v16  ;;  %v2851_v19 = vadd.f32 %v2850_v57, %v2849_v24 }
 0x18b   : > { %v1193_v48 = vadd.f32 %v2851_v19, %v2795_v8  ;;  %v2796_v30 = vpop.f32.mrb[8].mxu0  ;;  %v2852_v61 = vpop.f32.mrb[8].mxu1 }
 0x18c   : > { %v2797_v0 = vpop.f32.mrb[9].mxu0  ;;  %v2853_v51 = vpop.f32.mrb[9].mxu1 }
 0x18d   : > { %v2798_v29 = vadd.f32 %v2797_v0, %v2796_v30  ;;  %v2854_v21 = vadd.f32 %v2853_v51, %v2852_v61 }
 0x18f   : > { %v1198_v4 = vadd.f32 %v2854_v21, %v2798_v29  ;;  %v2799_v25 = vpop.f32.mrb[10].mxu0  ;;  %v2855_v14 = vpop.f32.mrb[10].mxu1 }
 0x190   : > { %v2800_v17 = vpop.f32.mrb[11].mxu0  ;;  %v2856_v5 = vpop.f32.mrb[11].mxu1 }
 0x191   : > { %v2801_v15 = vadd.f32 %v2800_v17, %v2799_v25  ;;  %v2857_v49 = vadd.f32 %v2856_v5, %v2855_v14 }
 0x193   : > { %v1203_v12 = vadd.f32 %v2857_v49, %v2801_v15  ;;  %v2802_v9 = vpop.f32.mrb[12].mxu0  ;;  %v2858_v62 = vpop.f32.mrb[12].mxu1 }
 0x194   : > { %v2803_v63 = vpop.f32.mrb[13].mxu0  ;;  %v2859_v26 = vpop.f32.mrb[13].mxu1 }
 0x195   : > { %v2804_v31 = vadd.f32 %v2803_v63, %v2802_v9  ;;  %v2860_v1 = vadd.f32 %v2859_v26, %v2858_v62 }
 0x197   : > { %v1208_v33 = vadd.f32 %v2860_v1, %v2804_v31  ;;  %v2805_v35 = vpop.f32.mrb[14].mxu0  ;;  %v2861_v50 = vpop.f32.mrb[14].mxu1 }
 0x198   : > { %v2806_v32 = vpop.f32.mrb[15].mxu0  ;;  %v2862_v39 = vpop.f32.mrb[15].mxu1 }
 0x199   : > { %v2807_v46 = vadd.f32 %v2806_v32, %v2805_v35  ;;  %v2863_v34 = vadd.f32 %v2862_v39, %v2861_v50 }
 0x19b   : > { %v1213_v41 = vadd.f32 %v2863_v34, %v2807_v46  ;;  %v2896_v53 = vpop.f32.mrb[16].mxu0 }
 0x19c   : > { %v2897_v18 = vpop.f32.mrb[17].mxu0 }
 0x19d   : > { %v2952_v37 = vpop.f32.mrb[16].mxu1  ;;  %v2898_v52 = vadd.f32 %v2897_v18, %v2896_v53 }
 0x19e   : > { %v2953_v27 = vpop.f32.mrb[17].mxu1 }
 0x19f   : > { %v1283_v6 = vadd.f32 %v2898_v52, %v1178_v10  ;;  %v2954_v7 = vadd.f32 %v2953_v27, %v2952_v37  ;;  %v2899_v55 = vpop.f32.mrb[18].mxu0 }
 0x1a0   : > { %v2900_v47 = vpop.f32.mrb[19].mxu0 }
 0x1a1   : > { %v1388_v2 = vadd.f32 %v2954_v7, %v1283_v6  ;;  %v2955_v13 = vpop.f32.mrb[18].mxu1  ;;  %v2901_v28 = vadd.f32 %v2900_v47, %v2899_v55 }
 0x1a2   : > { %v2956_v44 = vpop.f32.mrb[19].mxu1 }
 0x1a3   : > { %v1288_v54 = vadd.f32 %v2901_v28, %v1183_v42  ;;  %v2957_v38 = vadd.f32 %v2956_v44, %v2955_v13  ;;  %v2902_v58 = vpop.f32.mrb[20].mxu0 }
 0x1a4   : > { %v2903_v11 = vpop.f32.mrb[21].mxu0 }
 0x1a5   : > { %v1393_v22 = vadd.f32 %v2957_v38, %v1288_v54  ;;  %v2958_v23 = vpop.f32.mrb[20].mxu1  ;;  %v2904_v43 = vadd.f32 %v2903_v11, %v2902_v58 }
 0x1a6   : > { %v2959_v20 = vpop.f32.mrb[21].mxu1 }
 0x1a7   : > { %v1293_v56 = vadd.f32 %v2904_v43, %v1188_v45  ;;  %v2960_v36 = vadd.f32 %v2959_v20, %v2958_v23  ;;  %v2905_v40 = vpop.f32.mrb[22].mxu0 }
 0x1a8   : > { %v2906_v3 = vpop.f32.mrb[23].mxu0 }
 0x1a9   : > { %v1398_v10 = vadd.f32 %v2960_v36, %v1293_v56  ;;  %v2961_v59 = vpop.f32.mrb[22].mxu1  ;;  %v2907_v16 = vadd.f32 %v2906_v3, %v2905_v40 }
 0x1aa   : > { %v2962_v24 = vpop.f32.mrb[23].mxu1 }
 0x1ab   : > { %v1298_v60 = vadd.f32 %v2907_v16, %v1193_v48  ;;  %v2963_v57 = vadd.f32 %v2962_v24, %v2961_v59  ;;  %v2908_v8 = vpop.f32.mrb[24].mxu0 }
 0x1ac   : > { %v2909_v19 = vpop.f32.mrb[25].mxu0 }
 0x1ad   : > { %v1403_v42 = vadd.f32 %v2963_v57, %v1298_v60  ;;  %v2964_v30 = vpop.f32.mrb[24].mxu1  ;;  %v2910_v61 = vadd.f32 %v2909_v19, %v2908_v8 }
 0x1ae   : > { %v2965_v0 = vpop.f32.mrb[25].mxu1 }
 0x1af   : > { %v1303_v51 = vadd.f32 %v2910_v61, %v1198_v4  ;;  %v2966_v29 = vadd.f32 %v2965_v0, %v2964_v30  ;;  %v2911_v21 = vpop.f32.mrb[26].mxu0 }
 0x1b0   : > { %v2912_v25 = vpop.f32.mrb[27].mxu0 }
 0x1b1   : > { %v1408_v45 = vadd.f32 %v2966_v29, %v1303_v51  ;;  %v2967_v14 = vpop.f32.mrb[26].mxu1  ;;  %v2913_v17 = vadd.f32 %v2912_v25, %v2911_v21 }
 0x1b2   : > { %v2968_v5 = vpop.f32.mrb[27].mxu1 }
 0x1b3   : > { %v1308_v15 = vadd.f32 %v2913_v17, %v1203_v12  ;;  %v2969_v49 = vadd.f32 %v2968_v5, %v2967_v14  ;;  %v2914_v9 = vpop.f32.mrb[28].mxu0 }
 0x1b4   : > { %v2915_v62 = vpop.f32.mrb[29].mxu0 }
 0x1b5   : > { %v1413_v48 = vadd.f32 %v2969_v49, %v1308_v15  ;;  %v2970_v63 = vpop.f32.mrb[28].mxu1  ;;  %v2916_v26 = vadd.f32 %v2915_v62, %v2914_v9 }
 0x1b6   : > { %v2971_v31 = vpop.f32.mrb[29].mxu1 }
 0x1b7   : > { %v1313_v1 = vadd.f32 %v2916_v26, %v1208_v33  ;;  %v2972_v35 = vadd.f32 %v2971_v31, %v2970_v63  ;;  %v2917_v50 = vpop.f32.mrb[30].mxu0 }
 0x1b8   : > { %v2918_v32 = vpop.f32.mrb[31].mxu0 }
 0x1b9   : > { %v1418_v4 = vadd.f32 %v2972_v35, %v1313_v1  ;;  %v2973_v39 = vpop.f32.mrb[30].mxu1  ;;  %v2919_v46 = vadd.f32 %v2918_v32, %v2917_v50 }
 0x1ba   : > { %v2974_v34 = vpop.f32.mrb[31].mxu1 }
 0x1bb   : > { %v1318_v53 = vadd.f32 %v2919_v46, %v1213_v41  ;;  %v2975_v18 = vadd.f32 %v2974_v34, %v2973_v39  ;;  %v3008_v37 = vpop.f32.mrb[32].mxu0 }
 0x1bc   : > { %v3009_v52 = vpop.f32.mrb[33].mxu0 }
 0x1bd   : > { %v1423_v12 = vadd.f32 %v2975_v18, %v1318_v53  ;;  %v3064_v27 = vpop.f32.mrb[32].mxu1  ;;  %v3010_v6 = vadd.f32 %v3009_v52, %v3008_v37 }
 0x1be   : > { %v3065_v7 = vpop.f32.mrb[33].mxu1 }
 0x1bf   : > { %v1493_v55 = vadd.f32 %v3010_v6, %v1388_v2  ;;  %v3066_v47 = vadd.f32 %v3065_v7, %v3064_v27  ;;  %v3011_v13 = vpop.f32.mrb[34].mxu0 }
 0x1c0   : > { %v3012_v28 = vpop.f32.mrb[35].mxu0 }
 0x1c1   : > { %v1598_v33 = vadd.f32 %v3066_v47, %v1493_v55  ;;  %v3067_v44 = vpop.f32.mrb[34].mxu1  ;;  %v3013_v54 = vadd.f32 %v3012_v28, %v3011_v13 }
 0x1c2   : > { %v3068_v38 = vpop.f32.mrb[35].mxu1 }
 0x1c3   : > { %v1498_v58 = vadd.f32 %v3013_v54, %v1393_v22  ;;  %v3069_v11 = vadd.f32 %v3068_v38, %v3067_v44  ;;  %v3014_v23 = vpop.f32.mrb[36].mxu0  ;;  %v742_v44 = vld [vmem:[#allocation2] sm:$0xff] }
 0x1c4   : > { %v3015_v43 = vpop.f32.mrb[37].mxu0 }
 0x1c5   : > { %v5247_v41 = vadd.f32 %v3069_v11, %v1498_v58  ;;  %v3070_v20 = vpop.f32.mrb[36].mxu1  ;;  %v3016_v56 = vadd.f32 %v3015_v43, %v3014_v23 }
 0x1c6   : > { %v3071_v36 = vpop.f32.mrb[37].mxu1 }
 0x1c7   : > { %v1503_v40 = vadd.f32 %v3016_v56, %v1398_v10  ;;  %v3072_v3 = vadd.f32 %v3071_v36, %v3070_v20  ;;  %v3017_v59 = vpop.f32.mrb[38].mxu0  ;;  %v743_v36 = vld [vmem:[#allocation2 + $0x8] sm:$0xff] }
 0x1c8   : > { %v3018_v2 = vpop.f32.mrb[39].mxu0 }
 0x1c9   : > { %v5249_v16 = vadd.f32 %v3072_v3, %v1503_v40  ;;  %v3073_v24 = vpop.f32.mrb[38].mxu1  ;;  %v3019_v60 = vadd.f32 %v3018_v2, %v3017_v59 }
 0x1ca   : > { %v3074_v57 = vpop.f32.mrb[39].mxu1 }
 0x1cb   : > { %v1508_v8 = vadd.f32 %v3019_v60, %v1403_v42  ;;  %v3075_v19 = vadd.f32 %v3074_v57, %v3073_v24  ;;  %v3020_v22 = vpop.f32.mrb[40].mxu0 }
 0x1cc   : > { %v3021_v30 = vpop.f32.mrb[41].mxu0 }
 0x1cd   : > { %v5251_v61 = vadd.f32 %v3075_v19, %v1508_v8  ;;  %v3076_v0 = vpop.f32.mrb[40].mxu1  ;;  %v3022_v51 = vadd.f32 %v3021_v30, %v3020_v22  ;;  %v744_v19 = vld [vmem:[#allocation2 + $0x10] sm:$0xff] }
 0x1ce   : > { %v3077_v29 = vpop.f32.mrb[41].mxu1 }
 0x1cf   : > { %v1513_v21 = vadd.f32 %v3022_v51, %v1408_v45  ;;  %v3078_v25 = vadd.f32 %v3077_v29, %v3076_v0  ;;  %v3023_v10 = vpop.f32.mrb[42].mxu0 }
 0x1d0   : > { %v3024_v14 = vpop.f32.mrb[43].mxu0 }
 0x1d1   : > { %v5253_v17 = vadd.f32 %v3078_v25, %v1513_v21  ;;  %v3079_v5 = vpop.f32.mrb[42].mxu1  ;;  %v3025_v15 = vadd.f32 %v3024_v14, %v3023_v10  ;;  %v745_v14 = vld [vmem:[#allocation2 + $0x18] sm:$0xff] }
 0x1d2   : > { %v3080_v49 = vpop.f32.mrb[43].mxu1 }
 0x1d3   : > { %v1518_v9 = vadd.f32 %v3025_v15, %v1413_v48  ;;  %v3081_v62 = vadd.f32 %v3080_v49, %v3079_v5  ;;  %v3026_v42 = vpop.f32.mrb[44].mxu0 }
 0x1d4   : > { %v3027_v63 = vpop.f32.mrb[45].mxu0 }
 0x1d5   : > { %v5255_v26 = vadd.f32 %v3081_v62, %v1518_v9  ;;  %v3082_v31 = vpop.f32.mrb[44].mxu1  ;;  %v3028_v1 = vadd.f32 %v3027_v63, %v3026_v42 }
 0x1d6   : > { %v3083_v35 = vpop.f32.mrb[45].mxu1 }
 0x1d7   : > { %v1523_v50 = vadd.f32 %v3028_v1, %v1418_v4  ;;  %v3084_v32 = vadd.f32 %v3083_v35, %v3082_v31  ;;  %v3029_v45 = vpop.f32.mrb[46].mxu0  ;;  %v746_v1 = vld [vmem:[#allocation2 + $0x20] sm:$0xff] }
 0x1d8   : > { %v3030_v39 = vpop.f32.mrb[47].mxu0 }
 0x1d9   : > { %v5257_v46 = vadd.f32 %v3084_v32, %v1523_v50  ;;  %v3085_v34 = vpop.f32.mrb[46].mxu1  ;;  %v3031_v53 = vadd.f32 %v3030_v39, %v3029_v45 }
 0x1da   : > { %v3086_v18 = vpop.f32.mrb[47].mxu1 }
 0x1db   : > { %v1528_v37 = vadd.f32 %v3031_v53, %v1423_v12  ;;  %v3087_v52 = vadd.f32 %v3086_v18, %v3085_v34  ;;  %v3120_v48 = vpop.f32.mrb[48].mxu0 }
 0x1dc   : > { %v3121_v27 = vpop.f32.mrb[49].mxu0 }
 0x1dd   : > { %v5259_v6 = vadd.f32 %v3087_v52, %v1528_v37  ;;  %v3176_v7 = vpop.f32.mrb[48].mxu1  ;;  %v3122_v55 = vadd.f32 %v3121_v27, %v3120_v48  ;;  %v747_v37 = vld [vmem:[#allocation2 + $0x28] sm:$0xff] }
 0x1de   : > { %v3177_v47 = vpop.f32.mrb[49].mxu1 }
 0x1df   : > { %v1703_v13 = vadd.f32 %v3122_v55, %v1598_v33  ;;  %v3178_v28 = vadd.f32 %v3177_v47, %v3176_v7  ;;  %v3123_v4 = vpop.f32.mrb[50].mxu0 }
 0x1e0   : > { %v3124_v54 = vpop.f32.mrb[51].mxu0 }
 0x1e1   : > { %v1808_v38 = vadd.f32 %v3178_v28, %v1703_v13  ;;  %v3179_v58 = vpop.f32.mrb[50].mxu1  ;;  %v3125_v11 = vadd.f32 %v3124_v54, %v3123_v4  ;;  %v748_v4 = vld [vmem:[#allocation2 + $0x30] sm:$0xff] }
 0x1e2   : > { %v3180_v23 = vpop.f32.mrb[51].mxu1 }
 0x1e3   : > { %v1846_v43 = vadd.f32 %v1808_v38, %v742_v44  ;;  %v1708_v12 = vadd.f32 %v3125_v11, %v5247_v41  ;;  %v3181_v20 = vadd.f32 %v3180_v23, %v3179_v58  ;;  %v3126_v56 = vpop.f32.mrb[52].mxu0 }
 0x1e4   : > { %v3127_v40 = vpop.f32.mrb[53].mxu0 }
 0x1e5   : > { %1855 = vst.msk [vmem:[#allocation2] sm:$0xff] %vm1854_vm7, %v1846_v43  ;;  %v1813_v3 = vadd.f32 %v3181_v20, %v1708_v12  ;;  %v3182_v33 = vpop.f32.mrb[52].mxu1  ;;  %v3128_v59 = vadd.f32 %v3127_v40, %v3126_v56  ;;  %v749_v12 = vld [vmem:[#allocation2 + $0x38] sm:$0xff] }
 0x1e6   : > { %v3183_v2 = vpop.f32.mrb[53].mxu1 }
 0x1e7   : > { %v1847_v24 = vadd.f32 %v1813_v3, %v743_v36  ;;  %v1713_v60 = vadd.f32 %v3128_v59, %v5249_v16  ;;  %v3184_v57 = vadd.f32 %v3183_v2, %v3182_v33  ;;  %v3129_v8 = vpop.f32.mrb[54].mxu0  ;;  %v1878_v36 = vld [vmem:[%s5677_s2 + $0x18] sm:$0xff] (!%p2737_p1)  ;;  %v1877_v3 = vld [vmem:[%s5677_s2 + $0x10] sm:$0xff] (!%p2737_p1)  ;;  %v3766_v33 = vmov (!%p2737_p1), 0.0  }
 0x1e8   : > { %v3130_v22 = vpop.f32.mrb[55].mxu0  ;;  %1979 = vmatprep.mubr.f32.mxu0 (!%p2737_p1), %v3766_v33 }
 0x1e9   : > { %1856 = vst.msk [vmem:[#allocation2 + $0x8] sm:$0xff] %vm1854_vm7, %v1847_v24  ;;  %v1818_v41 = vadd.f32 %v3184_v57, %v1713_v60  ;;  %v3185_v30 = vpop.f32.mrb[54].mxu1  ;;  %v3131_v0 = vadd.f32 %v3130_v22, %v3129_v8  ;;  %v2045_v24 = vld [vmem:[%s5679_s4 + $0x8] sm:$0xff] (!%p2737_p1)  ;;  %v2047_v60 = vld [vmem:[%s5679_s4 + $0x18] sm:$0xff] (!%p2737_p1)  ;;  %v2044_v57 = vld [vmem:[%s5679_s4] sm:$0xff] (!%p2737_p1) }
 0x1ea   : > { %v3186_v51 = vpop.f32.mrb[55].mxu1  ;;  %v3460_v8 = vpack.c.bf16 (!%p2737_p1), %v2047_v60, %v2045_v24  ;;  %v2049_v22 = vld [vmem:[%s5679_s4 + $0x28] sm:$0xff] (!%p2737_p1)  ;;  %v2080_v24 = vld [vmem:[%s5679_s4 + $0x120] sm:$0xff] (!%p2737_p1)  ;;  %v2082_v60 = vld [vmem:[%s5679_s4 + $0x130] sm:$0xff] (!%p2737_p1) }
 0x1eb   : > { %v1848_v29 = vadd.f32 %v1818_v41, %v744_v19  ;;  %v1718_v21 = vadd.f32 %v3131_v0, %v5251_v61  ;;  %v3187_v25 = vadd.f32 %v3186_v51, %v3185_v30  ;;  %v3132_v10 = vpop.f32.mrb[56].mxu0  ;;  %v2046_v19 = vld [vmem:[%s5679_s4 + $0x10] sm:$0xff] (!%p2737_p1)  ;;  %v2051_v41 = vld [vmem:[%s5679_s4 + $0x38] sm:$0xff] (!%p2737_p1)  ;;  %v2048_v51 = vld [vmem:[%s5679_s4 + $0x20] sm:$0xff] (!%p2737_p1) }
 0x1ec   : > { %v3133_v5 = vpop.f32.mrb[57].mxu0  ;;  %v1867_v2 = vld [vmem:[#allocation2] sm:$0xff] (!%p2737_p1)  ;;  %v3462_v30 = vpack.c.bf16 (!%p2737_p1), %v2046_v19, %v2044_v57  ;;  %v3464_v0 = vpack.c.bf16 (!%p2737_p1), %v2051_v41, %v2049_v22  ;;  %3524 = vmatprep.subr.bf16.mxu1 (!%p2737_p1), %v3460_v8  ;;  %v2085_v57 = vld [vmem:[%s5679_s4 + $0x148] sm:$0xff] (!%p2737_p1)  ;;  %v3498_v19 = vpack.c.bf16 (!%p2737_p1), %v2082_v60, %v2080_v24 }
 0x1ed   : > { %1857 = vst.msk [vmem:[#allocation2 + $0x10] sm:$0xff] %vm1854_vm7, %v1848_v29  ;;  %v1823_v16 = vadd.f32 %v3187_v25, %v1718_v21  ;;  %v3188_v15 = vpop.f32.mrb[56].mxu1  ;;  %v3134_v49 = vadd.f32 %v3133_v5, %v3132_v10  ;;  %v2050_v29 = vld [vmem:[%s5679_s4 + $0x30] sm:$0xff] (!%p2737_p1)  ;;  %v2053_v21 = vld [vmem:[%s5679_s4 + $0x48] sm:$0xff] (!%p2737_p1)  ;;  %v2055_v25 = vld [vmem:[%s5679_s4 + $0x58] sm:$0xff] (!%p2737_p1) }
 0x1ee   : > { %v3189_v9 = vpop.f32.mrb[57].mxu1  ;;  %v3468_v5 = vpack.c.bf16 (!%p2737_p1), %v2055_v25, %v2053_v21  ;;  %3540 = vmatpush1.bf16.msra.mxu1 (!%p2737_p1), %v3462_v30  ;;  %v2084_v41 = vld [vmem:[%s5679_s4 + $0x140] sm:$0xff] (!%p2737_p1) }
 0x1ef   : > { %v1849_v62 = vadd.f32 %v1823_v16, %v745_v14  ;;  %v1723_v42 = vadd.f32 %v3134_v49, %v5253_v17  ;;  %v3190_v63 = vadd.f32 %v3189_v9, %v3188_v15  ;;  %v3135_v31 = vpop.f32.mrb[58].mxu0  ;;  %v3466_v14 = vpack.c.bf16 (!%p2737_p1), %v2050_v29, %v2048_v51  ;;  %v2052_v16 = vld [vmem:[%s5679_s4 + $0x40] sm:$0xff] (!%p2737_p1)  ;;  %v2054_v15 = vld [vmem:[%s5679_s4 + $0x50] sm:$0xff] (!%p2737_p1)  ;;  %v2057_v49 = vld [vmem:[%s5679_s4 + $0x68] sm:$0xff] (!%p2737_p1)  ;;  %3525 = vmatprep.subr.bf16.mxu1 (!%p2737_p1), %v3464_v0 }
 0x1f0   : > { %v3136_v35 = vpop.f32.mrb[59].mxu0  ;;  %v1868_v10 = vld [vmem:[#allocation2 + $0x8] sm:$0xff] (!%p2737_p1)  ;;  %v2059_v9 = vld [vmem:[%s5679_s4 + $0x78] sm:$0xff] (!%p2737_p1)  ;;  %v2088_v25 = vld [vmem:[%s5679_s4 + $0x160] sm:$0xff] (!%p2737_p1) }
 0x1f1   : > { %1858 = vst.msk [vmem:[#allocation2 + $0x18] sm:$0xff] %vm1854_vm7, %v1849_v62  ;;  %v1828_v61 = vadd.f32 %v3190_v63, %v1723_v42  ;;  %v3191_v50 = vpop.f32.mrb[58].mxu1  ;;  %v3137_v32 = vadd.f32 %v3136_v35, %v3135_v31  ;;  %v3470_v42 = vpack.c.bf16 (!%p2737_p1), %v2054_v15, %v2052_v16  ;;  %v3472_v63 = vpack.c.bf16 (!%p2737_p1), %v2059_v9, %v2057_v49  ;;  %v2056_v31 = vld [vmem:[%s5679_s4 + $0x60] sm:$0xff] (!%p2737_p1)  ;;  %v2061_v35 = vld [vmem:[%s5679_s4 + $0x88] sm:$0xff] (!%p2737_p1)  ;;  %v2091_v51 = vld [vmem:[%s5679_s4 + $0x178] sm:$0xff] (!%p2737_p1) }
 0x1f2   : > { %v3192_v45 = vpop.f32.mrb[59].mxu1  ;;  %3541 = vmatpush1.bf16.msra.mxu1 (!%p2737_p1), %v3466_v14  ;;  %v2092_v49 = vld [vmem:[%s5679_s4 + $0x180] sm:$0xff] (!%p2737_p1)  ;;  %v2094_v9 = vld [vmem:[%s5679_s4 + $0x190] sm:$0xff] (!%p2737_p1) }
 0x1f3   : > { %v1850_v39 = vadd.f32 %v1828_v61, %v746_v1  ;;  %v1728_v34 = vadd.f32 %v3137_v32, %v5255_v26  ;;  %v3193_v53 = vadd.f32 %v3192_v45, %v3191_v50  ;;  %v3138_v18 = vpop.f32.mrb[60].mxu0  ;;  %v2058_v1 = vld [vmem:[%s5679_s4 + $0x70] sm:$0xff] (!%p2737_p1)  ;;  %v2063_v61 = vld [vmem:[%s5679_s4 + $0x98] sm:$0xff] (!%p2737_p1)  ;;  %3526 = vmatprep.subr.bf16.mxu1 (!%p2737_p1), %v3468_v5 }
 0x1f4   : > { %v3139_v52 = vpop.f32.mrb[61].mxu0  ;;  %v1869_v62 = vld [vmem:[#allocation2 + $0x10] sm:$0xff] (!%p2737_p1)  ;;  %v3474_v32 = vpack.c.bf16 (!%p2737_p1), %v2058_v1, %v2056_v31  ;;  %v3476_v45 = vpack.c.bf16 (!%p2737_p1), %v2063_v61, %v2061_v35  ;;  %v2096_v1 = vld [vmem:[%s5679_s4 + $0x1a0] sm:$0xff] (!%p2737_p1)  ;;  %v2101_v61 = vld [vmem:[%s5679_s4 + $0x1c8] sm:$0xff] (!%p2737_p1) }
 0x1f5   : > { %1859 = vst.msk [vmem:[#allocation2 + $0x20] sm:$0xff] %vm1854_vm7, %v1850_v39  ;;  %v1833_v17 = vadd.f32 %v3193_v53, %v1728_v34  ;;  %v3194_v48 = vpop.f32.mrb[60].mxu1  ;;  %v3140_v27 = vadd.f32 %v3139_v52, %v3138_v18  ;;  %v2060_v39 = vld [vmem:[%s5679_s4 + $0x80] sm:$0xff] (!%p2737_p1)  ;;  %v2062_v34 = vld [vmem:[%s5679_s4 + $0x90] sm:$0xff] (!%p2737_p1)  ;;  %v2065_v53 = vld [vmem:[%s5679_s4 + $0xa8] sm:$0xff] (!%p2737_p1) }
 0x1f6   : > { %v3195_v7 = vpop.f32.mrb[61].mxu1  ;;  %v2067_v18 = vld [vmem:[%s5679_s4 + $0xb8] sm:$0xff] (!%p2737_p1)  ;;  %3542 = vmatpush1.bf16.msra.mxu1 (!%p2737_p1), %v3470_v42  ;;  %v3478_v52 = vpack.c.bf16 (!%p2737_p1), %v2062_v34, %v2060_v39  ;;  %v2098_v35 = vld [vmem:[%s5679_s4 + $0x1b0] sm:$0xff] (!%p2737_p1)  ;;  %v2100_v39 = vld [vmem:[%s5679_s4 + $0x1c0] sm:$0xff] (!%p2737_p1) }
 0x1f7   : > { %v1851_v55 = vadd.f32 %v1833_v17, %v747_v37  ;;  %v1733_v47 = vadd.f32 %v3140_v27, %v5257_v46  ;;  %v3196_v13 = vadd.f32 %v3195_v7, %v3194_v48  ;;  %v3141_v28 = vpop.f32.mrb[62].mxu0  ;;  %v1876_v46 = vld [vmem:[%s5677_s2 + $0x8] sm:$0xff] (!%p2737_p1)  ;;  %3527 = vmatprep.subr.bf16.mxu1 (!%p2737_p1), %v3472_v63  ;;  %v3480_v17 = vpack.c.bf16 (!%p2737_p1), %v2067_v18, %v2065_v53  ;;  %v2064_v48 = vld [vmem:[%s5679_s4 + $0xa0] sm:$0xff] (!%p2737_p1)  ;;  %v2066_v27 = vld [vmem:[%s5679_s4 + $0xb0] sm:$0xff] (!%p2737_p1) }
 0x1f8   : > { %v3142_v44 = vpop.f32.mrb[63].mxu0  ;;  %v3456_v40 = vpack.c.bf16 (!%p2737_p1), %v1878_v36, %v1876_v46  ;;  %v1870_v50 = vld [vmem:[#allocation2 + $0x18] sm:$0xff] (!%p2737_p1)  ;;  %v2069_v7 = vld [vmem:[%s5679_s4 + $0xc8] sm:$0xff] (!%p2737_p1)  ;;  %v2102_v34 = vld [vmem:[%s5679_s4 + $0x1d0] sm:$0xff] (!%p2737_p1) }
 0x1f9   : > { %1860 = vst.msk [vmem:[#allocation2 + $0x28] sm:$0xff] %vm1854_vm7, %v1851_v55  ;;  %v1838_v26 = vadd.f32 %v3196_v13, %v1733_v47  ;;  %v3197_v54 = vpop.f32.mrb[62].mxu1  ;;  %v3143_v38 = vadd.f32 %v3142_v44, %v3141_v28  ;;  %v2071_v55 = vld [vmem:[%s5679_s4 + $0xd8] sm:$0xff] (!%p2737_p1)  ;;  %v3482_v13 = vpack.c.bf16 (!%p2737_p1), %v2066_v27, %v2064_v48  ;;  %v2070_v44 = vld [vmem:[%s5679_s4 + $0xd0] sm:$0xff] (!%p2737_p1)  ;;  %v3518_v53 = vpack.c.bf16 (!%p2737_p1), %v2102_v34, %v2100_v39  ;;  %v2105_v18 = vld [vmem:[%s5679_s4 + $0x1e8] sm:$0xff] (!%p2737_p1) }
 0x1fa   : > { %v3198_v58 = vpop.f32.mrb[63].mxu1  ;;  %3457 = vmatprep.subr.bf16.mxu0 (!%p2737_p1), %v3456_v40  ;;  %3543 = vmatpush1.bf16.msra.mxu1 (!%p2737_p1), %v3474_v32  ;;  %v3484_v28 = vpack.c.bf16 (!%p2737_p1), %v2071_v55, %v2069_v7  ;;  %v2078_v40 = vld [vmem:[%s5679_s4 + $0x110] sm:$0xff] (!%p2737_p1)  ;;  %v5848_v7 = vlaneseq (!%p2737_p1)  ;;  %v2108_v39 = vld [vmem:[%s5680_s5] sm:$0x3] (!%p2737_p1) }
 0x1fb   : > { %v1852_v11 = vadd.f32 %v1838_v26, %v748_v4  ;;  %v1738_v23 = vadd.f32 %v3143_v38, %v5259_v6  ;;  %v3199_v43 = vadd.f32 %v3198_v58, %v3197_v54  ;;  %1866 = sbr.rel (%p2737_p1) target bundleno = 1151 (0x47f), region = 52  ;;  %v1875_v6 = vld [vmem:[%s5677_s2] sm:$0xff] (!%p2737_p1)  ;;  %3528 = vmatprep.subr.bf16.mxu1 (!%p2737_p1), %v3476_v45  ;;  %v2073_v26 = vld [vmem:[%s5679_s4 + $0xe8] sm:$0xff] (!%p2737_p1)  ;;  %v2075_v54 = vld [vmem:[%s5679_s4 + $0xf8] sm:$0xff] (!%p2737_p1) }
 0x1fc   : > { %v3458_v59 = vpack.c.bf16 (!%p2737_p1), %v1877_v3, %v1875_v6  ;;  %v1871_v37 = vld [vmem:[#allocation2 + $0x20] sm:$0xff] (!%p2737_p1)  ;;  %v2081_v3 = vld [vmem:[%s5679_s4 + $0x128] sm:$0xff] (!%p2737_p1)  ;;  %v2106_v48 = vld [vmem:[%s5679_s4 + $0x1f0] sm:$0xff] (!%p2737_p1)  ;;  %v5498_v55 = vshrl.u32 (!%p2737_p1), %v5848_v7, 7 }
 0x1fd   : > { %1861 = vst.msk [vmem:[#allocation2 + $0x30] sm:$0xff] %vm1854_vm7, %v1852_v11  ;;  %v1843_v20 = vadd.f32 %v3199_v43, %v1738_v23  ;;  %v2068_v4 = vld [vmem:[%s5679_s4 + $0xc0] sm:$0xff] (!%p2737_p1)  ;;  %v3488_v11 = vpack.c.bf16 (!%p2737_p1), %v2075_v54, %v2073_v26  ;;  %v2074_v43 = vld [vmem:[%s5679_s4 + $0xf0] sm:$0xff] (!%p2737_p1) }
 0x1fe   : > { %3459 = vmatpush1.bf16.msra.mxu0 (!%p2737_p1), %v3458_v59  ;;  %3544 = vmatpush1.bf16.msra.mxu1 (!%p2737_p1), %v3478_v52  ;;  %v3486_v58 = vpack.c.bf16 (!%p2737_p1), %v2070_v44, %v2068_v4  ;;  %v2072_v23 = vld [vmem:[%s5679_s4 + $0xe0] sm:$0xff] (!%p2737_p1) }
 0x1ff   : > { %v1853_v56 = vadd.f32 %v1843_v20, %v749_v12  ;;  %3461 = vmatprep.subr.bf16.mxu0 (!%p2737_p1), %v3460_v8  ;;  %3529 = vmatprep.subr.bf16.mxu1 (!%p2737_p1), %v3480_v17  ;;  %v2077_v12 = vld [vmem:[%s5679_s4 + $0x108] sm:$0xff] (!%p2737_p1)  ;;  %v2079_v20 = vld [vmem:[%s5679_s4 + $0x118] sm:$0xff] (!%p2737_p1)  ;;  %v3490_v46 = vpack.c.bf16 (!%p2737_p1), %v2074_v43, %v2072_v23  ;;  %v2076_v6 = vld [vmem:[%s5679_s4 + $0x100] sm:$0xff] (!%p2737_p1) }
 0x200   : > { %v1872_v47 = vld [vmem:[#allocation2 + $0x28] sm:$0xff] (!%p2737_p1)  ;;  %v3492_v36 = vpack.c.bf16 (!%p2737_p1), %v2079_v20, %v2077_v12  ;;  %v3494_v59 = vpack.c.bf16 (!%p2737_p1), %v2078_v40, %v2076_v6  ;;  %v2087_v8 = vld [vmem:[%s5679_s4 + $0x158] sm:$0xff] (!%p2737_p1) }
 0x201   : > { %1862 = vst.msk [vmem:[#allocation2 + $0x38] sm:$0xff] %vm1854_vm7, %v1853_v56  ;;  %2738 = vmatmul.mubr.msk.f32.vlgmr.msra.gmra.mrb[0].mxu0 (!%p2737_p1), %vm1854_vm7, %v1867_v2  ;;  %v3500_v22 = vpack.c.bf16 (!%p2737_p1), %v2087_v8, %v2085_v57 }
 0x202   : > { %1985 = vmatprep.mubr.f32.mxu0 %v3766_v33  ;;  %3463 = vmatpush1.bf16.msra.mxu0 %v3462_v30  ;;  %v2086_v30 = vld [vmem:[%s5679_s4 + $0x150] sm:$0xff] }
 0x203   : > { %3465 = vmatprep.subr.bf16.mxu0 %v3464_v0  ;;  %3545 = vmatpush1.bf16.msra.mxu1 %v3482_v13  ;;  %v2089_v0 = vld [vmem:[%s5679_s4 + $0x168] sm:$0xff]  ;;  %v3502_v29 = vpack.c.bf16 %v2086_v30, %v2084_v41 }
 0x204   : > { %v1873_v38 = vld [vmem:[#allocation2 + $0x30] sm:$0xff]  ;;  %3530 = vmatprep.subr.bf16.mxu1 %v3484_v28  ;;  %v3504_v21 = vpack.c.bf16 %v2091_v51, %v2089_v0 }
 0x205   : > { %2739 = vmatmul.mubr.msk.f32.gmra.mrb[2].mxu0 %vm1854_vm7, %v1868_v10  ;;  %v2090_v10 = vld [vmem:[%s5679_s4 + $0x170] sm:$0xff] }
 0x206   : > { %1991 = vmatprep.mubr.f32.mxu0 %v3766_v33  ;;  %3467 = vmatpush1.bf16.msra.mxu0 %v3466_v14  ;;  %v2093_v14 = vld [vmem:[%s5679_s4 + $0x188] sm:$0xff]  ;;  %v3506_v16 = vpack.c.bf16 %v2090_v10, %v2088_v25 }
 0x207   : > { %3469 = vmatprep.subr.bf16.mxu0 %v3468_v5  ;;  %3546 = vmatpush1.bf16.msra.mxu1 %v3486_v58  ;;  %v2095_v5 = vld [vmem:[%s5679_s4 + $0x198] sm:$0xff] }
 0x208   : > { %v1874_v56 = vld [vmem:[#allocation2 + $0x38] sm:$0xff]  ;;  %3531 = vmatprep.subr.bf16.mxu1 %v3488_v11  ;;  %v3508_v15 = vpack.c.bf16 %v2095_v5, %v2093_v14 }
 0x209   : > { %2740 = vmatmul.mubr.msk.f32.gmra.mrb[4].mxu0 %vm1854_vm7, %v1869_v62  ;;  %v2097_v62 = vld [vmem:[%s5679_s4 + $0x1a8] sm:$0xff] }
 0x20a   : > { %1997 = vmatprep.mubr.f32.mxu0 %v3766_v33  ;;  %3471 = vmatpush1.bf16.msra.mxu0 %v3470_v42  ;;  %v2099_v42 = vld [vmem:[%s5679_s4 + $0x1b8] sm:$0xff] }
 0x20b   : > { %3473 = vmatprep.subr.bf16.mxu0 %v3472_v63  ;;  %3547 = vmatpush1.bf16.msra.mxu1 %v3490_v46  ;;  %v3510_v63 = vpack.c.bf16 %v2094_v9, %v2092_v49  ;;  %v3512_v31 = vpack.c.bf16 %v2099_v42, %v2097_v62 }
 0x20c   : > { %3532 = vmatprep.subr.bf16.mxu1 %v3492_v36 }
 0x20d   : > { %2741 = vmatmul.mubr.msk.f32.gmra.mrb[6].mxu0 %vm1854_vm7, %v1870_v50  ;;  %v2103_v50 = vld [vmem:[%s5679_s4 + $0x1d8] sm:$0xff] }
 0x20e   : > { %2003 = vmatprep.mubr.f32.mxu0 %v3766_v33  ;;  %3475 = vmatpush1.bf16.msra.mxu0 %v3474_v32  ;;  %v3514_v32 = vpack.c.bf16 %v2098_v35, %v2096_v1 }
 0x20f   : > { %3477 = vmatprep.subr.bf16.mxu0 %v3476_v45  ;;  %3548 = vmatpush1.bf16.msra.mxu1 %v3494_v59  ;;  %v3516_v45 = vpack.c.bf16 %v2103_v50, %v2101_v61 }
 0x211   : > { %2742 = vmatmul.mubr.msk.f32.gmra.mrb[8].mxu0 %vm1854_vm7, %v1871_v37  ;;  %v2107_v37 = vld [vmem:[%s5679_s4 + $0x1f8] sm:$0xff] }
 0x212   : > { %2009 = vmatprep.mubr.f32.mxu0 %v3766_v33  ;;  %3479 = vmatpush1.bf16.msra.mxu0 %v3478_v52  ;;  %v3520_v52 = vpack.c.bf16 %v2107_v37, %v2105_v18 }
 0x213   : > { %3481 = vmatprep.subr.bf16.mxu0 %v3480_v17  ;;  %v2104_v17 = vld [vmem:[%s5679_s4 + $0x1e0] sm:$0xff] }
 0x214   : > { %v3522_v27 = vpack.c.bf16 %v2106_v48, %v2104_v17 }
 0x215   : > { %2743 = vmatmul.mubr.msk.f32.gmra.mrb[10].mxu0 %vm1854_vm7, %v1872_v47  ;;  %v1883_v47 = vsub.s32 0, %v5498_v55 }
 0x216   : > { %2015 = vmatprep.mubr.f32.mxu0 %v3766_v33  ;;  %3483 = vmatpush1.bf16.msra.mxu0 %v3482_v13  ;;  %v1879_v13 = vld [vmem:[%s5678_s3] sm:$0x3] }
 0x217   : > { %3485 = vmatprep.subr.bf16.mxu0 %v3484_v28  ;;  %v1887_v28 = vsub.s32 1, %v5498_v55  ;;  %v1884_v4 = vrot.slane %v1879_v13, %v1883_v47  ;;  %v2113_v34 = vrot.slane %v2108_v39, %v1883_v47 }
 0x219   : > { %2744 = vmatmul.mubr.msk.f32.gmra.mrb[12].mxu0 %vm1854_vm7, %v1873_v38  ;;  %v1888_v44 = vrot.slane %v1879_v13, %v1887_v28 }
 0x21a   : > { %2021 = vmatprep.mubr.f32.mxu0 %v3766_v33  ;;  %3487 = vmatpush1.bf16.msra.mxu0 %v3486_v58  ;;  %v2083_v33 = vld [vmem:[%s5679_s4 + $0x138] sm:$0xff] }
 0x21b   : > { %3489 = vmatprep.subr.bf16.mxu0 %v3488_v11  ;;  %v3496_v2 = vpack.c.bf16 %v2083_v33, %v2081_v3 }
 0x21d   : > { %2745 = vmatmul.mubr.msk.f32.gmra.mrb[14].mxu0 %vm1854_vm7, %v1874_v56  ;;  %3533 = vmatprep.subr.bf16.mxu1 %v3496_v2 }
 0x21e   : > { %3491 = vmatpush1.bf16.msra.mxu0 %v3490_v46  ;;  %3549 = vmatpush1.bf16.msra.mxu1 %v3498_v19 }
 0x21f   : > { %3493 = vmatprep.subr.bf16.mxu0 %v3492_v36  ;;  %3534 = vmatprep.subr.bf16.mxu1 %v3500_v22 }
 0x222   : > { %3495 = vmatpush1.bf16.msra.mxu0 %v3494_v59  ;;  %3550 = vmatpush1.bf16.msra.mxu1 %v3502_v29 }
 0x223   : > { %3497 = vmatprep.subr.bf16.mxu0 %v3496_v2  ;;  %3535 = vmatprep.subr.bf16.mxu1 %v3504_v21 }
 0x226   : > { %3499 = vmatpush1.bf16.msra.mxu0 %v3498_v19  ;;  %3551 = vmatpush1.bf16.msra.mxu1 %v3506_v16 }
 0x227   : > { %3501 = vmatprep.subr.bf16.mxu0 %v3500_v22  ;;  %3536 = vmatprep.subr.bf16.mxu1 %v3508_v15 }
 0x22a   : > { %3503 = vmatpush1.bf16.msra.mxu0 %v3502_v29  ;;  %3552 = vmatpush1.bf16.msra.mxu1 %v3510_v63 }
 0x22b   : > { %3505 = vmatprep.subr.bf16.mxu0 %v3504_v21  ;;  %3537 = vmatprep.subr.bf16.mxu1 %v3512_v31 }
 0x22e   : > { %3507 = vmatpush1.bf16.msra.mxu0 %v3506_v16  ;;  %3553 = vmatpush1.bf16.msra.mxu1 %v3514_v32 }
 0x22f   : > { %3509 = vmatprep.subr.bf16.mxu0 %v3508_v15  ;;  %3538 = vmatprep.subr.bf16.mxu1 %v3516_v45 }
 0x232   : > { %3511 = vmatpush1.bf16.msra.mxu0 %v3510_v63  ;;  %3554 = vmatpush1.bf16.msra.mxu1 %v3518_v53 }
 0x233   : > { %3513 = vmatprep.subr.bf16.mxu0 %v3512_v31  ;;  %3539 = vmatprep.subr.bf16.mxu1 %v3520_v52 }
 0x236   : > { %3515 = vmatpush1.bf16.msra.mxu0 %v3514_v32  ;;  %3555 = vmatpush1.bf16.msra.mxu1 %v3522_v27 }
 0x237   : > { %3517 = vmatprep.subr.bf16.mxu0 %v3516_v45 }
 0x23a   : > { %3519 = vmatpush1.bf16.msra.mxu0 %v3518_v53  ;;  %v2117_v53 = vrot.slane %v2108_v39, %v1887_v28 }
 0x23b   : > { %3521 = vmatprep.subr.bf16.mxu0 %v3520_v52 }
 0x23e   : > { %3523 = vmatpush1.bf16.msra.mxu0 %v3522_v27 }
 0x2d4   : > { %v1981_v26 = vpop.f32.mrb[0].mxu0 }
 0x2d5   : > { %v1982_v54 = vadd.f32 %v1981_v26, %v1884_v4  ;;  %v1983_v38 = vpop.f32.mrb[1].mxu0 }
 0x2d6   : > { %v1984_v58 = vadd.f32 %v1983_v38, %v1888_v44 }
 0x2d7   : > { %v2028_v43 = vmax.f32 %v1982_v54, 0.0 }
 0x2d8   : > { %v2029_v11 = vmax.f32 %v1984_v58, 0.0  ;;  %v1987_v23 = vpop.f32.mrb[2].mxu0 }
 0x2d9   : > { %v1988_v12 = vadd.f32 %v1987_v23, %v1884_v4  ;;  %v1989_v20 = vpop.f32.mrb[3].mxu0 }
 0x2da   : > { %v1990_v56 = vadd.f32 %v1989_v20, %v1888_v44  ;;  %2184 = vmatprep.mubr.f32.mxu0 %v2029_v11 }
 0x2db   : > { %2185 = vmatmul.mubr.f32.vlgmr.msra.gmra.mrb[16].mxu0 %v2028_v43  ;;  %v2030_v6 = vmax.f32 %v1988_v12, 0.0 }
 0x2dc   : > { %v2031_v46 = vmax.f32 %v1990_v56, 0.0  ;;  %v1993_v36 = vpop.f32.mrb[4].mxu0 }
 0x2dd   : > { %v1994_v40 = vadd.f32 %v1993_v36, %v1884_v4  ;;  %v1995_v3 = vpop.f32.mrb[5].mxu0 }
 0x2de   : > { %v1996_v33 = vadd.f32 %v1995_v3, %v1888_v44  ;;  %2190 = vmatprep.mubr.f32.mxu0 %v2031_v46 }
 0x2df   : > { %2191 = vmatmul.mubr.f32.gmra.mrb[18].mxu0 %v2030_v6  ;;  %v2032_v24 = vmax.f32 %v1994_v40, 0.0 }
 0x2e0   : > { %v2033_v59 = vmax.f32 %v1996_v33, 0.0  ;;  %v1999_v2 = vpop.f32.mrb[6].mxu0 }
 0x2e1   : > { %v2000_v60 = vadd.f32 %v1999_v2, %v1884_v4  ;;  %v2001_v57 = vpop.f32.mrb[7].mxu0 }
 0x2e2   : > { %2196 = vmatprep.mubr.f32.mxu0 %v2033_v59  ;;  %v2002_v8 = vadd.f32 %v2001_v57, %v1888_v44 }
 0x2e3   : > { %2197 = vmatmul.mubr.f32.gmra.mrb[20].mxu0 %v2032_v24  ;;  %v2034_v41 = vmax.f32 %v2000_v60, 0.0 }
 0x2e4   : > { %v2005_v19 = vpop.f32.mrb[8].mxu0  ;;  %v2035_v22 = vmax.f32 %v2002_v8, 0.0 }
 0x2e5   : > { %v2006_v30 = vadd.f32 %v2005_v19, %v1884_v4  ;;  %v2007_v0 = vpop.f32.mrb[9].mxu0 }
 0x2e6   : > { %v2008_v51 = vadd.f32 %v2007_v0, %v1888_v44  ;;  %2202 = vmatprep.mubr.f32.mxu1 %v2035_v22 }
 0x2e7   : > { %2203 = vmatmul.mubr.f32.vlgmr.msra.gmra.mrb[0].mxu1 %v2034_v41  ;;  %v2036_v25 = vmax.f32 %v2006_v30, 0.0 }
 0x2e8   : > { %v2037_v29 = vmax.f32 %v2008_v51, 0.0  ;;  %v2011_v21 = vpop.f32.mrb[10].mxu0 }
 0x2e9   : > { %v2012_v10 = vadd.f32 %v2011_v21, %v1884_v4  ;;  %v2013_v14 = vpop.f32.mrb[11].mxu0 }
 0x2ea   : > { %v2014_v5 = vadd.f32 %v2013_v14, %v1888_v44  ;;  %2208 = vmatprep.mubr.f32.mxu1 %v2037_v29 }
 0x2eb   : > { %2209 = vmatmul.mubr.f32.gmra.mrb[2].mxu1 %v2036_v25  ;;  %v2038_v49 = vmax.f32 %v2012_v10, 0.0 }
 0x2ec   : > { %v2039_v16 = vmax.f32 %v2014_v5, 0.0  ;;  %v2017_v15 = vpop.f32.mrb[12].mxu0 }
 0x2ed   : > { %v2018_v9 = vadd.f32 %v2017_v15, %v1884_v4  ;;  %v2019_v62 = vpop.f32.mrb[13].mxu0 }
 0x2ee   : > { %v2020_v42 = vadd.f32 %v2019_v62, %v1888_v44  ;;  %2214 = vmatprep.mubr.f32.mxu1 %v2039_v16 }
 0x2ef   : > { %2215 = vmatmul.mubr.f32.gmra.mrb[4].mxu1 %v2038_v49  ;;  %v2040_v1 = vmax.f32 %v2018_v9, 0.0 }
 0x2f0   : > { %v2041_v63 = vmax.f32 %v2020_v42, 0.0  ;;  %v2023_v31 = vpop.f32.mrb[14].mxu0 }
 0x2f1   : > { %v2024_v35 = vadd.f32 %v2023_v31, %v1884_v4  ;;  %v2025_v61 = vpop.f32.mrb[15].mxu0 }
 0x2f2   : > { %v2026_v50 = vadd.f32 %v2025_v61, %v1888_v44  ;;  %2220 = vmatprep.mubr.f32.mxu1 %v2041_v63 }
 0x2f3   : > { %2221 = vmatmul.mubr.f32.gmra.mrb[6].mxu1 %v2040_v1  ;;  %v2042_v45 = vmax.f32 %v2024_v35, 0.0 }
 0x2f4   : > { %v2043_v32 = vmax.f32 %v2026_v50, 0.0 }
 0x2f6   : > { %2226 = vmatprep.mubr.f32.mxu1 %v2043_v32 }
 0x2f7   : > { %2227 = vmatmul.mubr.f32.gmra.mrb[8].mxu1 %v2042_v45 }
 0x3ae   : > { %v2186_v18 = vpop.f32.mrb[16].mxu0 }
 0x3af   : > { %v5516_v37 = vadd.f32 %v2186_v18, %v2113_v34  ;;  %v2188_v52 = vpop.f32.mrb[17].mxu0 }
 0x3b0   : > { %v5518_v17 = vadd.f32 %v2188_v52, %v2117_v53 }
 0x3b1   : > { %v2233_v48 = vmul.f32 %v5516_v37, %v5516_v37 }
 0x3b2   : > { %v2192_v27 = vpop.f32.mrb[18].mxu0  ;;  %v2234_v7 = vmul.f32 %v5518_v17, %v5518_v17 }
 0x3b3   : > { %v5524_v13 = vadd.f32 %v2192_v27, %v2113_v34  ;;  %v2194_v4 = vpop.f32.mrb[19].mxu0 }
 0x3b4   : > { %v5526_v47 = vadd.f32 %v2194_v4, %v2117_v53  ;;  %v2249_v55 = vadd.f32 %v2234_v7, %v2233_v48 }
 0x3b5   : > { %v2235_v28 = vmul.f32 %v5524_v13, %v5524_v13 }
 0x3b6   : > { %v2236_v44 = vmul.f32 %v5526_v47, %v5526_v47  ;;  %v2198_v26 = vpop.f32.mrb[20].mxu0  ;;  %2250 = vadd.xlane.f32.xlu0 %v2249_v55 }
 0x3b7   : > { %v5532_v54 = vadd.f32 %v2198_v26, %v2113_v34  ;;  %v2200_v38 = vpop.f32.mrb[21].mxu0 }
 0x3b8   : > { %v5534_v58 = vadd.f32 %v2200_v38, %v2117_v53  ;;  %v2252_v11 = vadd.f32 %v2236_v44, %v2235_v28 }
 0x3b9   : > { %v2237_v23 = vmul.f32 %v5532_v54, %v5532_v54 }
 0x3ba   : > { %v2204_v43 = vpop.f32.mrb[0].mxu1  ;;  %2253 = vadd.xlane.f32.xlu0 %v2252_v11  ;;  %v2238_v12 = vmul.f32 %v5534_v58, %v5534_v58 }
 0x3bb   : > { %v5540_v20 = vadd.f32 %v2204_v43, %v2113_v34  ;;  %v2206_v56 = vpop.f32.mrb[1].mxu1 }
 0x3bc   : > { %v5542_v46 = vadd.f32 %v2206_v56, %v2117_v53  ;;  %v2255_v36 = vadd.f32 %v2238_v12, %v2237_v23 }
 0x3bd   : > { %v2239_v6 = vmul.f32 %v5540_v20, %v5540_v20 }
 0x3be   : > { %v2240_v40 = vmul.f32 %v5542_v46, %v5542_v46  ;;  %v2210_v3 = vpop.f32.mrb[2].mxu1  ;;  %2256 = vadd.xlane.f32.xlu1 %v2255_v36 }
 0x3bf   : > { %v5548_v33 = vadd.f32 %v2210_v3, %v2113_v34  ;;  %v2212_v59 = vpop.f32.mrb[3].mxu1 }
 0x3c0   : > { %v5550_v2 = vadd.f32 %v2212_v59, %v2117_v53  ;;  %v2258_v24 = vadd.f32 %v2240_v40, %v2239_v6 }
 0x3c1   : > { %v2241_v60 = vmul.f32 %v5548_v33, %v5548_v33 }
 0x3c2   : > { %v2242_v57 = vmul.f32 %v5550_v2, %v5550_v2  ;;  %v2216_v8 = vpop.f32.mrb[4].mxu1  ;;  %2259 = vadd.xlane.f32.xlu1 %v2258_v24 }
 0x3c3   : > { %v5556_v19 = vadd.f32 %v2216_v8, %v2113_v34  ;;  %v2218_v22 = vpop.f32.mrb[5].mxu1 }
 0x3c4   : > { %v5558_v41 = vadd.f32 %v2218_v22, %v2117_v53  ;;  %v2261_v30 = vadd.f32 %v2242_v57, %v2241_v60 }
 0x3c5   : > { %v2243_v0 = vmul.f32 %v5556_v19, %v5556_v19 }
 0x3c6   : > { %v2244_v51 = vmul.f32 %v5558_v41, %v5558_v41  ;;  %v2222_v29 = vpop.f32.mrb[6].mxu1  ;;  %2262 = vadd.xlane.f32.xlu0 %v2261_v30 }
 0x3c7   : > { %v5564_v21 = vadd.f32 %v2222_v29, %v2113_v34  ;;  %v2224_v25 = vpop.f32.mrb[7].mxu1 }
 0x3c8   : > { %v5566_v10 = vadd.f32 %v2224_v25, %v2117_v53  ;;  %v2264_v14 = vadd.f32 %v2244_v51, %v2243_v0 }
 0x3c9   : > { %v2245_v5 = vmul.f32 %v5564_v21, %v5564_v21 }
 0x3ca   : > { %v2246_v16 = vmul.f32 %v5566_v10, %v5566_v10  ;;  %v2228_v15 = vpop.f32.mrb[8].mxu1  ;;  %2265 = vadd.xlane.f32.xlu1 %v2264_v14 }
 0x3cb   : > { %v5572_v49 = vadd.f32 %v2228_v15, %v2113_v34  ;;  %v2230_v9 = vpop.f32.mrb[9].mxu1 }
 0x3cc   : > { %v5574_v62 = vadd.f32 %v2230_v9, %v2117_v53  ;;  %v2267_v42 = vadd.f32 %v2246_v16, %v2245_v5 }
 0x3cd   : > { %v2247_v63 = vmul.f32 %v5572_v49, %v5572_v49 }
 0x3ce   : > { %v2248_v31 = vmul.f32 %v5574_v62, %v5574_v62  ;;  %2268 = vadd.xlane.f32.xlu0 %v2267_v42 }
 0x3d0   : > { %v2270_v1 = vadd.f32 %v2248_v31, %v2247_v63 }
 0x3d2   : > { %2271 = vadd.xlane.f32.xlu1 %v2270_v1 }
 0x443   : > { %v2251_v35 = vpop.xlane.xlu0 %2250 }
 0x444   : > { %3635 = vrsqrt.f32 %v2251_v35  ;;  %vm2275_vm4 = vcmp.eq.f32.partialorder %v2251_v35, inf  ;;  %v2278_v34 = vand.u32 2147483648, %v2251_v35  ;;  %vm2277_vm1 = vcmp.eq.f32.partialorder %v2251_v35, 0.0 }
 0x447   : > { %v2254_v61 = vpop.xlane.xlu0 %2253 }
 0x448   : > { %3637 = vrsqrt.f32 %v2254_v61  ;;  %vm2282_vm14 = vcmp.eq.f32.partialorder %v2254_v61, inf  ;;  %v2285_v4 = vand.u32 2147483648, %v2254_v61  ;;  %vm2284_vm6 = vcmp.eq.f32.partialorder %v2254_v61, 0.0 }
 0x44b   : > { %v2257_v50 = vpop.xlane.xlu1 %2256 }
 0x44c   : > { %3639 = vrsqrt.f32 %v2257_v50  ;;  %vm2289_vm15 = vcmp.eq.f32.partialorder %v2257_v50, inf  ;;  %v2292_v23 = vand.u32 2147483648, %v2257_v50  ;;  %vm2291_vm13 = vcmp.eq.f32.partialorder %v2257_v50, 0.0 }
 0x44e   : > { %v3636_v32 = vpop.eup %3635 }
 0x44f   : > { %v2274_v45 = vmul.f32 %v3636_v32, %v2251_v35  ;;  %v2260_v39 = vpop.xlane.xlu1 %2259 }
 0x450   : > { %3641 = vrsqrt.f32 %v2260_v39  ;;  %vm2296_vm5 = vcmp.eq.f32.partialorder %v2260_v39, inf  ;;  %v2299_v3 = vand.u32 2147483648, %v2260_v39  ;;  %vm2298_vm11 = vcmp.eq.f32.partialorder %v2260_v39, 0.0 }
 0x451   : > { %v2276_v53 = vsel %vm2275_vm4, %v2251_v35, %v2274_v45 }
 0x452   : > { %v3638_v18 = vpop.eup %3637  ;;  %v2279_v52 = vsel %vm2277_vm1, %v2278_v34, %v2276_v53 }
 0x453   : > { %v2329_v48 = vadd.f32 1e-07, %v2279_v52  ;;  %v2281_v27 = vmul.f32 %v3638_v18, %v2254_v61  ;;  %v2263_v7 = vpop.xlane.xlu0 %2262 }
 0x454   : > { %3643 = vrsqrt.f32 %v2263_v7  ;;  %vm2303_vm3 = vcmp.eq.f32.partialorder %v2263_v7, inf  ;;  %v2306_v29 = vand.u32 2147483648, %v2263_v7  ;;  %vm2305_vm12 = vcmp.eq.f32.partialorder %v2263_v7, 0.0 }
 0x455   : > { %3645 = vrcp.f32 %v2329_v48  ;;  %v2283_v55 = vsel %vm2282_vm14, %v2254_v61, %v2281_v27 }
 0x456   : > { %v3640_v28 = vpop.eup %3639  ;;  %v2286_v44 = vsel %vm2284_vm6, %v2285_v4, %v2283_v55 }
 0x457   : > { %v2330_v26 = vadd.f32 1e-07, %v2286_v44  ;;  %v2288_v38 = vmul.f32 %v3640_v28, %v2257_v50  ;;  %v2266_v11 = vpop.xlane.xlu1 %2265 }
 0x458   : > { %3647 = vrsqrt.f32 %v2266_v11  ;;  %vm2310_vm0 = vcmp.eq.f32.partialorder %v2266_v11, inf  ;;  %vm2312_vm9 = vcmp.eq.f32.partialorder %v2266_v11, 0.0 }
 0x459   : > { %3649 = vrcp.f32 %v2330_v26  ;;  %v2290_v43 = vsel %vm2289_vm15, %v2257_v50, %v2288_v38 }
 0x45a   : > { %v3642_v12 = vpop.eup %3641  ;;  %v2293_v56 = vsel %vm2291_vm13, %v2292_v23, %v2290_v43 }
 0x45b   : > { %v2331_v36 = vadd.f32 1e-07, %v2293_v56  ;;  %v2295_v6 = vmul.f32 %v3642_v12, %v2260_v39  ;;  %v2269_v40 = vpop.xlane.xlu0 %2268 }
 0x45c   : > { %3651 = vrsqrt.f32 %v2269_v40  ;;  %vm2317_vm2 = vcmp.eq.f32.partialorder %v2269_v40, inf  ;;  %vm2319_vm10 = vcmp.eq.f32.partialorder %v2269_v40, 0.0 }
 0x45d   : > { %3653 = vrcp.f32 %v2331_v36  ;;  %v2297_v59 = vsel %vm2296_vm5, %v2260_v39, %v2295_v6 }
 0x45e   : > { %v3644_v24 = vpop.eup %3643  ;;  %v2300_v60 = vsel %vm2298_vm11, %v2299_v3, %v2297_v59 }
 0x45f   : > { %v3646_v57 = vpop.eup %3645  ;;  %v2332_v8 = vadd.f32 1e-07, %v2300_v60  ;;  %v2302_v22 = vmul.f32 %v3644_v24, %v2263_v7  ;;  %v2272_v30 = vpop.xlane.xlu1 %2271 }
 0x460   : > { %v2338_v0 = vmul.f32 %v3646_v57, %v5516_v37  ;;  %v2339_v51 = vmul.f32 %v3646_v57, %v5518_v17  ;;  %3655 = vrsqrt.f32 %v2272_v30  ;;  %v2313_v17 = vand.u32 2147483648, %v2266_v11 }
 0x461   : > { %3657 = vrcp.f32 %v2332_v8  ;;  %v2304_v25 = vsel %vm2303_vm3, %v2263_v7, %v2302_v22  ;;  %vm2324_vm8 = vcmp.eq.f32.partialorder %v2272_v30, inf  ;;  %vm2326_vm7 = vcmp.eq.f32.partialorder %v2272_v30, 0.0 }
 0x462   : > { %v3648_v14 = vpop.eup %3647  ;;  %2361 = vst [vmem:[%s3885_s12] sm:$0xff] %v2338_v0  ;;  %2362 = vst [vmem:[%s3885_s12 + $0x8] sm:$0xff] %v2339_v51  ;;  %v2307_v5 = vsel %vm2305_vm12, %v2306_v29, %v2304_v25 }
 0x463   : > { %v3650_v16 = vpop.eup %3649  ;;  %v2333_v15 = vadd.f32 1e-07, %v2307_v5  ;;  %v2309_v9 = vmul.f32 %v3648_v14, %v2266_v11 }
 0x464   : > { %v2341_v42 = vmul.f32 %v3650_v16, %v5524_v13  ;;  %v2342_v37 = vmul.f32 %v3650_v16, %v5526_v47  ;;  %v2320_v47 = vand.u32 2147483648, %v2269_v40 }
 0x465   : > { %3659 = vrcp.f32 %v2333_v15  ;;  %v2311_v63 = vsel %vm2310_vm0, %v2266_v11, %v2309_v9 }
 0x466   : > { %v3652_v31 = vpop.eup %3651  ;;  %2363 = vst [vmem:[%s3885_s12 + $0x10] sm:$0xff] %v2341_v42  ;;  %2364 = vst [vmem:[%s3885_s12 + $0x18] sm:$0xff] %v2342_v37  ;;  %v2314_v1 = vsel %vm2312_vm9, %v2313_v17, %v2311_v63 }
 0x467   : > { %v3654_v35 = vpop.eup %3653  ;;  %v2334_v61 = vadd.f32 1e-07, %v2314_v1  ;;  %v2316_v50 = vmul.f32 %v3652_v31, %v2269_v40 }
 0x468   : > { %v2344_v32 = vmul.f32 %v3654_v35, %v5532_v54  ;;  %v2345_v13 = vmul.f32 %v3654_v35, %v5534_v58  ;;  %v2327_v58 = vand.u32 2147483648, %v2272_v30 }
 0x469   : > { %3661 = vrcp.f32 %v2334_v61  ;;  %v2318_v45 = vsel %vm2317_vm2, %v2269_v40, %v2316_v50 }
 0x46a   : > { %v3656_v39 = vpop.eup %3655  ;;  %2365 = vst [vmem:[%s3885_s12 + $0x20] sm:$0xff] %v2344_v32  ;;  %2366 = vst [vmem:[%s3885_s12 + $0x28] sm:$0xff] %v2345_v13  ;;  %v2321_v34 = vsel %vm2319_vm10, %v2320_v47, %v2318_v45 }
 0x46b   : > { %v3658_v53 = vpop.eup %3657  ;;  %v2335_v18 = vadd.f32 1e-07, %v2321_v34  ;;  %v2323_v52 = vmul.f32 %v3656_v39, %v2272_v30 }
 0x46c   : > { %v2347_v48 = vmul.f32 %v3658_v53, %v5540_v20  ;;  %v2348_v54 = vmul.f32 %v3658_v53, %v5542_v46 }
 0x46d   : > { %3663 = vrcp.f32 %v2335_v18  ;;  %v2325_v27 = vsel %vm2324_vm8, %v2272_v30, %v2323_v52 }
 0x46e   : > { %2367 = vst [vmem:[%s3885_s12 + $0x30] sm:$0xff] %v2347_v48  ;;  %2368 = vst [vmem:[%s3885_s12 + $0x38] sm:$0xff] %v2348_v54  ;;  %v2328_v7 = vsel %vm2326_vm7, %v2327_v58, %v2325_v27 }
 0x46f   : > { %v3660_v4 = vpop.eup %3659  ;;  %v2336_v55 = vadd.f32 1e-07, %v2328_v7 }
 0x470   : > { %v2350_v28 = vmul.f32 %v3660_v4, %v5548_v33  ;;  %v2351_v20 = vmul.f32 %v3660_v4, %v5550_v2 }
 0x471   : > { %3665 = vrcp.f32 %v2336_v55 }
 0x472   : > { %2369 = vst [vmem:[%s3885_s12 + $0x40] sm:$0xff] %v2350_v28  ;;  %2370 = vst [vmem:[%s3885_s12 + $0x48] sm:$0xff] %v2351_v20 }
 0x473   : > { %v3662_v46 = vpop.eup %3661 }
 0x474   : > { %v2353_v44 = vmul.f32 %v3662_v46, %v5556_v19  ;;  %v2354_v26 = vmul.f32 %v3662_v46, %v5558_v41 }
 0x476   : > { %2371 = vst [vmem:[%s3885_s12 + $0x50] sm:$0xff] %v2353_v44  ;;  %2372 = vst [vmem:[%s3885_s12 + $0x58] sm:$0xff] %v2354_v26 }
 0x477   : > { %v3664_v38 = vpop.eup %3663 }
 0x478   : > { %v2356_v11 = vmul.f32 %v3664_v38, %v5564_v21  ;;  %v2357_v23 = vmul.f32 %v3664_v38, %v5566_v10 }
 0x47a   : > { %2373 = vst [vmem:[%s3885_s12 + $0x60] sm:$0xff] %v2356_v11  ;;  %2374 = vst [vmem:[%s3885_s12 + $0x68] sm:$0xff] %v2357_v23 }
 0x47b   : > { %v3666_v33 = vpop.eup %3665 }
 0x47c   : > { %v2359_v2 = vmul.f32 %v3666_v33, %v5572_v49  ;;  %v2360_v43 = vmul.f32 %v3666_v33, %v5574_v62 }
 0x47e   : > { %2375 = vst [vmem:[%s3885_s12 + $0x70] sm:$0xff] %v2359_v2  ;;  %2376 = vst [vmem:[%s3885_s12 + $0x78] sm:$0xff] %v2360_v43 }
 0x47f PF: > { %s2751_s24 = sshll.u32 %s3749_s25, 11  ;;  %s2391_s16 = sshll.u32 %s3885_s12, 4  ;;  %s5619_s16 = int_to_ptr.vmem [resolvable:$true] %s2391_s16 }
 0x480   : > { %s5616_s17 = scalar_lea.hbm %s5681_s6, %s2751_s24  ;;  %s5849_s18 = sand.u32 1, %s3737_s22  }
 0x481   : > { %s5623_s19 = scalar_lea.sflag [#allocation4], %s5849_s18  ;;  %s3667_s20 = scalar_lea.vmem %s5619_s16, 2048 }
 0x482   : > { %p3668_p2 = scmp.ne.s32.totalorder %s5619_s16, %s3667_s20  ;;  %s3767_s25 = smov [#allocation3]  }
 0x483   : > { %s3671_s14 = sshll.u32 %s3767_s25, 4  ;;  %s3672_s14 = int_to_ptr.vmem [resolvable:$false] %s3671_s14 }
 0x484   : > { %p3669_p4 = pnand %p3668_p2, %p3854_p3  ;;  %s3673_s29 = scalar_lea.vmem %s3672_s14, 4096 }
 0x485   : > { %p3674_p6 = scmp.lt.s32.totalorder %s5619_s16, %s3672_s14  ;;  %p3675_p7 = scmp.lt.s32.totalorder %s3673_s29, %s3667_s20 }
 0x486   : > { %p3670_p5 = pneg %p3669_p4 }
 0x487   : > { %p3676_p8 = por %p3675_p7, %p3674_p6 }
 0x489   : > { %p3677_p10 = pnand %p3676_p8, %p3670_p5 }
 0x48b   : > { %3680 = shalt.err (!%p3677_p10)
}
 0x48c   : > { %s3681_s12 = scalar_lea.hbm %s5616_s17, 2048  ;;  %s3685_s15 = scalar_lea.hbm %s5681_s6, 4096 }
 0x48d   : > { %p3682_p11 = scmp.ne.s32.totalorder %s5616_s17, %s3681_s12  ;;  %p3686_p0 = scmp.lt.u32.totalorder %s5616_s17, %s5681_s6 }
 0x48e   : > { %p3687_p1 = scmp.lt.u32.totalorder %s3685_s15, %s3681_s12  ;;  %p3689_p4 = scmp.lt.u32.totalorder %s3681_s12, %s5616_s17 }
 0x48f   : > { %p3683_p12 = pnand %p3682_p11, %p3854_p3 }
 0x490   : > { %p3688_p2 = por %p3687_p1, %p3686_p0 }
 0x491   : > { %p3684_p13 = pneg %p3683_p12 }
 0x492   : > { %p3690_p5 = por %p3689_p4, %p3688_p2 }
 0x494   : > { %p3691_p6 = pnand %p3690_p5, %p3684_p13 }
 0x496   : > { %3694 = shalt.err (!%p3691_p6)
}
 0x497   : > { %s3768_s20 = smov 256   ;;  %s3769_s25 = smov 16  }
 0x498   : > { %3556 = dma.vmem_to_hbm [thread:$0]  (%p3854_p3), %s5619_s16, 2048, %s5616_s17, %s5623_s19, %s3768_s20, %s3768_s20, %s3769_s25  }
 0x499 PF: > { %p3562_p7 = scmp.ge.s32.totalorder %s3761_s28, 2  ;;  %s2406_s14 = sand.u32 1, %s3733_s21  }
 0x49a   : > { %s2407_s29 = scalar_lea.sflag [#allocation4], %s2406_s14 }
 0x49b   : > { %p3559_p8 = pnand %p3562_p7, %p3864_p9 }
 0x49d   : > { %3728 = dma.done.wait (!%p3559_p8), %s2407_s29, 2048  }
 0x49e   : > { %3730 = vsyncadd (!%p3559_p8), %s2407_s29, 4294965248  ;;  %s19_s28 = sadd.s32 1, %s3761_s28   ;;  %s5850_s21 = smov %s3737_s22 }
 0x49f   : > { %p16_p10 = scmp.ge.s32.totalorder %s19_s28, 6   ;;  %s5851_s22 = smov %s3741_s23 }
 0x4a0   : > { %s5852_s23 = smov %s3872_s13  ;;  %s5853_s24 = smov %s3753_s26 }
 0x4a1   : > { %s5854_s25 = smov %s3757_s27  ;;  %s5855_s26 = smov %s5858_s7 }
 0x4a2   : > { %s5856_s27 = smov %s5862_s8  ;;  %18 = sbr.rel (!%p16_p10) target bundleno = 5 (0x5), region = 87 }
 0x4a9   :  { %2412 = vsyncpa [#allocation4], 1 }
 0x4aa   :  { %2414 = vsyncpa [#allocation4 + $0x1], 1 }

// kernel: patch_sample_forward.4
= control target key start
LH: loop header
LB: loop body
LE: loop exit
PB: predicated region body
PF: predicated region fallthrough
CT: control target
= control target key end

     0   :  { %11 = vsyncpa [#allocation4], 0  ;;  %s2290_s0 = inlined_call_operand.vmem [shape: s32[64,1], index: 0, kind: input, shape index: {}]   ;;  %s2291_s1 = inlined_call_operand.vmem [shape: f32[2,64,256], index: 1, kind: input, shape index: {}]   ;;  %s2292_s2 = inlined_call_operand.vmem [shape: f32[256,256], index: 2, kind: input, shape index: {}]   ;;  %s2293_s3 = inlined_call_operand.vmem [shape: f32[1,256], index: 3, kind: input, shape index: {}]   ;;  %s2294_s4 = inlined_call_operand.vmem [shape: f32[256,256], index: 4, kind: input, shape index: {}]   ;;  %s2295_s5 = inlined_call_operand.vmem [shape: f32[1,256], index: 5, kind: input, shape index: {}]   ;;  %s2296_s6 = inlined_call_operand.hbm [shape: f32[2,64,256], index: 6, kind: output, shape index: {}]  }
   0x1   :  { %13 = vsyncpa [#allocation4 + $0x1], 0  ;;  %s1602_s21 = smov 0   ;;  %s1604_s22 = smov 0  }
   0x2   :  { %s1606_s23 = smov 0   ;;  %s1608_s24 = smov 0  }
   0x3   :  { %s1610_s25 = smov 0   ;;  %s1612_s26 = smov 0  }
   0x4 LB: > { %s1214_s27 = sadd.s32 4294967295, %s1560_s26   ;;  %s1215_s28 = sadd.s32 4294967294, %s1560_s26   ;;  %s1560_s26 = sphi %s1612_s26, %s19_s26   ;;  %s1556_s25 = sphi %s1610_s25, %s2303_s25   ;;  %s1552_s24 = sphi %s1608_s24, %s2302_s24   ;;  %s1548_s23 = sphi %s1606_s23, %s2301_s23   ;;  %s1544_s22 = sphi %s1604_s22, %s2300_s22   ;;  %s1540_s21 = sphi %s1602_s21, %s2299_s21  }
   0x5   : > { %s31_s29 = sadd.s32 1, %s1556_s25  ;;  %s171_s30 = sadd.s32 1, %s1548_s23 }
   0x6   : > { %p33_p0 = scmp.ge.s32.totalorder %s31_s29, 2  ;;  %p181_p1 = scmp.ne.s32.totalorder %s1548_s23, %s1544_s22 }
   0x7   : > { %p182_p2 = scmp.eq.s32.totalorder %s1214_s27, 1  ;;  %p187_p3 = scmp.ne.s32.totalorder %s1544_s22, %s1540_s21 }
   0x8   : > { %s2305_s29 = smov (%p33_p0, %s31_s29), 0  ;;  %p188_p5 = scmp.eq.s32.totalorder %s1215_s28, 1 }
   0x9   : > { %p1642_p4 = por %p182_p2, %p181_p1  ;;  %s168_s8 = ssub.s32 %s1556_s25, %s2305_s29 }
   0xa   : > { %p1218_p6 = scmp.ge.s32.totalorder %s1560_s26, 1  ;;  %p169_p7 = scmp.eq.s32.totalorder %s168_s8, 0 }
   0xb   : > { %p1649_p8 = por %p188_p5, %p187_p3  ;;  %p235_p9 = scmp.lt.s32.totalorder %s1560_s26, 3 }
   0xc   : > { %s1655_s10 = scalar_select %p169_p7, %s1548_s23, %s171_s30  }
   0xd   : > { %p236_p10 = pnand %p1218_p6, %p235_p9 }
   0xe   : > { %v303_v0 = vld [vmem:[%s2290_s0 + $0x10] sm:$0xff] (!%p236_p10)  ;;  %v301_v1 = vld [vmem:[%s2290_s0] sm:$0xff] (!%p236_p10)  ;;  %p271_p11 = scmp.lt.s32.totalorder (!%p236_p10), %s1552_s24, 1  ;;  %v1562_v2 = vmov (!%p236_p10), 0   ;;  %v304_v3 = vld [vmem:[%s2290_s0 + $0x18] sm:$0xff] (!%p236_p10)  ;;  %v1563_v5 = vmov (!%p236_p10), 0.0  }
   0xf   : > { %239 = sbr.rel (%p236_p10) target bundleno = 1012 (0x3f4), region = 44  ;;  %1449 = vset.pattern.permute.xlu1 (!%p236_p10), %v1562_v2  ;;  %1448 = vset.pattern.permute.xlu0 (!%p236_p10), %v1562_v2  ;;  %v302_v4 = vld [vmem:[%s2290_s0 + $0x8] sm:$0xff] (!%p236_p10)  ;;  %v305_v7 = vld [vmem:[%s2290_s0 + $0x20] sm:$0xff] (!%p236_p10)  ;;  %v308_v21 = vld [vmem:[%s2290_s0 + $0x38] sm:$0xff] (!%p236_p10)  ;;  %vm394_vm0 = vcmask (!%p236_p10), 523264   ;;  %s267_s12 = sand.u32 (!%p236_p10), 1, %s1544_s22  }
  0x10   : > { %321 = vperm.xlu1 (!%p236_p10), %1449, %v303_v0   ;;  %315 = vperm.xlu0 (!%p236_p10), %1448, %v301_v1   ;;  %v306_v6 = vld [vmem:[%s2290_s0 + $0x28] sm:$0xff] (!%p236_p10)  ;;  %v307_v22 = vld [vmem:[%s2290_s0 + $0x30] sm:$0xff] (!%p236_p10)  ;;  %v586_v35 = vld [vmem:[%s2292_s2 + $0x18] sm:$0xff] (!%p236_p10)  ;;  %s1564_s27 = smov (!%p236_p10), [#allocation3]  }
  0x11   : > { %483 = vmatprep.mubr.f32.mxu0 (!%p236_p10), %v1563_v5  ;;  %v584_v34 = vld [vmem:[%s2292_s2 + $0x8] sm:$0xff] (!%p236_p10)  ;;  %v583_v36 = vld [vmem:[%s2292_s2] sm:$0xff] (!%p236_p10)  ;;  %v585_v38 = vld [vmem:[%s2292_s2 + $0x10] sm:$0xff] (!%p236_p10)  ;;  %s1486_s28 = sshll.u32 (!%p236_p10), %s1564_s27, 4  ;;  %s1487_s28 = int_to_ptr.vmem [resolvable:$false] %s1486_s28 }
  0x12   : > { %v1261_v37 = vpack.c.bf16 (!%p236_p10), %v586_v35, %v584_v34  ;;  %v588_v39 = vld [vmem:[%s2292_s2 + $0x28] sm:$0xff] (!%p236_p10)  ;;  %v590_v40 = vld [vmem:[%s2292_s2 + $0x38] sm:$0xff] (!%p236_p10)  ;;  %v1263_v41 = vpack.c.bf16 (!%p236_p10), %v585_v38, %v583_v36  ;;  %v587_v43 = vld [vmem:[%s2292_s2 + $0x20] sm:$0xff] (!%p236_p10)  ;;  %s1488_s30 = scalar_lea.vmem (!%p236_p10), %s1487_s28, 4096 }
  0x13   : > { %v1265_v42 = vpack.c.bf16 (!%p236_p10), %v590_v40, %v588_v39  ;;  %v589_v44 = vld [vmem:[%s2292_s2 + $0x30] sm:$0xff] (!%p236_p10)  ;;  %v592_v45 = vld [vmem:[%s2292_s2 + $0x48] sm:$0xff] (!%p236_p10)  ;;  %v594_v46 = vld [vmem:[%s2292_s2 + $0x58] sm:$0xff] (!%p236_p10) }
  0x14   : > { %324 = vperm.xlu1 (!%p236_p10), %1449, %v304_v3   ;;  %318 = vperm.xlu0 (!%p236_p10), %1448, %v302_v4   ;;  %v1267_v47 = vpack.c.bf16 (!%p236_p10), %v589_v44, %v587_v43  ;;  %v1269_v48 = vpack.c.bf16 (!%p236_p10), %v594_v46, %v592_v45  ;;  %v591_v49 = vld [vmem:[%s2292_s2 + $0x40] sm:$0xff] (!%p236_p10)  ;;  %v593_v50 = vld [vmem:[%s2292_s2 + $0x50] sm:$0xff] (!%p236_p10)  ;;  %v596_v51 = vld [vmem:[%s2292_s2 + $0x68] sm:$0xff] (!%p236_p10) }
  0x15   : > { %1262 = vmatprep.subr.bf16.mxu1 (!%p236_p10), %v1261_v37  ;;  %v598_v52 = vld [vmem:[%s2292_s2 + $0x78] sm:$0xff] (!%p236_p10)  ;;  %v1271_v53 = vpack.c.bf16 (!%p236_p10), %v593_v50, %v591_v49  ;;  %v595_v55 = vld [vmem:[%s2292_s2 + $0x60] sm:$0xff] (!%p236_p10)  ;;  %v597_v56 = vld [vmem:[%s2292_s2 + $0x70] sm:$0xff] (!%p236_p10) }
  0x16   : > { %s272_s15 = scalar_select %p271_p11, %s1552_s24, 1  ;;  %1264 = vmatpush1.bf16.msra.mxu1 %v1263_v41  ;;  %v1273_v54 = vpack.c.bf16 %v598_v52, %v596_v51  ;;  %v600_v57 = vld [vmem:[%s2292_s2 + $0x88] sm:$0xff]  ;;  %v602_v58 = vld [vmem:[%s2292_s2 + $0x98] sm:$0xff]  ;;  %v1275_v59 = vpack.c.bf16 %v597_v56, %v595_v55  ;;  %v599_v61 = vld [vmem:[%s2292_s2 + $0x80] sm:$0xff] }
  0x17   : > { %1266 = vmatprep.subr.bf16.mxu1 %v1265_v42  ;;  %v1277_v60 = vpack.c.bf16 %v602_v58, %v600_v57  ;;  %v601_v62 = vld [vmem:[%s2292_s2 + $0x90] sm:$0xff]  ;;  %v604_v63 = vld [vmem:[%s2292_s2 + $0xa8] sm:$0xff]  ;;  %v606_v0 = vld [vmem:[%s2292_s2 + $0xb8] sm:$0xff] }
  0x18   : > { %s1243_s20 = sshll.u32 %s272_s15, 7  ;;  %330 = vperm.xlu1 %1449, %v306_v6   ;;  %327 = vperm.xlu0 %1448, %v305_v7   ;;  %v1279_v1 = vpack.c.bf16 %v601_v62, %v599_v61  ;;  %v1281_v2 = vpack.c.bf16 %v606_v0, %v604_v63  ;;  %v603_v3 = vld [vmem:[%s2292_s2 + $0xa0] sm:$0xff]  ;;  %v605_v4 = vld [vmem:[%s2292_s2 + $0xb0] sm:$0xff]  ;;  %v608_v6 = vld [vmem:[%s2292_s2 + $0xc8] sm:$0xff]  ;;  %v310_v0 = vlaneseq  ;;  %s1244_s15 = sshll.u32 %s1552_s24, 11 }
  0x19   : > { %s1681_s13 = scalar_lea.vmem %s2291_s1, %s1243_s20  ;;  %v610_v7 = vld [vmem:[%s2292_s2 + $0xd8] sm:$0xff]  ;;  %v623_v34 = vld [vmem:[%s2292_s2 + $0x140] sm:$0xff]  ;;  %v625_v35 = vld [vmem:[%s2292_s2 + $0x150] sm:$0xff]  ;;  %s2234_s19 = scalar_lea.hbm %s2296_s6, %s1244_s15 }
  0x1a   : > { %v379_v8 = vld [vmem:[%s1681_s13 + $0x8] sm:$0xff]  ;;  %v381_v9 = vld [vmem:[%s1681_s13 + $0x18] sm:$0xff]  ;;  %v378_v10 = vld [vmem:[%s1681_s13] sm:$0xff]  ;;  %1268 = vmatpush1.bf16.msra.mxu1 %v1267_v47  ;;  %v1303_v38 = vpack.c.bf16 %v625_v35, %v623_v34  ;;  %s2244_s24 = scalar_lea.sflag [#allocation4], %s267_s12 }
  0x1b   : > { %v1245_v11 = vpack.c.bf16 %v381_v9, %v379_v8  ;;  %v380_v12 = vld [vmem:[%s1681_s13 + $0x10] sm:$0xff]  ;;  %v383_v13 = vld [vmem:[%s1681_s13 + $0x28] sm:$0xff]  ;;  %v385_v14 = vld [vmem:[%s1681_s13 + $0x38] sm:$0xff]  ;;  %1270 = vmatprep.subr.bf16.mxu1 %v1269_v48  ;;  %v1283_v8 = vpack.c.bf16 %v605_v4, %v603_v3  ;;  %v1285_v9 = vpack.c.bf16 %v610_v7, %v608_v6 }
  0x1c   : > { %v1247_v15 = vpack.c.bf16 %v380_v12, %v378_v10  ;;  %v1249_v16 = vpack.c.bf16 %v385_v14, %v383_v13  ;;  %v382_v17 = vld [vmem:[%s1681_s13 + $0x20] sm:$0xff]  ;;  %v384_v18 = vld [vmem:[%s1681_s13 + $0x30] sm:$0xff]  ;;  %v387_v19 = vld [vmem:[%s1681_s13 + $0x48] sm:$0xff]  ;;  %336 = vperm.xlu1 %1449, %v308_v21   ;;  %333 = vperm.xlu0 %1448, %v307_v22  }
  0x1d   : > { %1246 = vmatprep.subr.bf16.mxu0 %v1245_v11  ;;  %v389_v20 = vld [vmem:[%s1681_s13 + $0x58] sm:$0xff]  ;;  %v1251_v23 = vpack.c.bf16 %v384_v18, %v382_v17  ;;  %v386_v25 = vld [vmem:[%s1681_s13 + $0x40] sm:$0xff]  ;;  %v388_v26 = vld [vmem:[%s1681_s13 + $0x50] sm:$0xff] }
  0x1e   : > { %1248 = vmatpush1.bf16.msra.mxu0 %v1247_v15  ;;  %v1253_v24 = vpack.c.bf16 %v389_v20, %v387_v19  ;;  %v391_v27 = vld [vmem:[%s1681_s13 + $0x68] sm:$0xff]  ;;  %v393_v28 = vld [vmem:[%s1681_s13 + $0x78] sm:$0xff]  ;;  %v1255_v29 = vpack.c.bf16 %v388_v26, %v386_v25  ;;  %v390_v31 = vld [vmem:[%s1681_s13 + $0x60] sm:$0xff]  ;;  %1272 = vmatpush1.bf16.msra.mxu1 %v1271_v53 }
  0x1f   : > { %1250 = vmatprep.subr.bf16.mxu0 %v1249_v16  ;;  %v1257_v30 = vpack.c.bf16 %v393_v28, %v391_v27  ;;  %v392_v32 = vld [vmem:[%s1681_s13 + $0x70] sm:$0xff]  ;;  %1274 = vmatprep.subr.bf16.mxu1 %v1273_v54  ;;  %v607_v10 = vld [vmem:[%s2292_s2 + $0xc0] sm:$0xff]  ;;  %v612_v12 = vld [vmem:[%s2292_s2 + $0xe8] sm:$0xff]  ;;  %s1219_s13 = sshll.u32 %s267_s12, 7 }
  0x20   : > { %v1259_v33 = vpack.c.bf16 %v392_v32, %v390_v31  ;;  %v609_v11 = vld [vmem:[%s2292_s2 + $0xd0] sm:$0xff]  ;;  %v614_v13 = vld [vmem:[%s2292_s2 + $0xf8] sm:$0xff]  ;;  %v611_v16 = vld [vmem:[%s2292_s2 + $0xe0] sm:$0xff]  ;;  %s2201_s14 = scalar_lea.vmem [#allocation3], %s1219_s13 }
  0x21   : > { %v1287_v14 = vpack.c.bf16 %v609_v11, %v607_v10  ;;  %v1289_v15 = vpack.c.bf16 %v614_v13, %v612_v12  ;;  %v613_v17 = vld [vmem:[%s2292_s2 + $0xf0] sm:$0xff]  ;;  %v616_v18 = vld [vmem:[%s2292_s2 + $0x108] sm:$0xff]  ;;  %v618_v19 = vld [vmem:[%s2292_s2 + $0x118] sm:$0xff]  ;;  %s1135_s16 = sshll.u32 %s2201_s14, 4  ;;  %s2236_s16 = int_to_ptr.vmem [resolvable:$true] %s1135_s16 }
  0x22   : > { %1252 = vmatpush1.bf16.msra.mxu0 %v1251_v23  ;;  %1276 = vmatpush1.bf16.msra.mxu1 %v1275_v59  ;;  %v1291_v20 = vpack.c.bf16 %v613_v17, %v611_v16  ;;  %v1293_v21 = vpack.c.bf16 %v618_v19, %v616_v18  ;;  %v615_v22 = vld [vmem:[%s2292_s2 + $0x100] sm:$0xff]  ;;  %v617_v23 = vld [vmem:[%s2292_s2 + $0x110] sm:$0xff]  ;;  %v622_v25 = vld [vmem:[%s2292_s2 + $0x138] sm:$0xff]  ;;  %s1482_s20 = scalar_lea.vmem %s2236_s16, 2048  ;;  %p1489_p1 = scmp.lt.s32.totalorder %s2236_s16, %s1487_s28 }
  0x23   : > { %1254 = vmatprep.subr.bf16.mxu0 %v1253_v24  ;;  %1278 = vmatprep.subr.bf16.mxu1 %v1277_v60  ;;  %v620_v24 = vld [vmem:[%s2292_s2 + $0x128] sm:$0xff]  ;;  %v1295_v26 = vpack.c.bf16 %v617_v23, %v615_v22  ;;  %v619_v28 = vld [vmem:[%s2292_s2 + $0x120] sm:$0xff]  ;;  %v626_v31 = vld [vmem:[%s2292_s2 + $0x158] sm:$0xff]  ;;  %p1483_p12 = scmp.ne.s32.totalorder %s2236_s16, %s1482_s20  ;;  %p1490_p2 = scmp.lt.s32.totalorder %s1488_s30, %s1482_s20 }
  0x24   : > { %v1297_v27 = vpack.c.bf16 %v622_v25, %v620_v24  ;;  %v628_v36 = vld [vmem:[%s2292_s2 + $0x168] sm:$0xff]  ;;  %v630_v37 = vld [vmem:[%s2292_s2 + $0x178] sm:$0xff]  ;;  %v627_v40 = vld [vmem:[%s2292_s2 + $0x160] sm:$0xff] }
  0x25   : > { %v1305_v39 = vpack.c.bf16 %v630_v37, %v628_v36  ;;  %v629_v41 = vld [vmem:[%s2292_s2 + $0x170] sm:$0xff]  ;;  %v632_v42 = vld [vmem:[%s2292_s2 + $0x188] sm:$0xff]  ;;  %v634_v43 = vld [vmem:[%s2292_s2 + $0x198] sm:$0xff]  ;;  %p1484_p13 = pnand %p1483_p12, %p1642_p4  ;;  %p1491_p3 = por %p1490_p2, %p1489_p1 }
  0x26   : > { %1256 = vmatpush1.bf16.msra.mxu0 %v1255_v29  ;;  %1280 = vmatpush1.bf16.msra.mxu1 %v1279_v1  ;;  %v621_v29 = vld [vmem:[%s2292_s2 + $0x130] sm:$0xff]  ;;  %v1307_v44 = vpack.c.bf16 %v629_v41, %v627_v40  ;;  %v1309_v45 = vpack.c.bf16 %v634_v43, %v632_v42  ;;  %v631_v46 = vld [vmem:[%s2292_s2 + $0x180] sm:$0xff]  ;;  %v636_v48 = vld [vmem:[%s2292_s2 + $0x1a8] sm:$0xff]  ;;  %v311_v1 = vand.u32 127, %v310_v0 }
  0x27   : > { %1258 = vmatprep.subr.bf16.mxu0 %v1257_v30  ;;  %1282 = vmatprep.subr.bf16.mxu1 %v1281_v2  ;;  %v624_v30 = vld [vmem:[%s2292_s2 + $0x148] sm:$0xff]  ;;  %v1299_v32 = vpack.c.bf16 %v621_v29, %v619_v28  ;;  %v633_v47 = vld [vmem:[%s2292_s2 + $0x190] sm:$0xff]  ;;  %v638_v49 = vld [vmem:[%s2292_s2 + $0x1b8] sm:$0xff]  ;;  %p1485_p0 = pneg %p1484_p13 }
  0x28   : > { %v1311_v50 = vpack.c.bf16 %v633_v47, %v631_v46  ;;  %v1313_v51 = vpack.c.bf16 %v638_v49, %v636_v48  ;;  %v635_v52 = vld [vmem:[%s2292_s2 + $0x1a0] sm:$0xff]  ;;  %v637_v53 = vld [vmem:[%s2292_s2 + $0x1b0] sm:$0xff]  ;;  %v640_v54 = vld [vmem:[%s2292_s2 + $0x1c8] sm:$0xff] }
  0x29   : > { %v642_v55 = vld [vmem:[%s2292_s2 + $0x1d8] sm:$0xff]  ;;  %v1315_v56 = vpack.c.bf16 %v637_v53, %v635_v52  ;;  %v639_v58 = vld [vmem:[%s2292_s2 + $0x1c0] sm:$0xff]  ;;  %v641_v59 = vld [vmem:[%s2292_s2 + $0x1d0] sm:$0xff]  ;;  %p1492_p5 = pnand %p1491_p3, %p1485_p0 }
  0x2a   : > { %1260 = vmatpush1.bf16.msra.mxu0 %v1259_v33  ;;  %1284 = vmatpush1.bf16.msra.mxu1 %v1283_v8  ;;  %v1301_v33 = vpack.c.bf16 %v626_v31, %v624_v30  ;;  %v1317_v57 = vpack.c.bf16 %v642_v55, %v640_v54  ;;  %v644_v60 = vld [vmem:[%s2292_s2 + $0x1e8] sm:$0xff]  ;;  %v646_v61 = vld [vmem:[%s2292_s2 + $0x1f8] sm:$0xff]  ;;  %v1319_v62 = vpack.c.bf16 %v641_v59, %v639_v58  ;;  %v643_v19 = vld [vmem:[%s2292_s2 + $0x1e0] sm:$0xff] }
  0x2b   : > { %1286 = vmatprep.subr.bf16.mxu1 %v1285_v9  ;;  %v1321_v63 = vpack.c.bf16 %v646_v61, %v644_v60  ;;  %v789_v22 = vld [vmem:[%s2294_s4 + $0x8] sm:$0xff]  ;;  %v788_v23 = vld [vmem:[%s2294_s4] sm:$0xff]  ;;  %v790_v25 = vld [vmem:[%s2294_s4 + $0x10] sm:$0xff] }
  0x2c   : > { %v1327_v28 = vpack.c.bf16 %v790_v25, %v788_v23  ;;  %v792_v30 = vld [vmem:[%s2294_s4 + $0x20] sm:$0xff]  ;;  %v794_v31 = vld [vmem:[%s2294_s4 + $0x30] sm:$0xff]  ;;  %v833_v23 = vld [vmem:[%s2294_s4 + $0x168] sm:$0xff] }
  0x2d   : > { %v1331_v34 = vpack.c.bf16 %v794_v31, %v792_v30  ;;  %v796_v36 = vld [vmem:[%s2294_s4 + $0x40] sm:$0xff]  ;;  %v798_v37 = vld [vmem:[%s2294_s4 + $0x50] sm:$0xff]  ;;  %v839_v30 = vld [vmem:[%s2294_s4 + $0x198] sm:$0xff] }
  0x2e   : > { %1288 = vmatpush1.bf16.msra.mxu1 %v1287_v14  ;;  %v1335_v40 = vpack.c.bf16 %v798_v37, %v796_v36  ;;  %v800_v42 = vld [vmem:[%s2294_s4 + $0x60] sm:$0xff]  ;;  %v802_v43 = vld [vmem:[%s2294_s4 + $0x70] sm:$0xff]  ;;  %v843_v36 = vld [vmem:[%s2294_s4 + $0x1b8] sm:$0xff] }
  0x2f   : > { %1290 = vmatprep.subr.bf16.mxu1 %v1289_v15  ;;  %v1339_v46 = vpack.c.bf16 %v802_v43, %v800_v42  ;;  %v804_v48 = vld [vmem:[%s2294_s4 + $0x80] sm:$0xff]  ;;  %v806_v49 = vld [vmem:[%s2294_s4 + $0x90] sm:$0xff]  ;;  %v847_v42 = vld [vmem:[%s2294_s4 + $0x1d8] sm:$0xff] }
  0x30   : > { %v1343_v52 = vpack.c.bf16 %v806_v49, %v804_v48  ;;  %v808_v54 = vld [vmem:[%s2294_s4 + $0xa0] sm:$0xff]  ;;  %v810_v55 = vld [vmem:[%s2294_s4 + $0xb0] sm:$0xff] }
  0x31   : > { %v1347_v58 = vpack.c.bf16 %v810_v55, %v808_v54  ;;  %v812_v60 = vld [vmem:[%s2294_s4 + $0xc0] sm:$0xff]  ;;  %v814_v61 = vld [vmem:[%s2294_s4 + $0xd0] sm:$0xff] }
  0x32   : > { %1292 = vmatpush1.bf16.msra.mxu1 %v1291_v20  ;;  %v645_v20 = vld [vmem:[%s2292_s2 + $0x1f0] sm:$0xff] }
  0x33   : > { %1294 = vmatprep.subr.bf16.mxu1 %v1293_v21  ;;  %v1323_v21 = vpack.c.bf16 %v645_v20, %v643_v19  ;;  %v831_v19 = vld [vmem:[%s2294_s4 + $0x158] sm:$0xff] }
  0x36   : > { %1296 = vmatpush1.bf16.msra.mxu1 %v1295_v26  ;;  %v793_v26 = vld [vmem:[%s2294_s4 + $0x28] sm:$0xff] }
  0x37   : > { %1298 = vmatprep.subr.bf16.mxu1 %v1297_v27  ;;  %v795_v27 = vld [vmem:[%s2294_s4 + $0x38] sm:$0xff] }
  0x38   : > { %v1329_v29 = vpack.c.bf16 %v795_v27, %v793_v26  ;;  %v832_v27 = vld [vmem:[%s2294_s4 + $0x160] sm:$0xff] }
  0x3a   : > { %1300 = vmatpush1.bf16.msra.mxu1 %v1299_v32  ;;  %v797_v32 = vld [vmem:[%s2294_s4 + $0x48] sm:$0xff] }
  0x3b   : > { %1302 = vmatprep.subr.bf16.mxu1 %v1301_v33  ;;  %v799_v33 = vld [vmem:[%s2294_s4 + $0x58] sm:$0xff] }
  0x3c   : > { %v1333_v35 = vpack.c.bf16 %v799_v33, %v797_v32  ;;  %v836_v33 = vld [vmem:[%s2294_s4 + $0x180] sm:$0xff] }
  0x3e   : > { %1304 = vmatpush1.bf16.msra.mxu1 %v1303_v38  ;;  %v801_v38 = vld [vmem:[%s2294_s4 + $0x68] sm:$0xff] }
  0x3f   : > { %1306 = vmatprep.subr.bf16.mxu1 %v1305_v39  ;;  %v803_v39 = vld [vmem:[%s2294_s4 + $0x78] sm:$0xff] }
  0x40   : > { %v1337_v41 = vpack.c.bf16 %v803_v39, %v801_v38  ;;  %v840_v39 = vld [vmem:[%s2294_s4 + $0x1a0] sm:$0xff] }
  0x42   : > { %1308 = vmatpush1.bf16.msra.mxu1 %v1307_v44  ;;  %v805_v44 = vld [vmem:[%s2294_s4 + $0x88] sm:$0xff] }
  0x43   : > { %1310 = vmatprep.subr.bf16.mxu1 %v1309_v45  ;;  %v807_v45 = vld [vmem:[%s2294_s4 + $0x98] sm:$0xff] }
  0x44   : > { %v1341_v47 = vpack.c.bf16 %v807_v45, %v805_v44 }
  0x46   : > { %1312 = vmatpush1.bf16.msra.mxu1 %v1311_v50  ;;  %v809_v50 = vld [vmem:[%s2294_s4 + $0xa8] sm:$0xff] }
  0x47   : > { %1314 = vmatprep.subr.bf16.mxu1 %v1313_v51  ;;  %v811_v51 = vld [vmem:[%s2294_s4 + $0xb8] sm:$0xff] }
  0x48   : > { %v1345_v53 = vpack.c.bf16 %v811_v51, %v809_v50 }
  0x4a   : > { %1316 = vmatpush1.bf16.msra.mxu1 %v1315_v56  ;;  %v813_v56 = vld [vmem:[%s2294_s4 + $0xc8] sm:$0xff] }
  0x4b   : > { %1318 = vmatprep.subr.bf16.mxu1 %v1317_v57  ;;  %v815_v57 = vld [vmem:[%s2294_s4 + $0xd8] sm:$0xff] }
  0x4c   : > { %v1349_v59 = vpack.c.bf16 %v815_v57, %v813_v56 }
  0x4e   : > { %1320 = vmatpush1.bf16.msra.mxu1 %v1319_v62  ;;  %v817_v62 = vld [vmem:[%s2294_s4 + $0xe8] sm:$0xff] }
  0x4f   : > { %1322 = vmatprep.subr.bf16.mxu1 %v1321_v63  ;;  %v819_v63 = vld [vmem:[%s2294_s4 + $0xf8] sm:$0xff] }
  0x52   : > { %1324 = vmatpush1.bf16.msra.mxu1 %v1323_v21 }
  0x8f   : > { %v316_v2 = vpop.permute.xlu0 %315  ;;  %v322_v4 = vpop.permute.xlu1 %321 }
  0x90   : > { %vm338_vm1 = vcmp.eq.s32.totalorder %v311_v1, %v316_v2  ;;  %vm340_vm2 = vcmp.eq.s32.totalorder %v311_v1, %v322_v4  ;;  %v1353_v2 = vpack.c.bf16 %v819_v63, %v817_v62  ;;  %v818_v4 = vld [vmem:[%s2294_s4 + $0xf0] sm:$0xff] }
  0x91   : > { %v1222_v3 = vsel %vm338_vm1, 1.0, %v1563_v5  ;;  %v1224_v8 = vsel %vm340_vm2, 1.0, %v1563_v5  ;;  %v846_v62 = vld [vmem:[%s2294_s4 + $0x1d0] sm:$0xff] }
  0x92   : > { %1230 = vmatmul.mubr.msk.f32.vlgmr.msra.gmra.mrb[0].mxu0 %vm394_vm0, %v1222_v3  ;;  %v816_v3 = vld [vmem:[%s2294_s4 + $0xe0] sm:$0xff] }
  0x93   : > { %v319_v6 = vpop.permute.xlu0 %318  ;;  %489 = vmatprep.mubr.f32.mxu0 %v1563_v5  ;;  %v325_v9 = vpop.permute.xlu1 %324 }
  0x94   : > { %vm339_vm3 = vcmp.eq.s32.totalorder %v311_v1, %v319_v6  ;;  %vm341_vm4 = vcmp.eq.s32.totalorder %v311_v1, %v325_v9  ;;  %v821_v6 = vld [vmem:[%s2294_s4 + $0x108] sm:$0xff] }
  0x95   : > { %v1223_v7 = vsel %vm339_vm3, 1.0, %v1563_v5  ;;  %v1225_v11 = vsel %vm341_vm4, 1.0, %v1563_v5 }
  0x96   : > { %1231 = vmatmul.mubr.msk.f32.gmra.mrb[2].mxu0 %vm394_vm0, %v1223_v7  ;;  %v823_v7 = vld [vmem:[%s2294_s4 + $0x118] sm:$0xff] }
  0x97   : > { %495 = vmatprep.mubr.f32.mxu0 %v1563_v5  ;;  %v328_v10 = vpop.permute.xlu0 %327  ;;  %v331_v12 = vpop.permute.xlu1 %330  ;;  %v1357_v9 = vpack.c.bf16 %v823_v7, %v821_v6  ;;  %v850_v6 = vld [vmem:[%s2294_s4 + $0x1f0] sm:$0xff] }
  0x98   : > { %vm342_vm5 = vcmp.eq.s32.totalorder %v311_v1, %v328_v10  ;;  %vm343_vm6 = vcmp.eq.s32.totalorder %v311_v1, %v331_v12  ;;  %v820_v10 = vld [vmem:[%s2294_s4 + $0x100] sm:$0xff]  ;;  %v825_v12 = vld [vmem:[%s2294_s4 + $0x128] sm:$0xff] }
  0x99   : > { %v1226_v13 = vsel %vm342_vm5, 1.0, %v1563_v5  ;;  %v1227_v15 = vsel %vm343_vm6, 1.0, %v1563_v5 }
  0x9a   : > { %1232 = vmatmul.mubr.msk.f32.gmra.mrb[4].mxu0 %vm394_vm0, %v1224_v8  ;;  %v1355_v8 = vpack.c.bf16 %v818_v4, %v816_v3  ;;  %v848_v4 = vld [vmem:[%s2294_s4 + $0x1e0] sm:$0xff] }
  0x9b   : > { %501 = vmatprep.mubr.f32.mxu0 %v1563_v5  ;;  %v334_v14 = vpop.permute.xlu0 %333  ;;  %v337_v16 = vpop.permute.xlu1 %336  ;;  %v1387_v7 = vpack.c.bf16 %v850_v6, %v848_v4 }
  0x9c   : > { %vm344_vm7 = vcmp.eq.s32.totalorder %v311_v1, %v334_v14  ;;  %vm345_vm8 = vcmp.eq.s32.totalorder %v311_v1, %v337_v16  ;;  %v1351_v1 = vpack.c.bf16 %v814_v61, %v812_v60  ;;  %v824_v16 = vld [vmem:[%s2294_s4 + $0x120] sm:$0xff] }
  0x9d   : > { %v1228_v17 = vsel %vm344_vm7, 1.0, %v1563_v5  ;;  %v1229_v18 = vsel %vm345_vm8, 1.0, %v1563_v5  ;;  %v844_v61 = vld [vmem:[%s2294_s4 + $0x1c0] sm:$0xff] }
  0x9e   : > { %1233 = vmatmul.mubr.msk.f32.gmra.mrb[6].mxu0 %vm394_vm0, %v1225_v11  ;;  %v822_v11 = vld [vmem:[%s2294_s4 + $0x110] sm:$0xff]  ;;  %v1383_v63 = vpack.c.bf16 %v846_v62, %v844_v61 }
  0x9f   : > { %507 = vmatprep.mubr.f32.mxu0 %v1563_v5  ;;  %v1359_v14 = vpack.c.bf16 %v822_v11, %v820_v10  ;;  %v647_v10 = vld [vmem:[%s2293_s3] sm:$0x3] }
  0xa2   : > { %1234 = vmatmul.mubr.msk.f32.gmra.mrb[8].mxu0 %vm394_vm0, %v1226_v13  ;;  %v827_v13 = vld [vmem:[%s2294_s4 + $0x138] sm:$0xff] }
  0xa3   : > { %513 = vmatprep.mubr.f32.mxu0 %v1563_v5 }
  0xa6   : > { %1235 = vmatmul.mubr.msk.f32.gmra.mrb[10].mxu0 %vm394_vm0, %v1227_v15  ;;  %v1361_v15 = vpack.c.bf16 %v827_v13, %v825_v12 }
  0xa7   : > { %519 = vmatprep.mubr.f32.mxu0 %v1563_v5 }
  0xaa   : > { %1236 = vmatmul.mubr.msk.f32.gmra.mrb[12].mxu0 %vm394_vm0, %v1228_v17  ;;  %v826_v17 = vld [vmem:[%s2294_s4 + $0x130] sm:$0xff] }
  0xab   : > { %525 = vmatprep.mubr.f32.mxu0 %v1563_v5  ;;  %v791_v5 = vld [vmem:[%s2294_s4 + $0x18] sm:$0xff]  ;;  %v1363_v20 = vpack.c.bf16 %v826_v17, %v824_v16 }
  0xac   : > { %v1325_v24 = vpack.c.bf16 %v791_v5, %v789_v22  ;;  %v828_v22 = vld [vmem:[%s2294_s4 + $0x140] sm:$0xff]  ;;  %v830_v5 = vld [vmem:[%s2294_s4 + $0x150] sm:$0xff] }
  0xad   : > { %v1367_v25 = vpack.c.bf16 %v830_v5, %v828_v22 }
  0xae   : > { %1237 = vmatmul.mubr.msk.f32.gmra.mrb[14].mxu0 %vm394_vm0, %v1229_v18  ;;  %1326 = vmatprep.subr.bf16.mxu0 %v1325_v24  ;;  %v829_v18 = vld [vmem:[%s2294_s4 + $0x148] sm:$0xff]  ;;  %v835_v24 = vld [vmem:[%s2294_s4 + $0x178] sm:$0xff] }
  0xaf   : > { %1328 = vmatpush1.bf16.msra.mxu0 %v1327_v28  ;;  %v1365_v21 = vpack.c.bf16 %v831_v19, %v829_v18  ;;  %v1369_v26 = vpack.c.bf16 %v835_v24, %v833_v23  ;;  %v834_v28 = vld [vmem:[%s2294_s4 + $0x170] sm:$0xff] }
  0xb0   : > { %1330 = vmatprep.subr.bf16.mxu0 %v1329_v29  ;;  %v837_v29 = vld [vmem:[%s2294_s4 + $0x188] sm:$0xff]  ;;  %v1371_v31 = vpack.c.bf16 %v834_v28, %v832_v27 }
  0xb1   : > { %v1373_v32 = vpack.c.bf16 %v839_v30, %v837_v29 }
  0xb3   : > { %1332 = vmatpush1.bf16.msra.mxu0 %v1331_v34  ;;  %v838_v34 = vld [vmem:[%s2294_s4 + $0x190] sm:$0xff] }
  0xb4   : > { %1334 = vmatprep.subr.bf16.mxu0 %v1333_v35  ;;  %v841_v35 = vld [vmem:[%s2294_s4 + $0x1a8] sm:$0xff]  ;;  %v1375_v37 = vpack.c.bf16 %v838_v34, %v836_v33 }
  0xb5   : > { %v1377_v38 = vpack.c.bf16 %v843_v36, %v841_v35 }
  0xb7   : > { %1336 = vmatpush1.bf16.msra.mxu0 %v1335_v40  ;;  %v842_v40 = vld [vmem:[%s2294_s4 + $0x1b0] sm:$0xff] }
  0xb8   : > { %1338 = vmatprep.subr.bf16.mxu0 %v1337_v41  ;;  %v845_v41 = vld [vmem:[%s2294_s4 + $0x1c8] sm:$0xff]  ;;  %v1379_v43 = vpack.c.bf16 %v842_v40, %v840_v39 }
  0xb9   : > { %v1381_v44 = vpack.c.bf16 %v847_v42, %v845_v41 }
  0xbb   : > { %1340 = vmatpush1.bf16.msra.mxu0 %v1339_v46 }
  0xbc   : > { %1342 = vmatprep.subr.bf16.mxu0 %v1341_v47 }
  0xbf   : > { %1344 = vmatpush1.bf16.msra.mxu0 %v1343_v52 }
  0xc0   : > { %1346 = vmatprep.subr.bf16.mxu0 %v1345_v53 }
  0xc3   : > { %1348 = vmatpush1.bf16.msra.mxu0 %v1347_v58 }
  0xc4   : > { %1350 = vmatprep.subr.bf16.mxu0 %v1349_v59 }
  0xc7   : > { %1352 = vmatpush1.bf16.msra.mxu0 %v1351_v1  ;;  %v849_v1 = vld [vmem:[%s2294_s4 + $0x1e8] sm:$0xff] }
  0xc8   : > { %1354 = vmatprep.subr.bf16.mxu0 %v1353_v2  ;;  %v851_v2 = vld [vmem:[%s2294_s4 + $0x1f8] sm:$0xff] }
  0xc9   : > { %v1385_v3 = vpack.c.bf16 %v851_v2, %v849_v1 }
  0xcb   : > { %1356 = vmatpush1.bf16.msra.mxu0 %v1355_v8  ;;  %v2114_v8 = vshrl.u32 %v310_v0, 7 }
  0xcc   : > { %1358 = vmatprep.subr.bf16.mxu0 %v1357_v9 }
  0xcd   : > { %v651_v9 = vsub.s32 0, %v2114_v8  ;;  %v655_v11 = vsub.s32 1, %v2114_v8 }
  0xcf   : > { %1360 = vmatpush1.bf16.msra.mxu0 %v1359_v14  ;;  %v652_v12 = vrot.slane %v647_v10, %v651_v9  ;;  %v656_v13 = vrot.slane %v647_v10, %v655_v11 }
  0xd0   : > { %1362 = vmatprep.subr.bf16.mxu0 %v1361_v15 }
  0xd3   : > { %1364 = vmatpush1.bf16.msra.mxu0 %v1363_v20 }
  0xd4   : > { %1366 = vmatprep.subr.bf16.mxu0 %v1365_v21 }
  0xd7   : > { %1368 = vmatpush1.bf16.msra.mxu0 %v1367_v25 }
  0xd8   : > { %1370 = vmatprep.subr.bf16.mxu0 %v1369_v26 }
  0xdb   : > { %1372 = vmatpush1.bf16.msra.mxu0 %v1371_v31 }
  0xdc   : > { %1374 = vmatprep.subr.bf16.mxu0 %v1373_v32 }
  0xdf   : > { %1376 = vmatpush1.bf16.msra.mxu0 %v1375_v37 }
  0xe0   : > { %1378 = vmatprep.subr.bf16.mxu0 %v1377_v38 }
  0xe3   : > { %1380 = vmatpush1.bf16.msra.mxu0 %v1379_v43 }
  0xe4   : > { %1382 = vmatprep.subr.bf16.mxu0 %v1381_v44 }
  0xe7   : > { %1384 = vmatpush1.bf16.msra.mxu0 %v1383_v63 }
  0xe8   : > { %1386 = vmatprep.subr.bf16.mxu0 %v1385_v3 }
  0xeb   : > { %1388 = vmatpush1.bf16.msra.mxu0 %v1387_v7 }
 0x165   : > { %v485_v45 = vpop.f32.mrb[0].mxu0 }
 0x166   : > { %v487_v46 = vpop.f32.mrb[1].mxu0 }
 0x167   : > { %723 = vmatprep.mubr.f32.mxu1 %v487_v46 }
 0x168   : > { %724 = vmatmul.mubr.f32.vlgmr.msra.gmra.mrb[0].mxu1 %v485_v45 }
 0x169   : > { %v491_v47 = vpop.f32.mrb[2].mxu0 }
 0x16a   : > { %v493_v48 = vpop.f32.mrb[3].mxu0 }
 0x16b   : > { %729 = vmatprep.mubr.f32.mxu1 %v493_v48 }
 0x16c   : > { %730 = vmatmul.mubr.f32.gmra.mrb[2].mxu1 %v491_v47 }
 0x16d   : > { %v497_v49 = vpop.f32.mrb[4].mxu0 }
 0x16e   : > { %v499_v50 = vpop.f32.mrb[5].mxu0 }
 0x16f   : > { %735 = vmatprep.mubr.f32.mxu1 %v499_v50 }
 0x170   : > { %736 = vmatmul.mubr.f32.gmra.mrb[4].mxu1 %v497_v49 }
 0x171   : > { %v503_v51 = vpop.f32.mrb[6].mxu0 }
 0x172   : > { %v505_v52 = vpop.f32.mrb[7].mxu0 }
 0x173   : > { %741 = vmatprep.mubr.f32.mxu1 %v505_v52 }
 0x174   : > { %742 = vmatmul.mubr.f32.gmra.mrb[6].mxu1 %v503_v51 }
 0x175   : > { %v509_v53 = vpop.f32.mrb[8].mxu0 }
 0x176   : > { %v511_v54 = vpop.f32.mrb[9].mxu0 }
 0x177   : > { %747 = vmatprep.mubr.f32.mxu1 %v511_v54 }
 0x178   : > { %748 = vmatmul.mubr.f32.gmra.mrb[8].mxu1 %v509_v53 }
 0x179   : > { %v515_v55 = vpop.f32.mrb[10].mxu0 }
 0x17a   : > { %v517_v56 = vpop.f32.mrb[11].mxu0 }
 0x17b   : > { %753 = vmatprep.mubr.f32.mxu1 %v517_v56 }
 0x17c   : > { %754 = vmatmul.mubr.f32.gmra.mrb[10].mxu1 %v515_v55 }
 0x17d   : > { %v521_v57 = vpop.f32.mrb[12].mxu0 }
 0x17e   : > { %v523_v58 = vpop.f32.mrb[13].mxu0 }
 0x17f   : > { %759 = vmatprep.mubr.f32.mxu1 %v523_v58 }
 0x180   : > { %760 = vmatmul.mubr.f32.gmra.mrb[12].mxu1 %v521_v57 }
 0x181   : > { %v527_v59 = vpop.f32.mrb[14].mxu0 }
 0x182   : > { %v529_v60 = vpop.f32.mrb[15].mxu0 }
 0x183   : > { %765 = vmatprep.mubr.f32.mxu1 %v529_v60  ;;  %v852_v60 = vld [vmem:[%s2295_s5] sm:$0x3] }
 0x184   : > { %766 = vmatmul.mubr.f32.gmra.mrb[14].mxu1 %v527_v59  ;;  %v857_v61 = vrot.slane %v852_v60, %v651_v9  ;;  %v861_v62 = vrot.slane %v852_v60, %v655_v11 }
 0x23b   : > { %v725_v14 = vpop.f32.mrb[0].mxu1 }
 0x23c   : > { %v726_v15 = vadd.f32 %v725_v14, %v652_v12  ;;  %v727_v16 = vpop.f32.mrb[1].mxu1 }
 0x23d   : > { %v728_v17 = vadd.f32 %v727_v16, %v656_v13 }
 0x23e   : > { %v772_v19 = vmax.f32 %v726_v15, 0.0 }
 0x23f   : > { %v773_v0 = vmax.f32 %v728_v17, 0.0  ;;  %v731_v18 = vpop.f32.mrb[2].mxu1 }
 0x240   : > { %v732_v20 = vadd.f32 %v731_v18, %v652_v12  ;;  %v733_v21 = vpop.f32.mrb[3].mxu1 }
 0x241   : > { %v734_v22 = vadd.f32 %v733_v21, %v656_v13  ;;  %928 = vmatprep.mubr.f32.mxu0 %v773_v0 }
 0x242   : > { %929 = vmatmul.mubr.f32.vlgmr.msra.gmra.mrb[16].mxu0 %v772_v19  ;;  %v774_v24 = vmax.f32 %v732_v20, 0.0 }
 0x243   : > { %v775_v5 = vmax.f32 %v734_v22, 0.0  ;;  %v737_v23 = vpop.f32.mrb[4].mxu1 }
 0x244   : > { %v738_v25 = vadd.f32 %v737_v23, %v652_v12  ;;  %v739_v26 = vpop.f32.mrb[5].mxu1 }
 0x245   : > { %v740_v27 = vadd.f32 %v739_v26, %v656_v13  ;;  %934 = vmatprep.mubr.f32.mxu0 %v775_v5 }
 0x246   : > { %935 = vmatmul.mubr.f32.gmra.mrb[18].mxu0 %v774_v24  ;;  %v776_v30 = vmax.f32 %v738_v25, 0.0 }
 0x247   : > { %v777_v28 = vmax.f32 %v740_v27, 0.0  ;;  %v743_v29 = vpop.f32.mrb[6].mxu1 }
 0x248   : > { %v744_v31 = vadd.f32 %v743_v29, %v652_v12  ;;  %v745_v32 = vpop.f32.mrb[7].mxu1 }
 0x249   : > { %v746_v33 = vadd.f32 %v745_v32, %v656_v13  ;;  %940 = vmatprep.mubr.f32.mxu0 %v777_v28 }
 0x24a   : > { %941 = vmatmul.mubr.f32.gmra.mrb[20].mxu0 %v776_v30  ;;  %v778_v36 = vmax.f32 %v744_v31, 0.0 }
 0x24b   : > { %v779_v34 = vmax.f32 %v746_v33, 0.0  ;;  %v749_v35 = vpop.f32.mrb[8].mxu1 }
 0x24c   : > { %v750_v37 = vadd.f32 %v749_v35, %v652_v12  ;;  %v751_v38 = vpop.f32.mrb[9].mxu1 }
 0x24d   : > { %v752_v39 = vadd.f32 %v751_v38, %v656_v13  ;;  %946 = vmatprep.mubr.f32.mxu0 %v779_v34 }
 0x24e   : > { %947 = vmatmul.mubr.f32.gmra.mrb[22].mxu0 %v778_v36  ;;  %v780_v42 = vmax.f32 %v750_v37, 0.0 }
 0x24f   : > { %v781_v40 = vmax.f32 %v752_v39, 0.0  ;;  %v755_v41 = vpop.f32.mrb[10].mxu1 }
 0x250   : > { %v756_v43 = vadd.f32 %v755_v41, %v652_v12  ;;  %v757_v44 = vpop.f32.mrb[11].mxu1 }
 0x251   : > { %v758_v45 = vadd.f32 %v757_v44, %v656_v13  ;;  %952 = vmatprep.mubr.f32.mxu0 %v781_v40 }
 0x252   : > { %953 = vmatmul.mubr.f32.gmra.mrb[24].mxu0 %v780_v42  ;;  %v782_v48 = vmax.f32 %v756_v43, 0.0 }
 0x253   : > { %v783_v46 = vmax.f32 %v758_v45, 0.0  ;;  %v761_v47 = vpop.f32.mrb[12].mxu1 }
 0x254   : > { %v762_v49 = vadd.f32 %v761_v47, %v652_v12  ;;  %v763_v50 = vpop.f32.mrb[13].mxu1 }
 0x255   : > { %v764_v51 = vadd.f32 %v763_v50, %v656_v13  ;;  %958 = vmatprep.mubr.f32.mxu0 %v783_v46 }
 0x256   : > { %959 = vmatmul.mubr.f32.gmra.mrb[26].mxu0 %v782_v48  ;;  %v784_v54 = vmax.f32 %v762_v49, 0.0 }
 0x257   : > { %v785_v52 = vmax.f32 %v764_v51, 0.0  ;;  %v767_v53 = vpop.f32.mrb[14].mxu1 }
 0x258   : > { %v768_v55 = vadd.f32 %v767_v53, %v652_v12  ;;  %v769_v56 = vpop.f32.mrb[15].mxu1 }
 0x259   : > { %v770_v57 = vadd.f32 %v769_v56, %v656_v13  ;;  %964 = vmatprep.mubr.f32.mxu0 %v785_v52 }
 0x25a   : > { %965 = vmatmul.mubr.f32.gmra.mrb[28].mxu0 %v784_v54  ;;  %v786_v59 = vmax.f32 %v768_v55, 0.0 }
 0x25b   : > { %v787_v58 = vmax.f32 %v770_v57, 0.0 }
 0x25d   : > { %970 = vmatprep.mubr.f32.mxu0 %v787_v58 }
 0x25e   : > { %971 = vmatmul.mubr.f32.gmra.mrb[30].mxu0 %v786_v59 }
 0x315   : > { %v930_v63 = vpop.f32.mrb[16].mxu0 }
 0x316   : > { %v2132_v1 = vadd.f32 %v930_v63, %v857_v61  ;;  %v932_v2 = vpop.f32.mrb[17].mxu0 }
 0x317   : > { %v2134_v3 = vadd.f32 %v932_v2, %v861_v62 }
 0x318   : > { %v977_v4 = vmul.f32 %v2132_v1, %v2132_v1 }
 0x319   : > { %v978_v6 = vmul.f32 %v2134_v3, %v2134_v3  ;;  %v936_v7 = vpop.f32.mrb[18].mxu0 }
 0x31a   : > { %v2140_v10 = vadd.f32 %v936_v7, %v857_v61  ;;  %v938_v12 = vpop.f32.mrb[19].mxu0 }
 0x31b   : > { %v2142_v9 = vadd.f32 %v938_v12, %v861_v62  ;;  %v993_v8 = vadd.f32 %v978_v6, %v977_v4 }
 0x31c   : > { %v979_v11 = vmul.f32 %v2140_v10, %v2140_v10 }
 0x31d   : > { %v980_v13 = vmul.f32 %v2142_v9, %v2142_v9  ;;  %v942_v14 = vpop.f32.mrb[20].mxu0  ;;  %994 = vadd.xlane.f32.xlu0 %v993_v8 }
 0x31e   : > { %v2148_v15 = vadd.f32 %v942_v14, %v857_v61  ;;  %v944_v16 = vpop.f32.mrb[21].mxu0 }
 0x31f   : > { %v2150_v17 = vadd.f32 %v944_v16, %v861_v62  ;;  %v996_v0 = vadd.f32 %v980_v13, %v979_v11 }
 0x320   : > { %v981_v18 = vmul.f32 %v2148_v15, %v2148_v15 }
 0x321   : > { %v982_v19 = vmul.f32 %v2150_v17, %v2150_v17  ;;  %v948_v20 = vpop.f32.mrb[22].mxu0  ;;  %997 = vadd.xlane.f32.xlu1 %v996_v0 }
 0x322   : > { %v2156_v21 = vadd.f32 %v948_v20, %v857_v61  ;;  %v950_v22 = vpop.f32.mrb[23].mxu0 }
 0x323   : > { %v2158_v5 = vadd.f32 %v950_v22, %v861_v62  ;;  %v999_v23 = vadd.f32 %v982_v19, %v981_v18 }
 0x324   : > { %v983_v24 = vmul.f32 %v2156_v21, %v2156_v21 }
 0x325   : > { %v984_v25 = vmul.f32 %v2158_v5, %v2158_v5  ;;  %v954_v26 = vpop.f32.mrb[24].mxu0  ;;  %1000 = vadd.xlane.f32.xlu0 %v999_v23 }
 0x326   : > { %v2164_v27 = vadd.f32 %v954_v26, %v857_v61  ;;  %v956_v28 = vpop.f32.mrb[25].mxu0 }
 0x327   : > { %v2166_v29 = vadd.f32 %v956_v28, %v861_v62  ;;  %v1002_v30 = vadd.f32 %v984_v25, %v983_v24 }
 0x328   : > { %v985_v31 = vmul.f32 %v2164_v27, %v2164_v27 }
 0x329   : > { %v986_v32 = vmul.f32 %v2166_v29, %v2166_v29  ;;  %v960_v33 = vpop.f32.mrb[26].mxu0  ;;  %1003 = vadd.xlane.f32.xlu0 %v1002_v30 }
 0x32a   : > { %v2172_v34 = vadd.f32 %v960_v33, %v857_v61  ;;  %v962_v35 = vpop.f32.mrb[27].mxu0 }
 0x32b   : > { %v2174_v36 = vadd.f32 %v962_v35, %v861_v62  ;;  %v1005_v37 = vadd.f32 %v986_v32, %v985_v31 }
 0x32c   : > { %v987_v38 = vmul.f32 %v2172_v34, %v2172_v34 }
 0x32d   : > { %v988_v39 = vmul.f32 %v2174_v36, %v2174_v36  ;;  %v966_v40 = vpop.f32.mrb[28].mxu0  ;;  %1006 = vadd.xlane.f32.xlu1 %v1005_v37 }
 0x32e   : > { %v2180_v41 = vadd.f32 %v966_v40, %v857_v61  ;;  %v968_v42 = vpop.f32.mrb[29].mxu0 }
 0x32f   : > { %v2182_v43 = vadd.f32 %v968_v42, %v861_v62  ;;  %v1008_v44 = vadd.f32 %v988_v39, %v987_v38 }
 0x330   : > { %v989_v45 = vmul.f32 %v2180_v41, %v2180_v41 }
 0x331   : > { %v990_v46 = vmul.f32 %v2182_v43, %v2182_v43  ;;  %1009 = vadd.xlane.f32.xlu0 %v1008_v44  ;;  %v972_v47 = vpop.f32.mrb[30].mxu0 }
 0x332   : > { %v2188_v48 = vadd.f32 %v972_v47, %v857_v61  ;;  %v974_v49 = vpop.f32.mrb[31].mxu0 }
 0x333   : > { %v2190_v50 = vadd.f32 %v974_v49, %v861_v62  ;;  %v1011_v51 = vadd.f32 %v990_v46, %v989_v45 }
 0x334   : > { %v991_v52 = vmul.f32 %v2188_v48, %v2188_v48 }
 0x335   : > { %v992_v53 = vmul.f32 %v2190_v50, %v2190_v50  ;;  %1012 = vadd.xlane.f32.xlu1 %v1011_v51 }
 0x337   : > { %v1014_v54 = vadd.f32 %v992_v53, %v991_v52 }
 0x339   : > { %1015 = vadd.xlane.f32.xlu0 %v1014_v54 }
 0x3aa   : > { %v995_v55 = vpop.xlane.xlu0 %994 }
 0x3ab   : > { %1450 = vrsqrt.f32 %v995_v55  ;;  %vm1019_vm9 = vcmp.eq.f32.partialorder %v995_v55, inf  ;;  %v1022_v61 = vand.u32 2147483648, %v995_v55  ;;  %vm1021_vm10 = vcmp.eq.f32.partialorder %v995_v55, 0.0 }
 0x3ae   : > { %v998_v56 = vpop.xlane.xlu1 %997 }
 0x3af   : > { %1452 = vrsqrt.f32 %v998_v56  ;;  %vm1026_vm11 = vcmp.eq.f32.partialorder %v998_v56, inf  ;;  %v1029_v12 = vand.u32 2147483648, %v998_v56  ;;  %vm1028_vm12 = vcmp.eq.f32.partialorder %v998_v56, 0.0 }
 0x3b2   : > { %v1001_v57 = vpop.xlane.xlu0 %1000 }
 0x3b3   : > { %1454 = vrsqrt.f32 %v1001_v57  ;;  %vm1033_vm13 = vcmp.eq.f32.partialorder %v1001_v57, inf  ;;  %v1036_v18 = vand.u32 2147483648, %v1001_v57  ;;  %vm1035_vm14 = vcmp.eq.f32.partialorder %v1001_v57, 0.0 }
 0x3b5   : > { %v1451_v58 = vpop.eup %1450 }
 0x3b6   : > { %v1018_v59 = vmul.f32 %v1451_v58, %v995_v55  ;;  %v1004_v60 = vpop.xlane.xlu0 %1003 }
 0x3b7   : > { %1456 = vrsqrt.f32 %v1004_v60  ;;  %vm1040_vm15 = vcmp.eq.f32.partialorder %v1004_v60, inf  ;;  %v1043_v26 = vand.u32 2147483648, %v1004_v60  ;;  %vm1042_vm0 = vcmp.eq.f32.partialorder %v1004_v60, 0.0 }
 0x3b8   : > { %v1020_v62 = vsel %vm1019_vm9, %v995_v55, %v1018_v59 }
 0x3b9   : > { %v1453_v63 = vpop.eup %1452  ;;  %v1023_v2 = vsel %vm1021_vm10, %v1022_v61, %v1020_v62 }
 0x3ba   : > { %v1073_v4 = vadd.f32 1e-07, %v1023_v2  ;;  %v1025_v6 = vmul.f32 %v1453_v63, %v998_v56  ;;  %v1007_v7 = vpop.xlane.xlu1 %1006 }
 0x3bb   : > { %1458 = vrsqrt.f32 %v1007_v7  ;;  %vm1047_vm1 = vcmp.eq.f32.partialorder %v1007_v7, inf  ;;  %v1050_v40 = vand.u32 2147483648, %v1007_v7  ;;  %vm1049_vm2 = vcmp.eq.f32.partialorder %v1007_v7, 0.0 }
 0x3bc   : > { %1460 = vrcp.f32 %v1073_v4  ;;  %v1027_v8 = vsel %vm1026_vm11, %v998_v56, %v1025_v6 }
 0x3bd   : > { %v1455_v11 = vpop.eup %1454  ;;  %v1030_v13 = vsel %vm1028_vm12, %v1029_v12, %v1027_v8 }
 0x3be   : > { %v1074_v14 = vadd.f32 1e-07, %v1030_v13  ;;  %v1032_v16 = vmul.f32 %v1455_v11, %v1001_v57  ;;  %v1010_v0 = vpop.xlane.xlu0 %1009 }
 0x3bf   : > { %1462 = vrsqrt.f32 %v1010_v0  ;;  %vm1054_vm3 = vcmp.eq.f32.partialorder %v1010_v0, inf  ;;  %v1057_v51 = vand.u32 2147483648, %v1010_v0  ;;  %vm1056_vm4 = vcmp.eq.f32.partialorder %v1010_v0, 0.0 }
 0x3c0   : > { %1464 = vrcp.f32 %v1074_v14  ;;  %v1034_v19 = vsel %vm1033_vm13, %v1001_v57, %v1032_v16 }
 0x3c1   : > { %v1457_v20 = vpop.eup %1456  ;;  %v1037_v22 = vsel %vm1035_vm14, %v1036_v18, %v1034_v19 }
 0x3c2   : > { %v1075_v23 = vadd.f32 1e-07, %v1037_v22  ;;  %v1039_v24 = vmul.f32 %v1457_v20, %v1004_v60  ;;  %v1013_v25 = vpop.xlane.xlu1 %1012 }
 0x3c3   : > { %1466 = vrsqrt.f32 %v1013_v25  ;;  %vm1061_vm5 = vcmp.eq.f32.partialorder %v1013_v25, inf  ;;  %vm1063_vm6 = vcmp.eq.f32.partialorder %v1013_v25, 0.0 }
 0x3c4   : > { %1468 = vrcp.f32 %v1075_v23  ;;  %v1041_v28 = vsel %vm1040_vm15, %v1004_v60, %v1039_v24 }
 0x3c5   : > { %v1459_v30 = vpop.eup %1458  ;;  %v1044_v31 = vsel %vm1042_vm0, %v1043_v26, %v1041_v28 }
 0x3c6   : > { %v1461_v32 = vpop.eup %1460  ;;  %v1076_v33 = vadd.f32 1e-07, %v1044_v31  ;;  %v1046_v35 = vmul.f32 %v1459_v30, %v1007_v7  ;;  %v1016_v37 = vpop.xlane.xlu0 %1015 }
 0x3c7   : > { %v1082_v38 = vmul.f32 %v1461_v32, %v2132_v1  ;;  %v1083_v39 = vmul.f32 %v1461_v32, %v2134_v3  ;;  %1470 = vrsqrt.f32 %v1016_v37  ;;  %vm1068_vm7 = vcmp.eq.f32.partialorder %v1016_v37, inf }
 0x3c8   : > { %1472 = vrcp.f32 %v1076_v33  ;;  %v1048_v42 = vsel %vm1047_vm1, %v1007_v7, %v1046_v35  ;;  %vm1070_vm8 = vcmp.eq.f32.partialorder %v1016_v37, 0.0 }
 0x3c9   : > { %v1463_v44 = vpop.eup %1462  ;;  %1105 = vst [vmem:[%s2201_s14] sm:$0xff] %v1082_v38  ;;  %1106 = vst [vmem:[%s2201_s14 + $0x8] sm:$0xff] %v1083_v39  ;;  %v1051_v45 = vsel %vm1049_vm2, %v1050_v40, %v1048_v42 }
 0x3ca   : > { %v1465_v46 = vpop.eup %1464  ;;  %v1077_v47 = vadd.f32 1e-07, %v1051_v45  ;;  %v1053_v1 = vmul.f32 %v1463_v44, %v1010_v0 }
 0x3cb   : > { %v1085_v3 = vmul.f32 %v1465_v46, %v2140_v10  ;;  %v1086_v49 = vmul.f32 %v1465_v46, %v2142_v9  ;;  %v1064_v9 = vand.u32 2147483648, %v1013_v25 }
 0x3cc   : > { %1474 = vrcp.f32 %v1077_v47  ;;  %v1055_v52 = vsel %vm1054_vm3, %v1010_v0, %v1053_v1 }
 0x3cd   : > { %v1467_v53 = vpop.eup %1466  ;;  %1107 = vst [vmem:[%s2201_s14 + $0x10] sm:$0xff] %v1085_v3  ;;  %1108 = vst [vmem:[%s2201_s14 + $0x18] sm:$0xff] %v1086_v49  ;;  %v1058_v54 = vsel %vm1056_vm4, %v1057_v51, %v1055_v52 }
 0x3ce   : > { %v1469_v55 = vpop.eup %1468  ;;  %v1078_v56 = vadd.f32 1e-07, %v1058_v54  ;;  %v1060_v57 = vmul.f32 %v1467_v53, %v1013_v25 }
 0x3cf   : > { %v1088_v58 = vmul.f32 %v1469_v55, %v2148_v15  ;;  %v1089_v10 = vmul.f32 %v1469_v55, %v2150_v17  ;;  %v1071_v17 = vand.u32 2147483648, %v1016_v37 }
 0x3d0   : > { %1476 = vrcp.f32 %v1078_v56  ;;  %v1062_v59 = vsel %vm1061_vm5, %v1013_v25, %v1060_v57 }
 0x3d1   : > { %v1471_v60 = vpop.eup %1470  ;;  %1109 = vst [vmem:[%s2201_s14 + $0x20] sm:$0xff] %v1088_v58  ;;  %1110 = vst [vmem:[%s2201_s14 + $0x28] sm:$0xff] %v1089_v10  ;;  %v1065_v61 = vsel %vm1063_vm6, %v1064_v9, %v1062_v59 }
 0x3d2   : > { %v1473_v62 = vpop.eup %1472  ;;  %v1079_v63 = vadd.f32 1e-07, %v1065_v61  ;;  %v1067_v2 = vmul.f32 %v1471_v60, %v1016_v37 }
 0x3d3   : > { %v1091_v4 = vmul.f32 %v1473_v62, %v2156_v21  ;;  %v1092_v15 = vmul.f32 %v1473_v62, %v2158_v5 }
 0x3d4   : > { %1478 = vrcp.f32 %v1079_v63  ;;  %v1069_v6 = vsel %vm1068_vm7, %v1016_v37, %v1067_v2 }
 0x3d5   : > { %1111 = vst [vmem:[%s2201_s14 + $0x30] sm:$0xff] %v1091_v4  ;;  %1112 = vst [vmem:[%s2201_s14 + $0x38] sm:$0xff] %v1092_v15  ;;  %v1072_v7 = vsel %vm1070_vm8, %v1071_v17, %v1069_v6 }
 0x3d6   : > { %v1475_v12 = vpop.eup %1474  ;;  %v1080_v8 = vadd.f32 1e-07, %v1072_v7 }
 0x3d7   : > { %v1094_v21 = vmul.f32 %v1475_v12, %v2164_v27  ;;  %v1095_v5 = vmul.f32 %v1475_v12, %v2166_v29 }
 0x3d8   : > { %1480 = vrcp.f32 %v1080_v8 }
 0x3d9   : > { %1113 = vst [vmem:[%s2201_s14 + $0x40] sm:$0xff] %v1094_v21  ;;  %1114 = vst [vmem:[%s2201_s14 + $0x48] sm:$0xff] %v1095_v5 }
 0x3da   : > { %v1477_v11 = vpop.eup %1476 }
 0x3db   : > { %v1097_v13 = vmul.f32 %v1477_v11, %v2172_v34  ;;  %v1098_v14 = vmul.f32 %v1477_v11, %v2174_v36 }
 0x3dd   : > { %1115 = vst [vmem:[%s2201_s14 + $0x50] sm:$0xff] %v1097_v13  ;;  %1116 = vst [vmem:[%s2201_s14 + $0x58] sm:$0xff] %v1098_v14 }
 0x3de   : > { %v1479_v16 = vpop.eup %1478 }
 0x3df   : > { %v1100_v0 = vmul.f32 %v1479_v16, %v2180_v41  ;;  %v1101_v27 = vmul.f32 %v1479_v16, %v2182_v43 }
 0x3e1   : > { %1117 = vst [vmem:[%s2201_s14 + $0x60] sm:$0xff] %v1100_v0  ;;  %1118 = vst [vmem:[%s2201_s14 + $0x68] sm:$0xff] %v1101_v27 }
 0x3e2   : > { %v1481_v29 = vpop.eup %1480 }
 0x3e3   : > { %v1103_v34 = vmul.f32 %v1481_v29, %v2188_v48  ;;  %v1104_v36 = vmul.f32 %v1481_v29, %v2190_v50 }
 0x3e5   : > { %1119 = vst [vmem:[%s2201_s14 + $0x70] sm:$0xff] %v1103_v34  ;;  %1120 = vst [vmem:[%s2201_s14 + $0x78] sm:$0xff] %v1104_v36 }
 0x3e6   : > { %1495 = shalt.err (!%p1492_p5)
}
 0x3e7   : > { %s1496_s8 = scalar_lea.hbm %s2234_s19, 2048  ;;  %s1500_s13 = scalar_lea.hbm %s2296_s6, 4096 }
 0x3e8   : > { %p1497_p6 = scmp.ne.s32.totalorder %s2234_s19, %s1496_s8  ;;  %p1501_p10 = scmp.lt.u32.totalorder %s2234_s19, %s2296_s6 }
 0x3e9   : > { %p1502_p11 = scmp.lt.u32.totalorder %s1500_s13, %s1496_s8  ;;  %p1504_p13 = scmp.lt.u32.totalorder %s1496_s8, %s2234_s19 }
 0x3ea   : > { %p1498_p7 = pnand %p1497_p6, %p1642_p4 }
 0x3eb   : > { %p1503_p12 = por %p1502_p11, %p1501_p10 }
 0x3ec   : > { %p1499_p9 = pneg %p1498_p7 }
 0x3ed   : > { %p1505_p0 = por %p1504_p13, %p1503_p12 }
 0x3ef   : > { %p1506_p1 = pnand %p1505_p0, %p1499_p9 }
 0x3f1   : > { %1509 = shalt.err (!%p1506_p1)
}
 0x3f2   : > { %s1565_s17 = smov 256   ;;  %s1566_s18 = smov 16  }
 0x3f3   : > { %1389 = dma.vmem_to_hbm [thread:$0]  (%p1642_p4), %s2236_s16, 2048, %s2234_s19, %s2244_s24, %s1565_s17, %s1565_s17, %s1566_s18  }
 0x3f4 PF: > { %p1395_p2 = scmp.ge.s32.totalorder %s1560_s26, 2  ;;  %s1150_s20 = sand.u32 1, %s1540_s21  }
 0x3f5   : > { %s1151_s27 = scalar_lea.sflag [#allocation4], %s1150_s20 }
 0x3f6   : > { %p1392_p3 = pnand %p1395_p2, %p1649_p8 }
 0x3f8   : > { %1535 = dma.done.wait (!%p1392_p3), %s1151_s27, 2048  }
 0x3f9   : > { %1537 = vsyncadd (!%p1392_p3), %s1151_s27, 4294965248  ;;  %s19_s26 = sadd.s32 1, %s1560_s26   ;;  %s2299_s21 = smov %s1544_s22 }
 0x3fa   : > { %p16_p5 = scmp.ge.s32.totalorder %s19_s26, 4   ;;  %s2300_s22 = smov %s1548_s23 }
 0x3fb   : > { %s2301_s23 = smov %s1655_s10  ;;  %s2302_s24 = smov %s1556_s25 }
 0x3fc   : > { %s2303_s25 = smov %s2305_s29  ;;  %18 = sbr.rel (!%p16_p5) target bundleno = 4 (0x4), region = 87 }
 0x403   :  { %1156 = vsyncpa [#allocation4], 1 }
 0x404   :  { %1158 = vsyncpa [#allocation4 + $0x1], 1 }

// kernel: patch_sample_forward.3
= control target key start
LH: loop header
LB: loop body
LE: loop exit
PB: predicated region body
PF: predicated region fallthrough
CT: control target
= control target key end

     0   :  { %11 = vsyncpa [#allocation4], 0  ;;  %s2180_s0 = inlined_call_operand.vmem [shape: s32[64,1], index: 0, kind: input, shape index: {}]   ;;  %s2181_s1 = inlined_call_operand.vmem [shape: f32[2,256,64], index: 1, kind: input, shape index: {}]   ;;  %s2182_s2 = inlined_call_operand.vmem [shape: f32[64,256], index: 2, kind: input, shape index: {}]   ;;  %s2183_s3 = inlined_call_operand.vmem [shape: f32[1,256], index: 3, kind: input, shape index: {}]   ;;  %s2184_s4 = inlined_call_operand.vmem [shape: f32[256,256], index: 4, kind: input, shape index: {}]   ;;  %s2185_s5 = inlined_call_operand.vmem [shape: f32[1,256], index: 5, kind: input, shape index: {}]   ;;  %s2186_s6 = inlined_call_operand.hbm [shape: f32[2,64,256], index: 6, kind: output, shape index: {}]  }
   0x1   :  { %13 = vsyncpa [#allocation4 + $0x1], 0  ;;  %s1593_s21 = smov 0   ;;  %s1595_s22 = smov 0  }
   0x2   :  { %s1597_s23 = smov 0   ;;  %s1599_s24 = smov 0  }
   0x3   :  { %s1601_s25 = smov 0   ;;  %s1603_s26 = smov 0  }
   0x4 LB: > { %s1155_s27 = sadd.s32 4294967295, %s1550_s26   ;;  %s1156_s28 = sadd.s32 4294967294, %s1550_s26   ;;  %s1550_s26 = sphi %s1603_s26, %s19_s26   ;;  %s1546_s25 = sphi %s1601_s25, %s2193_s25   ;;  %s1542_s24 = sphi %s1599_s24, %s2192_s24   ;;  %s1538_s23 = sphi %s1597_s23, %s2191_s23   ;;  %s1534_s22 = sphi %s1595_s22, %s2190_s22   ;;  %s1530_s21 = sphi %s1593_s21, %s2189_s21  }
   0x5   : > { %s31_s29 = sadd.s32 1, %s1546_s25  ;;  %s171_s30 = sadd.s32 1, %s1538_s23 }
   0x6   : > { %p33_p0 = scmp.ge.s32.totalorder %s31_s29, 2  ;;  %p181_p1 = scmp.ne.s32.totalorder %s1538_s23, %s1534_s22 }
   0x7   : > { %p182_p2 = scmp.eq.s32.totalorder %s1155_s27, 1  ;;  %p187_p3 = scmp.ne.s32.totalorder %s1534_s22, %s1530_s21 }
   0x8   : > { %s2195_s29 = smov (%p33_p0, %s31_s29), 0  ;;  %p188_p5 = scmp.eq.s32.totalorder %s1156_s28, 1 }
   0x9   : > { %p1633_p4 = por %p182_p2, %p181_p1  ;;  %s168_s8 = ssub.s32 %s1546_s25, %s2195_s29 }
   0xa   : > { %p1159_p6 = scmp.ge.s32.totalorder %s1550_s26, 1  ;;  %p169_p7 = scmp.eq.s32.totalorder %s168_s8, 0 }
   0xb   : > { %p1640_p8 = por %p188_p5, %p187_p3  ;;  %p234_p9 = scmp.lt.s32.totalorder %s1550_s26, 3 }
   0xc   : > { %s1646_s10 = scalar_select %p169_p7, %s1538_s23, %s171_s30  }
   0xd   : > { %p235_p10 = pnand %p1159_p6, %p234_p9 }
   0xe   : > { %v293_v0 = vld [vmem:[%s2180_s0 + $0x10] sm:$0xff] (!%p235_p10)  ;;  %v291_v1 = vld [vmem:[%s2180_s0] sm:$0xff] (!%p235_p10)  ;;  %p269_p11 = scmp.lt.s32.totalorder (!%p235_p10), %s1542_s24, 1  ;;  %v1552_v2 = vmov (!%p235_p10), 0   ;;  %v294_v3 = vld [vmem:[%s2180_s0 + $0x18] sm:$0xff] (!%p235_p10)  ;;  %v300_v60 = vlaneseq (!%p235_p10)  ;;  %s265_s14 = sand.u32 (!%p235_p10), 1, %s1534_s22  }
   0xf   : > { %238 = sbr.rel (%p235_p10) target bundleno = 1023 (0x3ff), region = 44  ;;  %1439 = vset.pattern.permute.xlu1 (!%p235_p10), %v1552_v2  ;;  %1438 = vset.pattern.permute.xlu0 (!%p235_p10), %v1552_v2  ;;  %v292_v4 = vld [vmem:[%s2180_s0 + $0x8] sm:$0xff] (!%p235_p10)  ;;  %v295_v6 = vld [vmem:[%s2180_s0 + $0x20] sm:$0xff] (!%p235_p10)  ;;  %v298_v20 = vld [vmem:[%s2180_s0 + $0x38] sm:$0xff] (!%p235_p10)  ;;  %s1209_s17 = sshll.u32 (!%p235_p10), %s1542_s24, 11 }
  0x10   : > { %313 = vperm.xlu1 (!%p235_p10), %1439, %v293_v0   ;;  %307 = vperm.xlu0 (!%p235_p10), %1438, %v291_v1   ;;  %v296_v5 = vld [vmem:[%s2180_s0 + $0x28] sm:$0xff] (!%p235_p10)  ;;  %v297_v21 = vld [vmem:[%s2180_s0 + $0x30] sm:$0xff] (!%p235_p10)  ;;  %v554_v57 = vld [vmem:[%s2182_s2 + $0x18] sm:$0xff] (!%p235_p10)  ;;  %v1718_v61 = vand.u32 (!%p235_p10), 127, %v300_v60  ;;  %s2124_s27 = scalar_lea.hbm (!%p235_p10), %s2186_s6, %s1209_s17  ;;  %s1555_s30 = smov (!%p235_p10), [#allocation3]  }
  0x11   : > { %v552_v56 = vld [vmem:[%s2182_s2 + $0x8] sm:$0xff] (!%p235_p10)  ;;  %v551_v63 = vld [vmem:[%s2182_s2] sm:$0xff] (!%p235_p10)  ;;  %v553_v0 = vld [vmem:[%s2182_s2 + $0x10] sm:$0xff] (!%p235_p10)  ;;  %s1476_s8 = sshll.u32 (!%p235_p10), %s1555_s30, 4  ;;  %s1477_s8 = int_to_ptr.vmem [resolvable:$false] %s1476_s8 }
  0x12   : > { %v1298_v59 = vpack.c.bf16 (!%p235_p10), %v554_v57, %v552_v56  ;;  %v302_v62 = vadd.s32 (!%p235_p10), 128, %v1718_v61  ;;  %v556_v1 = vld [vmem:[%s2182_s2 + $0x28] sm:$0xff] (!%p235_p10)  ;;  %v558_v2 = vld [vmem:[%s2182_s2 + $0x38] sm:$0xff] (!%p235_p10)  ;;  %v748_v57 = vld [vmem:[%s2184_s4 + $0x80] sm:$0xff] (!%p235_p10)  ;;  %s1478_s11 = scalar_lea.vmem (!%p235_p10), %s1477_s8, 4096 }
  0x14   : > { %316 = vperm.xlu1 (!%p235_p10), %1439, %v294_v3   ;;  %310 = vperm.xlu0 (!%p235_p10), %1438, %v292_v4   ;;  %v1300_v4 = vpack.c.bf16 (!%p235_p10), %v553_v0, %v551_v63  ;;  %v752_v0 = vld [vmem:[%s2184_s4 + $0xa0] sm:$0xff] (!%p235_p10) }
  0x16   : > { %s270_s15 = scalar_select %p269_p11, %s1542_s24, 1 }
  0x17   : > { %s2134_s24 = scalar_lea.sflag [#allocation4], %s265_s14 }
  0x18   : > { %s1208_s20 = sshll.u32 %s270_s15, 8  ;;  %322 = vperm.xlu1 %1439, %v296_v5   ;;  %319 = vperm.xlu0 %1438, %v295_v6   ;;  %v1302_v5 = vpack.c.bf16 %v558_v2, %v556_v1  ;;  %v555_v6 = vld [vmem:[%s2182_s2 + $0x20] sm:$0xff]  ;;  %v754_v1 = vld [vmem:[%s2184_s4 + $0xb0] sm:$0xff]  ;;  %v757_v2 = vld [vmem:[%s2184_s4 + $0xc8] sm:$0xff]  ;;  %s1160_s15 = sshll.u32 %s265_s14, 7 }
  0x19   : > { %s1671_s13 = scalar_lea.vmem %s2181_s1, %s1208_s20  ;;  %s2091_s16 = scalar_lea.vmem [#allocation3], %s1160_s15 }
  0x1a   : > { %v402_v7 = vld [vmem:[%s1671_s13 + $0x80] sm:$0xff]  ;;  %v403_v8 = vld [vmem:[%s1671_s13 + $0x88] sm:$0xff]  ;;  %v404_v12 = vld [vmem:[%s1671_s13 + $0x90] sm:$0xff]  ;;  %s1079_s18 = sshll.u32 %s2091_s16, 4  ;;  %s2126_s18 = int_to_ptr.vmem [resolvable:$true] %s1079_s18 }
  0x1b   : > { %v386_v9 = vld [vmem:[%s1671_s13] sm:$0xff]  ;;  %v1266_v10 = vpack.c.bf16 %v403_v8, %v402_v7  ;;  %v387_v11 = vld [vmem:[%s1671_s13 + $0x8] sm:$0xff]  ;;  %v405_v13 = vld [vmem:[%s1671_s13 + $0x98] sm:$0xff]  ;;  %v1553_v8 = vmov 1.0   ;;  %s1472_s28 = scalar_lea.vmem %s2126_s18, 2048  ;;  %p1479_p1 = scmp.lt.s32.totalorder %s2126_s18, %s1477_s8 }
  0x1c   : > { %v1268_v14 = vpack.c.bf16 %v387_v11, %v386_v9  ;;  %v1270_v15 = vpack.c.bf16 %v405_v13, %v404_v12  ;;  %v388_v16 = vld [vmem:[%s1671_s13 + $0x10] sm:$0xff]  ;;  %v389_v17 = vld [vmem:[%s1671_s13 + $0x18] sm:$0xff]  ;;  %v406_v18 = vld [vmem:[%s1671_s13 + $0xa0] sm:$0xff]  ;;  %328 = vperm.xlu1 %1439, %v298_v20   ;;  %325 = vperm.xlu0 %1438, %v297_v21   ;;  %p1473_p12 = scmp.ne.s32.totalorder %s2126_s18, %s1472_s28  ;;  %p1480_p2 = scmp.lt.s32.totalorder %s1478_s11, %s1472_s28 }
  0x1d   : > { %1267 = vmatprep.subr.bf16.mxu0 %v1266_v10  ;;  %v407_v19 = vld [vmem:[%s1671_s13 + $0xa8] sm:$0xff]  ;;  %v1272_v22 = vpack.c.bf16 %v389_v17, %v388_v16  ;;  %v390_v24 = vld [vmem:[%s1671_s13 + $0x20] sm:$0xff]  ;;  %v408_v26 = vld [vmem:[%s1671_s13 + $0xb0] sm:$0xff] }
  0x1e   : > { %1269 = vmatpush3.bf16.msra.mxu0 %v1268_v14  ;;  %v1274_v23 = vpack.c.bf16 %v407_v19, %v406_v18  ;;  %v391_v25 = vld [vmem:[%s1671_s13 + $0x28] sm:$0xff]  ;;  %v409_v27 = vld [vmem:[%s1671_s13 + $0xb8] sm:$0xff]  ;;  %v392_v30 = vld [vmem:[%s1671_s13 + $0x30] sm:$0xff]  ;;  %p1474_p13 = pnand %p1473_p12, %p1633_p4  ;;  %p1481_p3 = por %p1480_p2, %p1479_p1 }
  0x1f   : > { %1271 = vmatprep.subr.bf16.mxu0 %v1270_v15  ;;  %v1276_v28 = vpack.c.bf16 %v391_v25, %v390_v24  ;;  %v1278_v29 = vpack.c.bf16 %v409_v27, %v408_v26  ;;  %v393_v31 = vld [vmem:[%s1671_s13 + $0x38] sm:$0xff]  ;;  %v410_v32 = vld [vmem:[%s1671_s13 + $0xc0] sm:$0xff]  ;;  %v411_v33 = vld [vmem:[%s1671_s13 + $0xc8] sm:$0xff] }
  0x20   : > { %v1280_v34 = vpack.c.bf16 %v393_v31, %v392_v30  ;;  %v1282_v35 = vpack.c.bf16 %v411_v33, %v410_v32  ;;  %v394_v36 = vld [vmem:[%s1671_s13 + $0x40] sm:$0xff]  ;;  %v395_v37 = vld [vmem:[%s1671_s13 + $0x48] sm:$0xff]  ;;  %v412_v38 = vld [vmem:[%s1671_s13 + $0xd0] sm:$0xff]  ;;  %p1475_p0 = pneg %p1474_p13 }
  0x21   : > { %v413_v39 = vld [vmem:[%s1671_s13 + $0xd8] sm:$0xff]  ;;  %v1284_v40 = vpack.c.bf16 %v395_v37, %v394_v36  ;;  %v396_v42 = vld [vmem:[%s1671_s13 + $0x50] sm:$0xff]  ;;  %v414_v44 = vld [vmem:[%s1671_s13 + $0xe0] sm:$0xff] }
  0x22   : > { %1273 = vmatpush3.bf16.msra.mxu0 %v1272_v22  ;;  %v1286_v41 = vpack.c.bf16 %v413_v39, %v412_v38  ;;  %v397_v43 = vld [vmem:[%s1671_s13 + $0x58] sm:$0xff]  ;;  %v415_v45 = vld [vmem:[%s1671_s13 + $0xe8] sm:$0xff]  ;;  %v398_v48 = vld [vmem:[%s1671_s13 + $0x60] sm:$0xff]  ;;  %p1482_p5 = pnand %p1481_p3, %p1475_p0 }
  0x23   : > { %1275 = vmatprep.subr.bf16.mxu0 %v1274_v23  ;;  %v1288_v46 = vpack.c.bf16 %v397_v43, %v396_v42  ;;  %v1290_v47 = vpack.c.bf16 %v415_v45, %v414_v44  ;;  %v399_v49 = vld [vmem:[%s1671_s13 + $0x68] sm:$0xff]  ;;  %v416_v50 = vld [vmem:[%s1671_s13 + $0xf0] sm:$0xff]  ;;  %v417_v51 = vld [vmem:[%s1671_s13 + $0xf8] sm:$0xff]  ;;  %v1554_v23 = vmov 0.0  }
  0x24   : > { %v1292_v52 = vpack.c.bf16 %v399_v49, %v398_v48  ;;  %v1294_v53 = vpack.c.bf16 %v417_v51, %v416_v50  ;;  %v400_v54 = vld [vmem:[%s1671_s13 + $0x70] sm:$0xff]  ;;  %v401_v55 = vld [vmem:[%s1671_s13 + $0x78] sm:$0xff]  ;;  %v560_v9 = vld [vmem:[%s2182_s2 + $0x48] sm:$0xff] }
  0x25   : > { %v1296_v58 = vpack.c.bf16 %v401_v55, %v400_v54  ;;  %v557_v7 = vld [vmem:[%s2182_s2 + $0x30] sm:$0xff]  ;;  %v562_v10 = vld [vmem:[%s2182_s2 + $0x58] sm:$0xff]  ;;  %v559_v15 = vld [vmem:[%s2182_s2 + $0x40] sm:$0xff] }
  0x26   : > { %1277 = vmatpush3.bf16.msra.mxu0 %v1276_v28  ;;  %v1304_v13 = vpack.c.bf16 %v557_v7, %v555_v6  ;;  %v1306_v14 = vpack.c.bf16 %v562_v10, %v560_v9  ;;  %v561_v16 = vld [vmem:[%s2182_s2 + $0x50] sm:$0xff]  ;;  %v564_v24 = vld [vmem:[%s2182_s2 + $0x68] sm:$0xff]  ;;  %v566_v25 = vld [vmem:[%s2182_s2 + $0x78] sm:$0xff] }
  0x27   : > { %1279 = vmatprep.subr.bf16.mxu0 %v1278_v29  ;;  %v1308_v17 = vpack.c.bf16 %v561_v16, %v559_v15  ;;  %v1310_v26 = vpack.c.bf16 %v566_v25, %v564_v24  ;;  %v563_v27 = vld [vmem:[%s2182_s2 + $0x60] sm:$0xff]  ;;  %v565_v28 = vld [vmem:[%s2182_s2 + $0x70] sm:$0xff]  ;;  %v733_v30 = vld [vmem:[%s2184_s4 + $0x8] sm:$0xff] }
  0x28   : > { %v1312_v29 = vpack.c.bf16 %v565_v28, %v563_v27  ;;  %v735_v31 = vld [vmem:[%s2184_s4 + $0x18] sm:$0xff]  ;;  %v732_v32 = vld [vmem:[%s2184_s4] sm:$0xff]  ;;  %v758_v7 = vld [vmem:[%s2184_s4 + $0xd0] sm:$0xff] }
  0x29   : > { %v1314_v33 = vpack.c.bf16 %v735_v31, %v733_v30  ;;  %v739_v36 = vld [vmem:[%s2184_s4 + $0x38] sm:$0xff]  ;;  %v736_v39 = vld [vmem:[%s2184_s4 + $0x20] sm:$0xff]  ;;  %v773_v27 = vld [vmem:[%s2184_s4 + $0x148] sm:$0xff] }
  0x2a   : > { %1281 = vmatpush3.bf16.msra.mxu0 %v1280_v34  ;;  %v734_v34 = vld [vmem:[%s2184_s4 + $0x10] sm:$0xff]  ;;  %v743_v42 = vld [vmem:[%s2184_s4 + $0x58] sm:$0xff]  ;;  %v740_v45 = vld [vmem:[%s2184_s4 + $0x40] sm:$0xff] }
  0x2b   : > { %1283 = vmatprep.subr.bf16.mxu0 %v1282_v35  ;;  %v737_v35 = vld [vmem:[%s2184_s4 + $0x28] sm:$0xff]  ;;  %v1316_v37 = vpack.c.bf16 %v734_v34, %v732_v32  ;;  %1315 = vmatprep.subr.bf16.mxu1 %v1314_v33  ;;  %v747_v48 = vld [vmem:[%s2184_s4 + $0x78] sm:$0xff]  ;;  %v744_v51 = vld [vmem:[%s2184_s4 + $0x60] sm:$0xff] }
  0x2c   : > { %v1318_v38 = vpack.c.bf16 %v739_v36, %v737_v35  ;;  %v751_v54 = vld [vmem:[%s2184_s4 + $0x98] sm:$0xff]  ;;  %v756_v6 = vld [vmem:[%s2184_s4 + $0xc0] sm:$0xff]  ;;  %v774_v32 = vld [vmem:[%s2184_s4 + $0x150] sm:$0xff] }
  0x2d   : > { %1317 = vmatpush1.bf16.msra.mxu1 %v1316_v37  ;;  %v763_v9 = vld [vmem:[%s2184_s4 + $0xf8] sm:$0xff]  ;;  %v1340_v10 = vpack.c.bf16 %v758_v7, %v756_v6  ;;  %v768_v25 = vld [vmem:[%s2184_s4 + $0x120] sm:$0xff]  ;;  %v777_v33 = vld [vmem:[%s2184_s4 + $0x168] sm:$0xff] }
  0x2e   : > { %1285 = vmatpush3.bf16.msra.mxu0 %v1284_v40  ;;  %v738_v40 = vld [vmem:[%s2184_s4 + $0x30] sm:$0xff]  ;;  %1319 = vmatprep.subr.bf16.mxu1 %v1318_v38  ;;  %v767_v15 = vld [vmem:[%s2184_s4 + $0x118] sm:$0xff]  ;;  %v772_v31 = vld [vmem:[%s2184_s4 + $0x140] sm:$0xff] }
  0x2f   : > { %1287 = vmatprep.subr.bf16.mxu0 %v1286_v41  ;;  %v741_v41 = vld [vmem:[%s2184_s4 + $0x48] sm:$0xff]  ;;  %v1320_v43 = vpack.c.bf16 %v738_v40, %v736_v39  ;;  %v775_v28 = vld [vmem:[%s2184_s4 + $0x158] sm:$0xff]  ;;  %v1356_v35 = vpack.c.bf16 %v774_v32, %v772_v31  ;;  %v776_v37 = vld [vmem:[%s2184_s4 + $0x160] sm:$0xff] }
  0x30   : > { %v1322_v44 = vpack.c.bf16 %v743_v42, %v741_v41  ;;  %v1354_v30 = vpack.c.bf16 %v775_v28, %v773_v27  ;;  %v779_v34 = vld [vmem:[%s2184_s4 + $0x178] sm:$0xff]  ;;  %v778_v38 = vld [vmem:[%s2184_s4 + $0x170] sm:$0xff]  ;;  %v781_v39 = vld [vmem:[%s2184_s4 + $0x188] sm:$0xff] }
  0x31   : > { %1321 = vmatpush1.bf16.msra.mxu1 %v1320_v43  ;;  %v1358_v36 = vpack.c.bf16 %v779_v34, %v777_v33  ;;  %v783_v40 = vld [vmem:[%s2184_s4 + $0x198] sm:$0xff]  ;;  %v1360_v41 = vpack.c.bf16 %v778_v38, %v776_v37  ;;  %v780_v43 = vld [vmem:[%s2184_s4 + $0x180] sm:$0xff] }
  0x32   : > { %1289 = vmatpush3.bf16.msra.mxu0 %v1288_v46  ;;  %v742_v46 = vld [vmem:[%s2184_s4 + $0x50] sm:$0xff]  ;;  %1323 = vmatprep.subr.bf16.mxu1 %v1322_v44  ;;  %v1362_v42 = vpack.c.bf16 %v783_v40, %v781_v39 }
  0x33   : > { %1291 = vmatprep.subr.bf16.mxu0 %v1290_v47  ;;  %v745_v47 = vld [vmem:[%s2184_s4 + $0x68] sm:$0xff]  ;;  %v1324_v49 = vpack.c.bf16 %v742_v46, %v740_v45  ;;  %v782_v44 = vld [vmem:[%s2184_s4 + $0x190] sm:$0xff]  ;;  %v787_v46 = vld [vmem:[%s2184_s4 + $0x1b8] sm:$0xff] }
  0x34   : > { %v1326_v50 = vpack.c.bf16 %v747_v48, %v745_v47  ;;  %v785_v45 = vld [vmem:[%s2184_s4 + $0x1a8] sm:$0xff]  ;;  %v1364_v47 = vpack.c.bf16 %v782_v44, %v780_v43 }
  0x35   : > { %1325 = vmatpush1.bf16.msra.mxu1 %v1324_v49  ;;  %v1366_v48 = vpack.c.bf16 %v787_v46, %v785_v45  ;;  %v784_v49 = vld [vmem:[%s2184_s4 + $0x1a0] sm:$0xff]  ;;  %v793_v44 = vld [vmem:[%s2184_s4 + $0x1e8] sm:$0xff] }
  0x36   : > { %1293 = vmatpush3.bf16.msra.mxu0 %v1292_v52  ;;  %v746_v52 = vld [vmem:[%s2184_s4 + $0x70] sm:$0xff]  ;;  %1327 = vmatprep.subr.bf16.mxu1 %v1326_v50  ;;  %v792_v46 = vld [vmem:[%s2184_s4 + $0x1e0] sm:$0xff] }
  0x37   : > { %1295 = vmatprep.subr.bf16.mxu0 %v1294_v53  ;;  %v749_v53 = vld [vmem:[%s2184_s4 + $0x88] sm:$0xff]  ;;  %v1328_v55 = vpack.c.bf16 %v746_v52, %v744_v51  ;;  %v786_v50 = vld [vmem:[%s2184_s4 + $0x1b0] sm:$0xff]  ;;  %v791_v52 = vld [vmem:[%s2184_s4 + $0x1d8] sm:$0xff] }
  0x38   : > { %v1330_v56 = vpack.c.bf16 %v751_v54, %v749_v53  ;;  %v789_v51 = vld [vmem:[%s2184_s4 + $0x1c8] sm:$0xff]  ;;  %v1368_v53 = vpack.c.bf16 %v786_v50, %v784_v49  ;;  %v2004_v49 = vshrl.u32 %v300_v60, 7 }
  0x39   : > { %1329 = vmatpush1.bf16.msra.mxu1 %v1328_v55  ;;  %v1370_v54 = vpack.c.bf16 %v791_v52, %v789_v51  ;;  %v567_v51 = vld [vmem:[%s2183_s3] sm:$0x3] }
  0x3a   : > { %1297 = vmatpush3.bf16.msra.mxu0 %v1296_v58  ;;  %v750_v58 = vld [vmem:[%s2184_s4 + $0x90] sm:$0xff]  ;;  %1331 = vmatprep.subr.bf16.mxu1 %v1330_v56  ;;  %v571_v50 = vsub.s32 0, %v2004_v49  ;;  %v575_v52 = vsub.s32 1, %v2004_v49 }
  0x3b   : > { %1299 = vmatprep.subr.bf16.mxu0 %v1298_v59  ;;  %v753_v59 = vld [vmem:[%s2184_s4 + $0xa8] sm:$0xff] }
  0x8f   : > { %v308_v3 = vpop.permute.xlu0 %307  ;;  %v314_v11 = vpop.permute.xlu1 %313 }
  0x90   : > { %vm330_vm0 = vcmp.eq.s32.totalorder %v1718_v61, %v308_v3  ;;  %vm331_vm1 = vcmp.eq.s32.totalorder %v302_v62, %v308_v3  ;;  %vm335_vm2 = vcmp.eq.s32.totalorder %v302_v62, %v314_v11  ;;  %vm334_vm5 = vcmp.eq.s32.totalorder %v1718_v61, %v314_v11  ;;  %v759_v3 = vld [vmem:[%s2184_s4 + $0xd8] sm:$0xff] }
  0x91   : > { %1179 = vmatprep.mubr.msk.f32.mxu0 %vm331_vm1, %v1553_v8 }
  0x92   : > { %1180 = vmatmul.mubr.msk.f32.vlgmr.msra.gmra.mrb[0].mxu0 %vm330_vm0, %v1553_v8  ;;  %vm282_vm0 = vcmask 523264  }
  0x93   : > { %v311_v12 = vpop.permute.xlu0 %310  ;;  %1301 = vmatpush1.bf16.msra.mxu0 %v1300_v4  ;;  %v317_v18 = vpop.permute.xlu1 %316  ;;  %283 = vst.msk [vmem:[#allocation2] sm:$0xff] %vm282_vm0, %v1554_v23  ;;  %284 = vst.msk [vmem:[#allocation2 + $0x8] sm:$0xff] %vm282_vm0, %v1554_v23  ;;  %v1336_v4 = vpack.c.bf16 %v754_v1, %v752_v0 }
  0x94   : > { %vm332_vm3 = vcmp.eq.s32.totalorder %v1718_v61, %v311_v12  ;;  %vm333_vm4 = vcmp.eq.s32.totalorder %v302_v62, %v311_v12  ;;  %1303 = vmatprep.subr.bf16.mxu0 %v1302_v5  ;;  %vm337_vm6 = vcmp.eq.s32.totalorder %v302_v62, %v317_v18  ;;  %vm336_vm7 = vcmp.eq.s32.totalorder %v1718_v61, %v317_v18  ;;  %v760_v12 = vld [vmem:[%s2184_s4 + $0xe0] sm:$0xff] }
  0x95   : > { %1181 = vmatprep.mubr.msk.f32.mxu0 %vm333_vm4, %v1553_v8  ;;  %285 = vst.msk [vmem:[#allocation2 + $0x10] sm:$0xff] %vm282_vm0, %v1554_v23  ;;  %286 = vst.msk [vmem:[#allocation2 + $0x18] sm:$0xff] %vm282_vm0, %v1554_v23  ;;  %v1338_v5 = vpack.c.bf16 %v759_v3, %v757_v2  ;;  %v764_v18 = vld [vmem:[%s2184_s4 + $0x100] sm:$0xff] }
  0x96   : > { %1182 = vmatmul.mubr.msk.f32.gmra.mrb[2].mxu0 %vm332_vm3, %v1553_v8  ;;  %287 = vst.msk [vmem:[#allocation2 + $0x20] sm:$0xff] %vm282_vm0, %v1554_v23  ;;  %288 = vst.msk [vmem:[#allocation2 + $0x28] sm:$0xff] %vm282_vm0, %v1554_v23 }
  0x97   : > { %1183 = vmatprep.mubr.msk.f32.mxu0 %vm335_vm2, %v1553_v8  ;;  %1305 = vmatpush1.bf16.msra.mxu0 %v1304_v13  ;;  %v320_v19 = vpop.permute.xlu0 %319  ;;  %v323_v20 = vpop.permute.xlu1 %322  ;;  %289 = vst.msk [vmem:[#allocation2 + $0x30] sm:$0xff] %vm282_vm0, %v1554_v23  ;;  %290 = vst.msk [vmem:[#allocation2 + $0x38] sm:$0xff] %vm282_vm0, %v1554_v23  ;;  %v762_v13 = vld [vmem:[%s2184_s4 + $0xf0] sm:$0xff] }
  0x98   : > { %1307 = vmatprep.subr.bf16.mxu0 %v1306_v14  ;;  %vm339_vm8 = vcmp.eq.s32.totalorder %v302_v62, %v320_v19  ;;  %vm338_vm9 = vcmp.eq.s32.totalorder %v1718_v61, %v320_v19  ;;  %vm341_vm10 = vcmp.eq.s32.totalorder %v302_v62, %v323_v20  ;;  %vm340_vm11 = vcmp.eq.s32.totalorder %v1718_v61, %v323_v20  ;;  %v765_v14 = vld [vmem:[%s2184_s4 + $0x108] sm:$0xff]  ;;  %v766_v19 = vld [vmem:[%s2184_s4 + $0x110] sm:$0xff] }
  0x99   : > { %v1344_v16 = vpack.c.bf16 %v762_v13, %v760_v12  ;;  %v769_v20 = vld [vmem:[%s2184_s4 + $0x128] sm:$0xff] }
  0x9a   : > { %1184 = vmatmul.mubr.msk.f32.gmra.mrb[4].mxu0 %vm334_vm5, %v1553_v8  ;;  %v378_v56 = vld [vmem:[#allocation2] sm:$0xff] }
  0x9b   : > { %1185 = vmatprep.mubr.msk.f32.mxu0 %vm337_vm6, %v1553_v8  ;;  %1309 = vmatpush1.bf16.msra.mxu0 %v1308_v17  ;;  %v326_v21 = vpop.permute.xlu0 %325  ;;  %v329_v22 = vpop.permute.xlu1 %328  ;;  %v1346_v17 = vpack.c.bf16 %v767_v15, %v765_v14 }
  0x9c   : > { %vm343_vm12 = vcmp.eq.s32.totalorder %v302_v62, %v326_v21  ;;  %vm342_vm13 = vcmp.eq.s32.totalorder %v1718_v61, %v326_v21  ;;  %vm345_vm14 = vcmp.eq.s32.totalorder %v302_v62, %v329_v22  ;;  %vm344_vm15 = vcmp.eq.s32.totalorder %v1718_v61, %v329_v22  ;;  %1311 = vmatprep.subr.bf16.mxu0 %v1310_v26  ;;  %v755_v61 = vld [vmem:[%s2184_s4 + $0xb8] sm:$0xff]  ;;  %v770_v26 = vld [vmem:[%s2184_s4 + $0x130] sm:$0xff] }
  0x9d   : > { %v1332_v62 = vpack.c.bf16 %v750_v58, %v748_v57  ;;  %v1334_v63 = vpack.c.bf16 %v755_v61, %v753_v59  ;;  %v771_v21 = vld [vmem:[%s2184_s4 + $0x138] sm:$0xff]  ;;  %v1348_v22 = vpack.c.bf16 %v766_v19, %v764_v18  ;;  %v380_v3 = vld [vmem:[#allocation2 + $0x10] sm:$0xff]  ;;  %v382_v14 = vld [vmem:[#allocation2 + $0x20] sm:$0xff] }
  0x9e   : > { %1186 = vmatmul.mubr.msk.f32.gmra.mrb[6].mxu0 %vm336_vm7, %v1553_v8  ;;  %v1350_v24 = vpack.c.bf16 %v771_v21, %v769_v20  ;;  %v383_v20 = vld [vmem:[#allocation2 + $0x28] sm:$0xff]  ;;  %v384_v27 = vld [vmem:[#allocation2 + $0x30] sm:$0xff]  ;;  %v385_v33 = vld [vmem:[#allocation2 + $0x38] sm:$0xff] }
  0x9f   : > { %1187 = vmatprep.mubr.msk.f32.mxu0 %vm339_vm8, %v1553_v8  ;;  %1313 = vmatpush1.bf16.msra.mxu0 %v1312_v29  ;;  %v1352_v29 = vpack.c.bf16 %v770_v26, %v768_v25 }
  0xa0   : > { %1333 = vmatpush1.bf16.msra.mxu1 %v1332_v62  ;;  %v379_v62 = vld [vmem:[#allocation2 + $0x8] sm:$0xff] }
  0xa1   : > { %1335 = vmatprep.subr.bf16.mxu1 %v1334_v63 }
  0xa2   : > { %1188 = vmatmul.mubr.msk.f32.gmra.mrb[8].mxu0 %vm338_vm9, %v1553_v8 }
  0xa3   : > { %1189 = vmatprep.mubr.msk.f32.mxu0 %vm341_vm10, %v1553_v8 }
  0xa4   : > { %1337 = vmatpush1.bf16.msra.mxu1 %v1336_v4 }
  0xa5   : > { %1339 = vmatprep.subr.bf16.mxu1 %v1338_v5 }
  0xa6   : > { %1190 = vmatmul.mubr.msk.f32.gmra.mrb[10].mxu0 %vm340_vm11, %v1553_v8 }
  0xa7   : > { %1191 = vmatprep.mubr.msk.f32.mxu0 %vm343_vm12, %v1553_v8 }
  0xa8   : > { %1341 = vmatpush1.bf16.msra.mxu1 %v1340_v10 }
  0xaa   : > { %1192 = vmatmul.mubr.msk.f32.gmra.mrb[12].mxu0 %vm342_vm13, %v1553_v8 }
  0xab   : > { %1193 = vmatprep.mubr.msk.f32.mxu0 %vm345_vm14, %v1553_v8 }
  0xae   : > { %1194 = vmatmul.mubr.msk.f32.gmra.mrb[14].mxu0 %vm344_vm15, %v1553_v8  ;;  %v761_v8 = vld [vmem:[%s2184_s4 + $0xe8] sm:$0xff] }
  0xaf   : > { %667 = vmatprep.mubr.f32.mxu0 %v1554_v23  ;;  %v1342_v11 = vpack.c.bf16 %v763_v9, %v761_v8  ;;  %v381_v8 = vld [vmem:[#allocation2 + $0x18] sm:$0xff] }
  0xb1   : > { %1343 = vmatprep.subr.bf16.mxu1 %v1342_v11 }
  0xb2   : > { %1345 = vmatpush1.bf16.msra.mxu1 %v1344_v16 }
  0xb3   : > { %1347 = vmatprep.subr.bf16.mxu1 %v1346_v17 }
  0xb6   : > { %1349 = vmatpush1.bf16.msra.mxu1 %v1348_v22 }
  0xb7   : > { %1351 = vmatprep.subr.bf16.mxu1 %v1350_v24 }
  0xba   : > { %1353 = vmatpush1.bf16.msra.mxu1 %v1352_v29 }
  0xbb   : > { %1355 = vmatprep.subr.bf16.mxu1 %v1354_v30 }
  0xbe   : > { %1357 = vmatpush1.bf16.msra.mxu1 %v1356_v35 }
  0xbf   : > { %1359 = vmatprep.subr.bf16.mxu1 %v1358_v36 }
  0xc2   : > { %1361 = vmatpush1.bf16.msra.mxu1 %v1360_v41  ;;  %v788_v41 = vld [vmem:[%s2184_s4 + $0x1c0] sm:$0xff] }
  0xc3   : > { %1363 = vmatprep.subr.bf16.mxu1 %v1362_v42  ;;  %v790_v42 = vld [vmem:[%s2184_s4 + $0x1d0] sm:$0xff] }
  0xc4   : > { %v1372_v43 = vpack.c.bf16 %v790_v42, %v788_v41 }
  0xc6   : > { %1365 = vmatpush1.bf16.msra.mxu1 %v1364_v47  ;;  %v794_v47 = vld [vmem:[%s2184_s4 + $0x1f0] sm:$0xff] }
  0xc7   : > { %1367 = vmatprep.subr.bf16.mxu1 %v1366_v48  ;;  %v1376_v48 = vpack.c.bf16 %v794_v47, %v792_v46 }
  0xca   : > { %1369 = vmatpush1.bf16.msra.mxu1 %v1368_v53  ;;  %v572_v53 = vrot.slane %v567_v51, %v571_v50 }
  0xcb   : > { %1371 = vmatprep.subr.bf16.mxu1 %v1370_v54  ;;  %v576_v54 = vrot.slane %v567_v51, %v575_v52 }
  0xce   : > { %1373 = vmatpush1.bf16.msra.mxu1 %v1372_v43 }
 0x165   : > { %v1242_v55 = vpop.f32.mrb[0].mxu0 }
 0x166   : > { %v1243_v57 = vpop.f32.mrb[1].mxu0 }
 0x167   : > { %v1244_v58 = vadd.f32 %v1243_v57, %v1242_v55 }
 0x169   : > { %v523_v59 = vadd.f32 %v1244_v58, %v378_v56  ;;  %v1245_v61 = vpop.f32.mrb[2].mxu0 }
 0x16a   : > { %v1246_v63 = vpop.f32.mrb[3].mxu0 }
 0x16b   : > { %532 = vst.msk [vmem:[#allocation2] sm:$0xff] %vm282_vm0, %v523_v59  ;;  %v1247_v0 = vadd.f32 %v1246_v63, %v1245_v61 }
 0x16d   : > { %v524_v1 = vadd.f32 %v1247_v0, %v379_v62  ;;  %v1248_v2 = vpop.f32.mrb[4].mxu0 }
 0x16e   : > { %v1249_v4 = vpop.f32.mrb[5].mxu0 }
 0x16f   : > { %533 = vst.msk [vmem:[#allocation2 + $0x8] sm:$0xff] %vm282_vm0, %v524_v1  ;;  %v1250_v5 = vadd.f32 %v1249_v4, %v1248_v2 }
 0x171   : > { %v525_v6 = vadd.f32 %v1250_v5, %v380_v3  ;;  %v1251_v7 = vpop.f32.mrb[6].mxu0 }
 0x172   : > { %v1252_v9 = vpop.f32.mrb[7].mxu0  ;;  %v543_v10 = vld [vmem:[#allocation2] sm:$0xff] }
 0x173   : > { %534 = vst.msk [vmem:[#allocation2 + $0x10] sm:$0xff] %vm282_vm0, %v525_v6  ;;  %v1253_v11 = vadd.f32 %v1252_v9, %v1251_v7  ;;  %1195 = vmatmul.mubr.msk.f32.vlgmr.msra.gmra.mrb[16].mxu0 %vm282_vm0, %v543_v10 }
 0x174   : > { %673 = vmatprep.mubr.f32.mxu0 %v1554_v23 }
 0x175   : > { %v526_v12 = vadd.f32 %v1253_v11, %v381_v8  ;;  %v1254_v13 = vpop.f32.mrb[8].mxu0 }
 0x176   : > { %v1255_v15 = vpop.f32.mrb[9].mxu0  ;;  %v544_v16 = vld [vmem:[#allocation2 + $0x8] sm:$0xff] }
 0x177   : > { %535 = vst.msk [vmem:[#allocation2 + $0x18] sm:$0xff] %vm282_vm0, %v526_v12  ;;  %v1256_v17 = vadd.f32 %v1255_v15, %v1254_v13  ;;  %1196 = vmatmul.mubr.msk.f32.gmra.mrb[18].mxu0 %vm282_vm0, %v544_v16 }
 0x178   : > { %679 = vmatprep.mubr.f32.mxu0 %v1554_v23 }
 0x179   : > { %v527_v18 = vadd.f32 %v1256_v17, %v382_v14  ;;  %v1257_v19 = vpop.f32.mrb[10].mxu0 }
 0x17a   : > { %v1258_v21 = vpop.f32.mrb[11].mxu0  ;;  %v545_v22 = vld [vmem:[#allocation2 + $0x10] sm:$0xff] }
 0x17b   : > { %536 = vst.msk [vmem:[#allocation2 + $0x20] sm:$0xff] %vm282_vm0, %v527_v18  ;;  %v1259_v24 = vadd.f32 %v1258_v21, %v1257_v19  ;;  %1197 = vmatmul.mubr.msk.f32.gmra.mrb[20].mxu0 %vm282_vm0, %v545_v22 }
 0x17c   : > { %685 = vmatprep.mubr.f32.mxu0 %v1554_v23 }
 0x17d   : > { %v528_v25 = vadd.f32 %v1259_v24, %v383_v20  ;;  %v1260_v26 = vpop.f32.mrb[12].mxu0 }
 0x17e   : > { %v1261_v28 = vpop.f32.mrb[13].mxu0  ;;  %v546_v29 = vld [vmem:[#allocation2 + $0x18] sm:$0xff] }
 0x17f   : > { %537 = vst.msk [vmem:[#allocation2 + $0x28] sm:$0xff] %vm282_vm0, %v528_v25  ;;  %v1262_v30 = vadd.f32 %v1261_v28, %v1260_v26  ;;  %1198 = vmatmul.mubr.msk.f32.gmra.mrb[22].mxu0 %vm282_vm0, %v546_v29 }
 0x180   : > { %691 = vmatprep.mubr.f32.mxu0 %v1554_v23 }
 0x181   : > { %v529_v31 = vadd.f32 %v1262_v30, %v384_v27  ;;  %v1263_v32 = vpop.f32.mrb[14].mxu0 }
 0x182   : > { %v1264_v34 = vpop.f32.mrb[15].mxu0  ;;  %v547_v35 = vld [vmem:[#allocation2 + $0x20] sm:$0xff] }
 0x183   : > { %538 = vst.msk [vmem:[#allocation2 + $0x30] sm:$0xff] %vm282_vm0, %v529_v31  ;;  %v1265_v36 = vadd.f32 %v1264_v34, %v1263_v32  ;;  %1199 = vmatmul.mubr.msk.f32.gmra.mrb[24].mxu0 %vm282_vm0, %v547_v35 }
 0x184   : > { %697 = vmatprep.mubr.f32.mxu0 %v1554_v23 }
 0x185   : > { %v530_v37 = vadd.f32 %v1265_v36, %v385_v33 }
 0x186   : > { %v548_v38 = vld [vmem:[#allocation2 + $0x28] sm:$0xff] }
 0x187   : > { %539 = vst.msk [vmem:[#allocation2 + $0x38] sm:$0xff] %vm282_vm0, %v530_v37  ;;  %1200 = vmatmul.mubr.msk.f32.gmra.mrb[26].mxu0 %vm282_vm0, %v548_v38 }
 0x188   : > { %703 = vmatprep.mubr.f32.mxu0 %v1554_v23 }
 0x18a   : > { %v549_v39 = vld [vmem:[#allocation2 + $0x30] sm:$0xff] }
 0x18b   : > { %1201 = vmatmul.mubr.msk.f32.gmra.mrb[28].mxu0 %vm282_vm0, %v549_v39 }
 0x18c   : > { %709 = vmatprep.mubr.f32.mxu0 %v1554_v23  ;;  %v795_v23 = vld [vmem:[%s2184_s4 + $0x1f8] sm:$0xff] }
 0x18d   : > { %v1374_v45 = vpack.c.bf16 %v795_v23, %v793_v44 }
 0x18e   : > { %v550_v40 = vld [vmem:[#allocation2 + $0x38] sm:$0xff] }
 0x18f   : > { %1202 = vmatmul.mubr.msk.f32.gmra.mrb[30].mxu0 %vm282_vm0, %v550_v40  ;;  %1375 = vmatprep.subr.bf16.mxu1 %v1374_v45  ;;  %v796_v40 = vld [vmem:[%s2185_s5] sm:$0x3] }
 0x190   : > { %1377 = vmatpush1.bf16.msra.mxu1 %v1376_v48  ;;  %v801_v41 = vrot.slane %v796_v40, %v571_v50  ;;  %v805_v42 = vrot.slane %v796_v40, %v575_v52 }
 0x246   : > { %v669_v55 = vpop.f32.mrb[16].mxu0 }
 0x247   : > { %v670_v56 = vadd.f32 %v669_v55, %v572_v53  ;;  %v671_v57 = vpop.f32.mrb[17].mxu0 }
 0x248   : > { %v672_v58 = vadd.f32 %v671_v57, %v576_v54 }
 0x249   : > { %v716_v61 = vmax.f32 %v670_v56, 0.0 }
 0x24a   : > { %v675_v60 = vpop.f32.mrb[18].mxu0  ;;  %v717_v59 = vmax.f32 %v672_v58, 0.0 }
 0x24b   : > { %v676_v62 = vadd.f32 %v675_v60, %v572_v53  ;;  %v677_v63 = vpop.f32.mrb[19].mxu0 }
 0x24c   : > { %v678_v0 = vadd.f32 %v677_v63, %v576_v54  ;;  %872 = vmatprep.mubr.f32.mxu1 %v717_v59 }
 0x24d   : > { %873 = vmatmul.mubr.f32.vlgmr.msra.gmra.mrb[0].mxu1 %v716_v61  ;;  %v718_v3 = vmax.f32 %v676_v62, 0.0 }
 0x24e   : > { %v719_v1 = vmax.f32 %v678_v0, 0.0  ;;  %v681_v2 = vpop.f32.mrb[20].mxu0 }
 0x24f   : > { %v682_v4 = vadd.f32 %v681_v2, %v572_v53  ;;  %v683_v5 = vpop.f32.mrb[21].mxu0 }
 0x250   : > { %v684_v6 = vadd.f32 %v683_v5, %v576_v54  ;;  %878 = vmatprep.mubr.f32.mxu1 %v719_v1 }
 0x251   : > { %879 = vmatmul.mubr.f32.gmra.mrb[2].mxu1 %v718_v3  ;;  %v720_v9 = vmax.f32 %v682_v4, 0.0 }
 0x252   : > { %v721_v7 = vmax.f32 %v684_v6, 0.0  ;;  %v687_v8 = vpop.f32.mrb[22].mxu0 }
 0x253   : > { %v688_v10 = vadd.f32 %v687_v8, %v572_v53  ;;  %v689_v11 = vpop.f32.mrb[23].mxu0 }
 0x254   : > { %v690_v12 = vadd.f32 %v689_v11, %v576_v54  ;;  %884 = vmatprep.mubr.f32.mxu1 %v721_v7 }
 0x255   : > { %885 = vmatmul.mubr.f32.gmra.mrb[4].mxu1 %v720_v9  ;;  %v722_v15 = vmax.f32 %v688_v10, 0.0 }
 0x256   : > { %v723_v13 = vmax.f32 %v690_v12, 0.0  ;;  %v693_v14 = vpop.f32.mrb[24].mxu0 }
 0x257   : > { %v694_v16 = vadd.f32 %v693_v14, %v572_v53  ;;  %v695_v17 = vpop.f32.mrb[25].mxu0 }
 0x258   : > { %v696_v18 = vadd.f32 %v695_v17, %v576_v54  ;;  %890 = vmatprep.mubr.f32.mxu1 %v723_v13 }
 0x259   : > { %891 = vmatmul.mubr.f32.gmra.mrb[6].mxu1 %v722_v15  ;;  %v724_v21 = vmax.f32 %v694_v16, 0.0 }
 0x25a   : > { %v725_v19 = vmax.f32 %v696_v18, 0.0  ;;  %v699_v20 = vpop.f32.mrb[26].mxu0 }
 0x25b   : > { %v700_v22 = vadd.f32 %v699_v20, %v572_v53  ;;  %v701_v24 = vpop.f32.mrb[27].mxu0 }
 0x25c   : > { %v702_v25 = vadd.f32 %v701_v24, %v576_v54  ;;  %896 = vmatprep.mubr.f32.mxu1 %v725_v19 }
 0x25d   : > { %897 = vmatmul.mubr.f32.gmra.mrb[8].mxu1 %v724_v21  ;;  %v726_v28 = vmax.f32 %v700_v22, 0.0 }
 0x25e   : > { %v727_v26 = vmax.f32 %v702_v25, 0.0  ;;  %v705_v27 = vpop.f32.mrb[28].mxu0 }
 0x25f   : > { %v706_v29 = vadd.f32 %v705_v27, %v572_v53  ;;  %v707_v30 = vpop.f32.mrb[29].mxu0 }
 0x260   : > { %v708_v31 = vadd.f32 %v707_v30, %v576_v54  ;;  %902 = vmatprep.mubr.f32.mxu1 %v727_v26 }
 0x261   : > { %903 = vmatmul.mubr.f32.gmra.mrb[10].mxu1 %v726_v28  ;;  %v728_v34 = vmax.f32 %v706_v29, 0.0 }
 0x262   : > { %v729_v32 = vmax.f32 %v708_v31, 0.0  ;;  %v711_v33 = vpop.f32.mrb[30].mxu0 }
 0x263   : > { %v712_v35 = vadd.f32 %v711_v33, %v572_v53  ;;  %v713_v36 = vpop.f32.mrb[31].mxu0 }
 0x264   : > { %v714_v37 = vadd.f32 %v713_v36, %v576_v54  ;;  %908 = vmatprep.mubr.f32.mxu1 %v729_v32 }
 0x265   : > { %909 = vmatmul.mubr.f32.gmra.mrb[12].mxu1 %v728_v34  ;;  %v730_v39 = vmax.f32 %v712_v35, 0.0 }
 0x266   : > { %v731_v38 = vmax.f32 %v714_v37, 0.0 }
 0x268   : > { %914 = vmatprep.mubr.f32.mxu1 %v731_v38 }
 0x269   : > { %915 = vmatmul.mubr.f32.gmra.mrb[14].mxu1 %v730_v39 }
 0x320   : > { %v874_v43 = vpop.f32.mrb[0].mxu1 }
 0x321   : > { %v2022_v44 = vadd.f32 %v874_v43, %v801_v41  ;;  %v876_v23 = vpop.f32.mrb[1].mxu1 }
 0x322   : > { %v2024_v45 = vadd.f32 %v876_v23, %v805_v42 }
 0x323   : > { %v921_v46 = vmul.f32 %v2022_v44, %v2022_v44 }
 0x324   : > { %v922_v47 = vmul.f32 %v2024_v45, %v2024_v45  ;;  %v880_v48 = vpop.f32.mrb[2].mxu1 }
 0x325   : > { %v2030_v51 = vadd.f32 %v880_v48, %v801_v41  ;;  %v882_v53 = vpop.f32.mrb[3].mxu1 }
 0x326   : > { %v2032_v50 = vadd.f32 %v882_v53, %v805_v42  ;;  %v937_v49 = vadd.f32 %v922_v47, %v921_v46 }
 0x327   : > { %v923_v52 = vmul.f32 %v2030_v51, %v2030_v51 }
 0x328   : > { %v924_v54 = vmul.f32 %v2032_v50, %v2032_v50  ;;  %v886_v55 = vpop.f32.mrb[4].mxu1  ;;  %938 = vadd.xlane.f32.xlu0 %v937_v49 }
 0x329   : > { %v2038_v56 = vadd.f32 %v886_v55, %v801_v41  ;;  %v888_v57 = vpop.f32.mrb[5].mxu1 }
 0x32a   : > { %v2040_v58 = vadd.f32 %v888_v57, %v805_v42  ;;  %v940_v60 = vadd.f32 %v924_v54, %v923_v52 }
 0x32b   : > { %v925_v59 = vmul.f32 %v2038_v56, %v2038_v56 }
 0x32c   : > { %v926_v61 = vmul.f32 %v2040_v58, %v2040_v58  ;;  %v892_v62 = vpop.f32.mrb[6].mxu1  ;;  %941 = vadd.xlane.f32.xlu1 %v940_v60 }
 0x32d   : > { %v2046_v63 = vadd.f32 %v892_v62, %v801_v41  ;;  %v894_v0 = vpop.f32.mrb[7].mxu1 }
 0x32e   : > { %v2048_v1 = vadd.f32 %v894_v0, %v805_v42  ;;  %v943_v2 = vadd.f32 %v926_v61, %v925_v59 }
 0x32f   : > { %v927_v3 = vmul.f32 %v2046_v63, %v2046_v63 }
 0x330   : > { %v928_v4 = vmul.f32 %v2048_v1, %v2048_v1  ;;  %v898_v5 = vpop.f32.mrb[8].mxu1  ;;  %944 = vadd.xlane.f32.xlu0 %v943_v2 }
 0x331   : > { %v2054_v6 = vadd.f32 %v898_v5, %v801_v41  ;;  %v900_v7 = vpop.f32.mrb[9].mxu1 }
 0x332   : > { %v2056_v8 = vadd.f32 %v900_v7, %v805_v42  ;;  %v946_v9 = vadd.f32 %v928_v4, %v927_v3 }
 0x333   : > { %v929_v10 = vmul.f32 %v2054_v6, %v2054_v6 }
 0x334   : > { %v930_v11 = vmul.f32 %v2056_v8, %v2056_v8  ;;  %v904_v12 = vpop.f32.mrb[10].mxu1  ;;  %947 = vadd.xlane.f32.xlu0 %v946_v9 }
 0x335   : > { %v2062_v13 = vadd.f32 %v904_v12, %v801_v41  ;;  %v906_v14 = vpop.f32.mrb[11].mxu1 }
 0x336   : > { %v2064_v15 = vadd.f32 %v906_v14, %v805_v42  ;;  %v949_v16 = vadd.f32 %v930_v11, %v929_v10 }
 0x337   : > { %v931_v17 = vmul.f32 %v2062_v13, %v2062_v13 }
 0x338   : > { %v932_v18 = vmul.f32 %v2064_v15, %v2064_v15  ;;  %v910_v19 = vpop.f32.mrb[12].mxu1  ;;  %950 = vadd.xlane.f32.xlu1 %v949_v16 }
 0x339   : > { %v2070_v20 = vadd.f32 %v910_v19, %v801_v41  ;;  %v912_v21 = vpop.f32.mrb[13].mxu1 }
 0x33a   : > { %v2072_v22 = vadd.f32 %v912_v21, %v805_v42  ;;  %v952_v24 = vadd.f32 %v932_v18, %v931_v17 }
 0x33b   : > { %v933_v25 = vmul.f32 %v2070_v20, %v2070_v20 }
 0x33c   : > { %v934_v26 = vmul.f32 %v2072_v22, %v2072_v22  ;;  %v916_v27 = vpop.f32.mrb[14].mxu1  ;;  %953 = vadd.xlane.f32.xlu0 %v952_v24 }
 0x33d   : > { %v2078_v28 = vadd.f32 %v916_v27, %v801_v41  ;;  %v918_v29 = vpop.f32.mrb[15].mxu1 }
 0x33e   : > { %v2080_v30 = vadd.f32 %v918_v29, %v805_v42  ;;  %v955_v31 = vadd.f32 %v934_v26, %v933_v25 }
 0x33f   : > { %v935_v32 = vmul.f32 %v2078_v28, %v2078_v28 }
 0x340   : > { %v936_v33 = vmul.f32 %v2080_v30, %v2080_v30  ;;  %956 = vadd.xlane.f32.xlu1 %v955_v31 }
 0x342   : > { %v958_v34 = vadd.f32 %v936_v33, %v935_v32 }
 0x344   : > { %959 = vadd.xlane.f32.xlu0 %v958_v34 }
 0x3b5   : > { %v939_v35 = vpop.xlane.xlu0 %938 }
 0x3b6   : > { %1440 = vrsqrt.f32 %v939_v35  ;;  %vm963_vm1 = vcmp.eq.f32.partialorder %v939_v35, inf  ;;  %v966_v41 = vand.u32 2147483648, %v939_v35  ;;  %vm965_vm2 = vcmp.eq.f32.partialorder %v939_v35, 0.0 }
 0x3b9   : > { %v942_v36 = vpop.xlane.xlu1 %941 }
 0x3ba   : > { %1442 = vrsqrt.f32 %v942_v36  ;;  %vm970_vm3 = vcmp.eq.f32.partialorder %v942_v36, inf  ;;  %v973_v53 = vand.u32 2147483648, %v942_v36  ;;  %vm972_vm4 = vcmp.eq.f32.partialorder %v942_v36, 0.0 }
 0x3bd   : > { %v945_v37 = vpop.xlane.xlu0 %944 }
 0x3be   : > { %1444 = vrsqrt.f32 %v945_v37  ;;  %vm977_vm5 = vcmp.eq.f32.partialorder %v945_v37, inf  ;;  %v980_v59 = vand.u32 2147483648, %v945_v37  ;;  %vm979_vm6 = vcmp.eq.f32.partialorder %v945_v37, 0.0 }
 0x3c0   : > { %v1441_v38 = vpop.eup %1440 }
 0x3c1   : > { %v962_v39 = vmul.f32 %v1441_v38, %v939_v35  ;;  %v948_v40 = vpop.xlane.xlu0 %947 }
 0x3c2   : > { %1446 = vrsqrt.f32 %v948_v40  ;;  %vm984_vm7 = vcmp.eq.f32.partialorder %v948_v40, inf  ;;  %v987_v5 = vand.u32 2147483648, %v948_v40  ;;  %vm986_vm8 = vcmp.eq.f32.partialorder %v948_v40, 0.0 }
 0x3c3   : > { %v964_v42 = vsel %vm963_vm1, %v939_v35, %v962_v39 }
 0x3c4   : > { %v1443_v43 = vpop.eup %1442  ;;  %v967_v23 = vsel %vm965_vm2, %v966_v41, %v964_v42 }
 0x3c5   : > { %v1017_v46 = vadd.f32 1e-07, %v967_v23  ;;  %v969_v47 = vmul.f32 %v1443_v43, %v942_v36  ;;  %v951_v48 = vpop.xlane.xlu1 %950 }
 0x3c6   : > { %1448 = vrsqrt.f32 %v951_v48  ;;  %vm991_vm9 = vcmp.eq.f32.partialorder %v951_v48, inf  ;;  %v994_v19 = vand.u32 2147483648, %v951_v48  ;;  %vm993_vm10 = vcmp.eq.f32.partialorder %v951_v48, 0.0 }
 0x3c7   : > { %1450 = vrcp.f32 %v1017_v46  ;;  %v971_v49 = vsel %vm970_vm3, %v942_v36, %v969_v47 }
 0x3c8   : > { %v1445_v52 = vpop.eup %1444  ;;  %v974_v54 = vsel %vm972_vm4, %v973_v53, %v971_v49 }
 0x3c9   : > { %v1018_v55 = vadd.f32 1e-07, %v974_v54  ;;  %v976_v57 = vmul.f32 %v1445_v52, %v945_v37  ;;  %v954_v60 = vpop.xlane.xlu0 %953 }
 0x3ca   : > { %1452 = vrsqrt.f32 %v954_v60  ;;  %vm998_vm11 = vcmp.eq.f32.partialorder %v954_v60, inf  ;;  %v1001_v31 = vand.u32 2147483648, %v954_v60  ;;  %vm1000_vm12 = vcmp.eq.f32.partialorder %v954_v60, 0.0 }
 0x3cb   : > { %1454 = vrcp.f32 %v1018_v55  ;;  %v978_v61 = vsel %vm977_vm5, %v945_v37, %v976_v57 }
 0x3cc   : > { %v1447_v62 = vpop.eup %1446  ;;  %v981_v0 = vsel %vm979_vm6, %v980_v59, %v978_v61 }
 0x3cd   : > { %v1019_v2 = vadd.f32 1e-07, %v981_v0  ;;  %v983_v3 = vmul.f32 %v1447_v62, %v948_v40  ;;  %v957_v4 = vpop.xlane.xlu1 %956 }
 0x3ce   : > { %1456 = vrsqrt.f32 %v957_v4  ;;  %vm1005_vm13 = vcmp.eq.f32.partialorder %v957_v4, inf  ;;  %vm1007_vm14 = vcmp.eq.f32.partialorder %v957_v4, 0.0 }
 0x3cf   : > { %1458 = vrcp.f32 %v1019_v2  ;;  %v985_v7 = vsel %vm984_vm7, %v948_v40, %v983_v3 }
 0x3d0   : > { %v1449_v9 = vpop.eup %1448  ;;  %v988_v10 = vsel %vm986_vm8, %v987_v5, %v985_v7 }
 0x3d1   : > { %v1451_v11 = vpop.eup %1450  ;;  %v1020_v12 = vadd.f32 1e-07, %v988_v10  ;;  %v990_v14 = vmul.f32 %v1449_v9, %v951_v48  ;;  %v960_v16 = vpop.xlane.xlu0 %959 }
 0x3d2   : > { %v1026_v17 = vmul.f32 %v1451_v11, %v2022_v44  ;;  %v1027_v18 = vmul.f32 %v1451_v11, %v2024_v45  ;;  %1460 = vrsqrt.f32 %v960_v16  ;;  %vm1012_vm15 = vcmp.eq.f32.partialorder %v960_v16, inf }
 0x3d3   : > { %1462 = vrcp.f32 %v1020_v12  ;;  %v992_v21 = vsel %vm991_vm9, %v951_v48, %v990_v14  ;;  %vm1014_vm0 = vcmp.eq.f32.partialorder %v960_v16, 0.0 }
 0x3d4   : > { %v1453_v24 = vpop.eup %1452  ;;  %1049 = vst [vmem:[%s2091_s16] sm:$0xff] %v1026_v17  ;;  %1050 = vst [vmem:[%s2091_s16 + $0x8] sm:$0xff] %v1027_v18  ;;  %v995_v25 = vsel %vm993_vm10, %v994_v19, %v992_v21 }
 0x3d5   : > { %v1455_v26 = vpop.eup %1454  ;;  %v1021_v27 = vadd.f32 1e-07, %v995_v25  ;;  %v997_v44 = vmul.f32 %v1453_v24, %v954_v60 }
 0x3d6   : > { %v1029_v45 = vmul.f32 %v1455_v26, %v2030_v51  ;;  %v1030_v29 = vmul.f32 %v1455_v26, %v2032_v50  ;;  %v1008_v50 = vand.u32 2147483648, %v957_v4 }
 0x3d7   : > { %1464 = vrcp.f32 %v1021_v27  ;;  %v999_v32 = vsel %vm998_vm11, %v954_v60, %v997_v44 }
 0x3d8   : > { %v1457_v33 = vpop.eup %1456  ;;  %1051 = vst [vmem:[%s2091_s16 + $0x10] sm:$0xff] %v1029_v45  ;;  %1052 = vst [vmem:[%s2091_s16 + $0x18] sm:$0xff] %v1030_v29  ;;  %v1002_v34 = vsel %vm1000_vm12, %v1001_v31, %v999_v32 }
 0x3d9   : > { %v1459_v35 = vpop.eup %1458  ;;  %v1022_v36 = vadd.f32 1e-07, %v1002_v34  ;;  %v1004_v37 = vmul.f32 %v1457_v33, %v957_v4 }
 0x3da   : > { %v1032_v38 = vmul.f32 %v1459_v35, %v2038_v56  ;;  %v1033_v51 = vmul.f32 %v1459_v35, %v2040_v58  ;;  %v1015_v58 = vand.u32 2147483648, %v960_v16 }
 0x3db   : > { %1466 = vrcp.f32 %v1022_v36  ;;  %v1006_v39 = vsel %vm1005_vm13, %v957_v4, %v1004_v37 }
 0x3dc   : > { %v1461_v40 = vpop.eup %1460  ;;  %1053 = vst [vmem:[%s2091_s16 + $0x20] sm:$0xff] %v1032_v38  ;;  %1054 = vst [vmem:[%s2091_s16 + $0x28] sm:$0xff] %v1033_v51  ;;  %v1009_v41 = vsel %vm1007_vm14, %v1008_v50, %v1006_v39 }
 0x3dd   : > { %v1463_v42 = vpop.eup %1462  ;;  %v1023_v43 = vadd.f32 1e-07, %v1009_v41  ;;  %v1011_v23 = vmul.f32 %v1461_v40, %v960_v16 }
 0x3de   : > { %v1035_v46 = vmul.f32 %v1463_v42, %v2046_v63  ;;  %v1036_v56 = vmul.f32 %v1463_v42, %v2048_v1 }
 0x3df   : > { %1468 = vrcp.f32 %v1023_v43  ;;  %v1013_v47 = vsel %vm1012_vm15, %v960_v16, %v1011_v23 }
 0x3e0   : > { %1055 = vst [vmem:[%s2091_s16 + $0x30] sm:$0xff] %v1035_v46  ;;  %1056 = vst [vmem:[%s2091_s16 + $0x38] sm:$0xff] %v1036_v56  ;;  %v1016_v48 = vsel %vm1014_vm0, %v1015_v58, %v1013_v47 }
 0x3e1   : > { %v1465_v53 = vpop.eup %1464  ;;  %v1024_v49 = vadd.f32 1e-07, %v1016_v48 }
 0x3e2   : > { %v1038_v63 = vmul.f32 %v1465_v53, %v2054_v6  ;;  %v1039_v1 = vmul.f32 %v1465_v53, %v2056_v8 }
 0x3e3   : > { %1470 = vrcp.f32 %v1024_v49 }
 0x3e4   : > { %1057 = vst [vmem:[%s2091_s16 + $0x40] sm:$0xff] %v1038_v63  ;;  %1058 = vst [vmem:[%s2091_s16 + $0x48] sm:$0xff] %v1039_v1 }
 0x3e5   : > { %v1467_v52 = vpop.eup %1466 }
 0x3e6   : > { %v1041_v54 = vmul.f32 %v1467_v52, %v2062_v13  ;;  %v1042_v55 = vmul.f32 %v1467_v52, %v2064_v15 }
 0x3e8   : > { %1059 = vst [vmem:[%s2091_s16 + $0x50] sm:$0xff] %v1041_v54  ;;  %1060 = vst [vmem:[%s2091_s16 + $0x58] sm:$0xff] %v1042_v55 }
 0x3e9   : > { %v1469_v57 = vpop.eup %1468 }
 0x3ea   : > { %v1044_v60 = vmul.f32 %v1469_v57, %v2070_v20  ;;  %v1045_v6 = vmul.f32 %v1469_v57, %v2072_v22 }
 0x3ec   : > { %1061 = vst [vmem:[%s2091_s16 + $0x60] sm:$0xff] %v1044_v60  ;;  %1062 = vst [vmem:[%s2091_s16 + $0x68] sm:$0xff] %v1045_v6 }
 0x3ed   : > { %v1471_v8 = vpop.eup %1470 }
 0x3ee   : > { %v1047_v13 = vmul.f32 %v1471_v8, %v2078_v28  ;;  %v1048_v15 = vmul.f32 %v1471_v8, %v2080_v30 }
 0x3f0   : > { %1063 = vst [vmem:[%s2091_s16 + $0x70] sm:$0xff] %v1047_v13  ;;  %1064 = vst [vmem:[%s2091_s16 + $0x78] sm:$0xff] %v1048_v15 }
 0x3f1   : > { %1485 = shalt.err (!%p1482_p5)
}
 0x3f2   : > { %s1486_s12 = scalar_lea.hbm %s2124_s27, 2048  ;;  %s1490_s15 = scalar_lea.hbm %s2186_s6, 4096 }
 0x3f3   : > { %p1487_p6 = scmp.ne.s32.totalorder %s2124_s27, %s1486_s12  ;;  %p1491_p10 = scmp.lt.u32.totalorder %s2124_s27, %s2186_s6 }
 0x3f4   : > { %p1492_p11 = scmp.lt.u32.totalorder %s1490_s15, %s1486_s12  ;;  %p1494_p13 = scmp.lt.u32.totalorder %s1486_s12, %s2124_s27 }
 0x3f5   : > { %p1488_p7 = pnand %p1487_p6, %p1633_p4 }
 0x3f6   : > { %p1493_p12 = por %p1492_p11, %p1491_p10 }
 0x3f7   : > { %p1489_p9 = pneg %p1488_p7 }
 0x3f8   : > { %p1495_p0 = por %p1494_p13, %p1493_p12 }
 0x3fa   : > { %p1496_p1 = pnand %p1495_p0, %p1489_p9 }
 0x3fc   : > { %1499 = shalt.err (!%p1496_p1)
}
 0x3fd   : > { %s1556_s19 = smov 256   ;;  %s1557_s20 = smov 16  }
 0x3fe   : > { %1378 = dma.vmem_to_hbm [thread:$0]  (%p1633_p4), %s2126_s18, 2048, %s2124_s27, %s2134_s24, %s1556_s19, %s1556_s19, %s1557_s20  }
 0x3ff PF: > { %p1384_p2 = scmp.ge.s32.totalorder %s1550_s26, 2  ;;  %s1094_s28 = sand.u32 1, %s1530_s21  }
 0x400   : > { %s1095_s30 = scalar_lea.sflag [#allocation4], %s1094_s28 }
 0x401   : > { %p1381_p3 = pnand %p1384_p2, %p1640_p8 }
 0x403   : > { %1525 = dma.done.wait (!%p1381_p3), %s1095_s30, 2048  }
 0x404   : > { %1527 = vsyncadd (!%p1381_p3), %s1095_s30, 4294965248  ;;  %s19_s26 = sadd.s32 1, %s1550_s26   ;;  %s2189_s21 = smov %s1534_s22 }
 0x405   : > { %p16_p5 = scmp.ge.s32.totalorder %s19_s26, 4   ;;  %s2190_s22 = smov %s1538_s23 }
 0x406   : > { %s2191_s23 = smov %s1646_s10  ;;  %s2192_s24 = smov %s1546_s25 }
 0x407   : > { %s2193_s25 = smov %s2195_s29  ;;  %18 = sbr.rel (!%p16_p5) target bundleno = 4 (0x4), region = 87 }
 0x40e   :  { %1100 = vsyncpa [#allocation4], 1 }
 0x40f   :  { %1102 = vsyncpa [#allocation4 + $0x1], 1 }

</bundles_post_ra>
